<compile_context>
chip_gen: v5e
topology: v5e:2x2
jax: 0.10.0
libtpu: 0.0.40
codegen_flags: <defaults>
</compile_context>

<pallas_src>
import functools

import numpy as np
import jax
import jax.numpy as jnp
from jax import lax
from jax.experimental import pallas as pl
from jax.experimental.pallas import tpu as pltpu

EPS = 1e-5
F1 = 8             # conv1 output channels
D = 2              # depth multiplier
C2 = F1 * D        # 16
H_EEG = 30         # EEG electrode rows (depthconv kernel height)
K1, PAD1 = 64, 32  # conv1 temporal kernel / padding
K3, PAD3 = 16, 8   # separable temporal kernel / padding


# ------------------------------ fused kernel ---------------------------------

def _eegnet_fused_kernel(xb_ref, wtoe_ref, selbt_ref, g1_ref, b1_ref, wd_ref,
                         dmask_ref, bsumt_ref, g2_ref, b2_ref, p4_ref, ws_ref,
                         vmask_ref, g3_ref, b3_ref, p8t_ref, cplace_ref,
                         out_ref, *, n, w1, p1, w2, wp, eps):
    # xb_ref   : (H, n*Tp)            bf16, padded input, cols = n*Tp + t
    # wtoe_ref : (n*Tp, F1*n*w1)      bf16, banded Toeplitz, cols = (f, n, w)
    # selbt_ref: (F1, F1*n*w1)        0/1 per-f column-block selector
    # wd_ref   : (C2, H)              depth-conv taps
    # dmask_ref: (C2, F1*n*w1)        0/1 own-group mask
    # bsumt_ref: (n*w1, F1*n*w1)      0/1 fold of the F1 column blocks
    # p4_ref   : (n*w1, n*blk+K3)     avg_pool(1,4)/4 + zero-pad placement
    # ws_ref   : (C2, K3)             separable depthwise taps
    # vmask_ref: (1, n*blk)           1 on the n*w2 valid separable outputs
    # p8t_ref  : (wp, n, n*blk)       avg_pool(1,8)/8 gathers, one slab per q
    # cplace_ref:(wp, C2, C2*wp)      0/1 feature placement c -> c*wp + q
    # g*/b*    : BN affine params
    f32 = jnp.float32
    nw1 = n * w1
    blk = p1 + 2 * PAD3                 # padded width per batch element (32)
    l3 = n * blk
    cnt1 = float(H_EEG * n * w1)
    cnt2 = float(n * w1)
    cnt3 = float(n * w2)
    dn_bt = (((1,), (1,)), ((), ()))    # contract last dims of both ("A @ B^T")

    def _elu(v):
        return jnp.where(v > 0, v, jnp.exp(jnp.minimum(v, 0.0)) - 1.0)

    # ---- stage 1: conv1 (1x64, pad 32) as ONE MXU matmul ---------------------
    acc1 = jnp.dot(xb_ref[...], wtoe_ref[...],
                   preferred_element_type=f32)                  # (H, F1*n*w1)

    # ---- BN1 (batch stats, per conv1 channel f, two-pass) --------------------
    selbt = selbt_ref[...]
    colsum = jnp.sum(acc1, axis=0, keepdims=True)               # (1, F1*n*w1)
    mu_f = lax.dot_general(colsum, selbt, dn_bt,
                           preferred_element_type=f32) / cnt1   # (1, F1)
    mu_cols = jnp.dot(mu_f, selbt, preferred_element_type=f32)  # (1, F1*n*w1)
    d1 = acc1 - mu_cols
    var_f = lax.dot_general(jnp.sum(d1 * d1, axis=0, keepdims=True), selbt,
                            dn_bt, preferred_element_type=f32) / cnt1
    s_f = g1_ref[...] * lax.rsqrt(var_f + eps)                  # (1, F1)
    t_f = b1_ref[...] - mu_f * s_f
    scale_cols = jnp.dot(s_f, selbt, preferred_element_type=f32)
    shift_cols = jnp.dot(t_f, selbt, preferred_element_type=f32)

    # ---- stage 2: grouped (30x1) depth-conv as one MXU matmul ----------------
    # BN1 is a per-column affine, so it is folded in after the row contraction.
    wd = wd_ref[...]                                            # (C2, H)
    full = jnp.dot(wd, acc1, preferred_element_type=f32)        # (C2, F1*n*w1)
    full = full * scale_cols + jnp.sum(wd, axis=1, keepdims=True) * shift_cols
    # keep each channel's own group block and fold the F1 blocks down
    a2 = lax.dot_general(full * dmask_ref[...], bsumt_ref[...], dn_bt,
                         preferred_element_type=f32)            # (C2, n*w1)

    # ---- BN2 + ELU -----------------------------------------------------------
    mu2 = jnp.sum(a2, axis=1, keepdims=True) / cnt2
    d2 = a2 - mu2
    var2 = jnp.sum(d2 * d2, axis=1, keepdims=True) / cnt2
    e2 = _elu(d2 * (g2_ref[...] * lax.rsqrt(var2 + eps)) + b2_ref[...])
    # TODO(synk): dropout(p=0.5) is identity here (inference semantics).

    # ---- avg_pool(1,4) + zero-pad placement: one tiny pooling matmul ---------
    z2p = jnp.dot(e2, p4_ref[...], preferred_element_type=f32)  # (C2, l3+K3)

    # ---- stage 3: separable depthwise (1x16, pad 8) --------------------------
    # Per-channel taps cannot be expressed as a single 2-D matmul (the weight
    # would have to vary per lhs row); a 16-tap shift-FMA over ~2 vregs is
    # negligible next to the MXU stages above.
    wsv = ws_ref[...]                                           # (C2, K3)
    acc3 = jnp.zeros((C2, l3), f32)
    for k in range(K3):
        acc3 = acc3 + wsv[:, k:k + 1] * z2p[:, k:k + l3]

    # ---- BN3 + ELU (stats only over the n*W2 valid positions) ----------------
    vm = vmask_ref[...]                                         # (1, l3)
    mu3 = jnp.sum(acc3 * vm, axis=1, keepdims=True) / cnt3
    c3 = acc3 - mu3
    cm = c3 * vm
    var3 = jnp.sum(cm * cm, axis=1, keepdims=True) / cnt3
    e3 = _elu(c3 * (g3_ref[...] * lax.rsqrt(var3 + eps)) + b3_ref[...])

    # ---- avg_pool(1,8) + flatten placement: tiny matmul pairs ----------------
    logits = jnp.zeros((n, C2 * wp), f32)
    for q in range(wp):
        tq = lax.dot_general(p8t_ref[q], e3, dn_bt,
                             preferred_element_type=f32)        # (n, C2)
        logits = logits + jnp.dot(tq, cplace_ref[q], preferred_element_type=f32)

    # ---- log-softmax over the flattened features, per batch row --------------
    mx = jnp.max(logits, axis=1, keepdims=True)
    z = logits - mx
    lse = jnp.log(jnp.sum(jnp.exp(z), axis=1, keepdims=True))
    out_ref[...] = z - lse


# ------------------------------ host wrapper ----------------------------------

def _build_static_mats(n, t):
    """Shape-only 0/1 and pooling matrices (built with numpy at trace time)."""
    w1 = t + 2 * PAD1 - K1 + 1
    p1 = w1 // 4
    w2 = p1 + 2 * PAD3 - K3 + 1
    wp = w2 // 8
    nw1 = n * w1
    blk = p1 + 2 * PAD3
    l3 = n * blk

    selbt = np.zeros((F1, F1 * nw1), np.float32)
    for f in range(F1):
        selbt[f, f * nw1:(f + 1) * nw1] = 1.0

    dmask = np.zeros((C2, F1 * nw1), np.float32)
    for c in range(C2):
        f = c // D
        dmask[c, f * nw1:(f + 1) * nw1] = 1.0

    bsumt = np.zeros((nw1, F1 * nw1), np.float32)
    for f in range(F1):
        bsumt[np.arange(nw1), f * nw1 + np.arange(nw1)] = 1.0

    # avg_pool(1,4) with floor (drops w = w1-1) and placement into the 8-zero
    # padded per-batch blocks the separable conv reads.
    p4 = np.zeros((nw1, l3 + K3), np.float32)
    for nn in range(n):
        for p in range(p1):
            for j in range(4):
                p4[nn * w1 + 4 * p + j, nn * blk + PAD3 + p] = 0.25

    vmask = np.zeros((1, l3), np.float32)
    for nn in range(n):
        vmask[0, nn * blk:nn * blk + w2] = 1.0

    # avg_pool(1,8) with floor (keeps windows q = 0..wp-1 over v = 0..8*wp-1)
    p8t = np.zeros((wp, n, l3), np.float32)
    for q in range(wp):
        for nn in range(n):
            p8t[q, nn, nn * blk + 8 * q:nn * blk + 8 * q + 8] = 1.0 / 8.0

    cplace = np.zeros((wp, C2, C2 * wp), np.float32)
    for q in range(wp):
        for c in range(C2):
            cplace[q, c, c * wp + q] = 1.0

    return selbt, dmask, bsumt, p4, vmask, p8t, cplace


def eegnet_forward_pallas(x, params):
    N, _, H, T = x.shape
    assert H == H_EEG
    TP = T + 2 * PAD1                   # padded time length (= K of stage 1)
    W1 = TP - K1 + 1                    # conv1 output width (= T + 1)
    P1 = W1 // 4                        # after avg_pool(1,4)
    W2 = P1 + 2 * PAD3 - K3 + 1         # separable conv output width
    WP = W2 // 8                        # after avg_pool(1,8)

    selbt, dmask, bsumt, p4, vmask, p8t, cplace = _build_static_mats(N, T)

    # (N,1,H,T) -> (H,N,T) -> zero-pad time -> (H, N*TP), bf16 for the MXU.
    xhb = jnp.pad(jnp.transpose(x[:, 0], (1, 0, 2)),
                  ((0, 0), (0, 0), (PAD1, PAD1)))
    xhb = xhb.reshape(H_EEG, N * TP).astype(jnp.bfloat16)

    # Banded Toeplitz for conv1 (cross-correlation):  wtoe[(n',t),(f,n,w)] =
    # w1[f, t-w] * delta(n,n').  Batch is folded block-diagonally into K; this
    # is the small-batch formulation — for large N tile the batch over a grid.
    t_idx = np.arange(TP)[:, None]
    w_idx = np.arange(W1)[None, :]
    k = t_idx - w_idx
    band = jnp.asarray((k >= 0) & (k < K1), jnp.float32)        # (TP, W1)
    kc = np.clip(k, 0, K1 - 1)
    toe = params["w1"][:, kc] * band                            # (F1, TP, W1)
    eye_n = np.eye(N, dtype=np.float32)
    wtoe = jnp.einsum("ftw,nm->ntfmw", toe, eye_n)
    wtoe = wtoe.reshape(N * TP, F1 * N * W1).astype(jnp.bfloat16)

    kern = functools.partial(_eegnet_fused_kernel, n=N, w1=W1, p1=P1, w2=W2,
                             wp=WP, eps=EPS)
    vmem = pl.BlockSpec(memory_space=pltpu.MemorySpace.VMEM)
    out = pl.pallas_call(
        kern,
        in_specs=[vmem] * 17,
        out_specs=vmem,
        out_shape=jax.ShapeDtypeStruct((N, C2 * WP), jnp.float32),
        compiler_params=pltpu.CompilerParams(
            vmem_limit_bytes=32 * 1024 * 1024),
    )(xhb, wtoe,
      jnp.asarray(selbt),
      params["g1"].reshape(1, F1), params["b1"].reshape(1, F1),
      params["wdep"],
      jnp.asarray(dmask), jnp.asarray(bsumt),
      params["g2"].reshape(C2, 1), params["b2"].reshape(C2, 1),
      jnp.asarray(p4),
      params["ws"],
      jnp.asarray(vmask),
      params["g3"].reshape(C2, 1), params["b3"].reshape(C2, 1),
      jnp.asarray(p8t), jnp.asarray(cplace))
    return out


# ------------------------------ pure-JAX reference ----------------------------

def _bn_ref(x, g, b):
    m = jnp.mean(x, axis=(0, 2, 3), keepdims=True)
    v = jnp.mean((x - m) ** 2, axis=(0, 2, 3), keepdims=True)
    return (x - m) / jnp.sqrt(v + EPS) * g.reshape(1, -1, 1, 1) + b.reshape(1, -1, 1, 1)


def _elu_ref(x):
    return jnp.where(x > 0, x, jnp.exp(jnp.minimum(x, 0.0)) - 1.0)


def _pool_w_ref(x, k):
    wo = x.shape[-1] // k
    return jnp.mean(x[..., : wo * k].reshape(x.shape[:-1] + (wo, k)), axis=-1)


def eegnet_forward_reference(x, params):
    dn = ("NCHW", "OIHW", "NCHW")
    y = lax.conv_general_dilated(x, params["w1"].reshape(F1, 1, 1, K1),
                                 (1, 1), [(0, 0), (PAD1, PAD1)],
                                 dimension_numbers=dn)
    y = _bn_ref(y, params["g1"], params["b1"])
    y = lax.conv_general_dilated(y, params["wdep"].reshape(C2, 1, H_EEG, 1),
                                 (1, 1), [(0, 0), (0, 0)],
                                 dimension_numbers=dn, feature_group_count=F1)
    y = _bn_ref(y, params["g2"], params["b2"])
    y = _elu_ref(y)
    y = _pool_w_ref(y, 4)
    y = lax.conv_general_dilated(y, params["ws"].reshape(C2, 1, 1, K3),
                                 (1, 1), [(0, 0), (PAD3, PAD3)],
                                 dimension_numbers=dn, feature_group_count=C2)
    y = _bn_ref(y, params["g3"], params["b3"])
    y = _elu_ref(y)
    y = _pool_w_ref(y, 8)
    y = y.reshape(y.shape[0], -1)
    return jax.nn.log_softmax(y, axis=1)


# ---------------------------------- main ---------------------------------------

if __name__ == "__main__":
    key = jax.random.PRNGKey(0)
    keys = jax.random.split(key, 10)
    N, T = 2, 64
    x = jax.random.normal(keys[0], (N, 1, H_EEG, T), jnp.float32)
    params = {
        "w1":   0.1 * jax.random.normal(keys[1], (F1, K1), jnp.float32),
        "wdep": 0.2 * jax.random.normal(keys[2], (C2, H_EEG), jnp.float32),
        "ws":   0.2 * jax.random.normal(keys[3], (C2, K3), jnp.float32),
        "g1": 1.0 + 0.1 * jax.random.normal(keys[4], (F1,), jnp.float32),
        "b1": 0.1 * jax.random.normal(keys[5], (F1,), jnp.float32),
        "g2": 1.0 + 0.1 * jax.random.normal(keys[6], (C2,), jnp.float32),
        "b2": 0.1 * jax.random.normal(keys[7], (C2,), jnp.float32),
        "g3": 1.0 + 0.1 * jax.random.normal(keys[8], (C2,), jnp.float32),
        "b3": 0.1 * jax.random.normal(keys[9], (C2,), jnp.float32),
    }

    fwd = jax.jit(eegnet_forward_pallas)
    out = jax.block_until_ready(fwd(x, params))
    ref = jax.block_until_ready(eegnet_forward_reference(x, params))

    expected_feats = C2 * ((((T + 1) // 4) + 1) // 8)    # 16 * 2 = 32
    assert out.shape == (N, expected_feats), out.shape
    err = float(jnp.max(jnp.abs(out - ref)))
    # Stage-1 matmul operands are bf16 (perf-review item); f32 operands match
    # the reference below 1e-2, bf16 stays comfortably below 3e-2.
    assert err < 3e-2, f"max abs error vs reference: {err}"
    print("KERNEL_OK")
</pallas_src>

<mosaic_0001>
module attributes {stable_mosaic.version = 11 : i64} {
  func.func @_eegnet_fused_kernel(%arg0: memref<30x256xbf16, #tpu.memory_space<vmem>>, %arg1: memref<256x1040xbf16, #tpu.memory_space<vmem>>, %arg2: memref<8x1040xf32, #tpu.memory_space<vmem>>, %arg3: memref<1x8xf32, #tpu.memory_space<vmem>>, %arg4: memref<1x8xf32, #tpu.memory_space<vmem>>, %arg5: memref<16x30xf32, #tpu.memory_space<vmem>>, %arg6: memref<16x1040xf32, #tpu.memory_space<vmem>>, %arg7: memref<130x1040xf32, #tpu.memory_space<vmem>>, %arg8: memref<16x1xf32, #tpu.memory_space<vmem>>, %arg9: memref<16x1xf32, #tpu.memory_space<vmem>>, %arg10: memref<130x80xf32, #tpu.memory_space<vmem>>, %arg11: memref<16x16xf32, #tpu.memory_space<vmem>>, %arg12: memref<1x64xf32, #tpu.memory_space<vmem>>, %arg13: memref<16x1xf32, #tpu.memory_space<vmem>>, %arg14: memref<16x1xf32, #tpu.memory_space<vmem>>, %arg15: memref<2x2x64xf32, #tpu.memory_space<vmem>>, %arg16: memref<2x16x32xf32, #tpu.memory_space<vmem>>, %arg17: memref<2x32xf32, #tpu.memory_space<vmem>>) attributes {dimension_semantics = [], scalar_prefetch = 0 : i64, scratch_operands = 0 : i64, tpu.core_type = #tpu.core_type<tc>} {
    %c0 = arith.constant 0 : index
    %c0_0 = arith.constant 0 : index
    %0 = vector.load %arg0[%c0, %c0_0] : memref<30x256xbf16, #tpu.memory_space<vmem>>, vector<30x256xbf16>
    %c0_1 = arith.constant 0 : index
    %c0_2 = arith.constant 0 : index
    %1 = vector.load %arg1[%c0_1, %c0_2] : memref<256x1040xbf16, #tpu.memory_space<vmem>>, vector<256x1040xbf16>
    %cst = arith.constant dense<0.000000e+00> : vector<30x1040xf32>
    %2 = tpu.matmul %0, %1, %cst {dimension_numbers = #tpu.dot_dimension_numbers<[1], [0], [0], [1], [0, 0, 1, 1], [], []>} : vector<30x256xbf16>, vector<256x1040xbf16>, vector<30x1040xf32> -> vector<30x1040xf32>
    %c0_3 = arith.constant 0 : index
    %c0_4 = arith.constant 0 : index
    %3 = vector.load %arg2[%c0_3, %c0_4] : memref<8x1040xf32, #tpu.memory_space<vmem>>, vector<8x1040xf32>
    %cst_5 = arith.constant dense<0.000000e+00> : vector<1040xf32>
    %4 = vector.multi_reduction <add>, %2, %cst_5 [0] : vector<30x1040xf32> to vector<1040xf32>
    %5 = vector.shape_cast %4 : vector<1040xf32> to vector<1x1040xf32>
    %cst_6 = arith.constant dense<0.000000e+00> : vector<1x8xf32>
    %6 = tpu.matmul %5, %3, %cst_6 {dimension_numbers = #tpu.dot_dimension_numbers<[1], [1], [0], [0], [0, 0, 1, 0], [], []>} : vector<1x1040xf32>, vector<8x1040xf32>, vector<1x8xf32> -> vector<1x8xf32>
    %cst_7 = arith.constant 3.900000e+03 : f32
    %7 = vector.broadcast %cst_7 : f32 to vector<1x8xf32>
    %8 = arith.divf %6, %7 : vector<1x8xf32>
    %cst_8 = arith.constant dense<0.000000e+00> : vector<1x1040xf32>
    %9 = tpu.matmul %8, %3, %cst_8 {dimension_numbers = #tpu.dot_dimension_numbers<[1], [0], [0], [1], [0, 0, 1, 1], [], []>} : vector<1x8xf32>, vector<8x1040xf32>, vector<1x1040xf32> -> vector<1x1040xf32>
    %10 = vector.broadcast %9 : vector<1x1040xf32> to vector<30x1040xf32>
    %11 = arith.subf %2, %10 : vector<30x1040xf32>
    %12 = arith.mulf %11, %11 : vector<30x1040xf32>
    %cst_9 = arith.constant dense<0.000000e+00> : vector<1040xf32>
    %13 = vector.multi_reduction <add>, %12, %cst_9 [0] : vector<30x1040xf32> to vector<1040xf32>
    %14 = vector.shape_cast %13 : vector<1040xf32> to vector<1x1040xf32>
    %cst_10 = arith.constant dense<0.000000e+00> : vector<1x8xf32>
    %15 = tpu.matmul %14, %3, %cst_10 {dimension_numbers = #tpu.dot_dimension_numbers<[1], [1], [0], [0], [0, 0, 1, 0], [], []>} : vector<1x1040xf32>, vector<8x1040xf32>, vector<1x8xf32> -> vector<1x8xf32>
    %cst_11 = arith.constant 3.900000e+03 : f32
    %16 = vector.broadcast %cst_11 : f32 to vector<1x8xf32>
    %17 = arith.divf %15, %16 : vector<1x8xf32>
    %c0_12 = arith.constant 0 : index
    %c0_13 = arith.constant 0 : index
    %18 = vector.load %arg3[%c0_12, %c0_13] : memref<1x8xf32, #tpu.memory_space<vmem>>, vector<1x8xf32>
    %cst_14 = arith.constant 9.99999974E-6 : f32
    %19 = vector.broadcast %cst_14 : f32 to vector<1x8xf32>
    %20 = arith.addf %17, %19 : vector<1x8xf32>
    %21 = math.rsqrt %20 : vector<1x8xf32>
    %22 = arith.mulf %18, %21 : vector<1x8xf32>
    %c0_15 = arith.constant 0 : index
    %c0_16 = arith.constant 0 : index
    %23 = vector.load %arg4[%c0_15, %c0_16] : memref<1x8xf32, #tpu.memory_space<vmem>>, vector<1x8xf32>
    %24 = arith.mulf %8, %22 : vector<1x8xf32>
    %25 = arith.subf %23, %24 : vector<1x8xf32>
    %cst_17 = arith.constant dense<0.000000e+00> : vector<1x1040xf32>
    %26 = tpu.matmul %22, %3, %cst_17 {dimension_numbers = #tpu.dot_dimension_numbers<[1], [0], [0], [1], [0, 0, 1, 1], [], []>} : vector<1x8xf32>, vector<8x1040xf32>, vector<1x1040xf32> -> vector<1x1040xf32>
    %cst_18 = arith.constant dense<0.000000e+00> : vector<1x1040xf32>
    %27 = tpu.matmul %25, %3, %cst_18 {dimension_numbers = #tpu.dot_dimension_numbers<[1], [0], [0], [1], [0, 0, 1, 1], [], []>} : vector<1x8xf32>, vector<8x1040xf32>, vector<1x1040xf32> -> vector<1x1040xf32>
    %c0_19 = arith.constant 0 : index
    %c0_20 = arith.constant 0 : index
    %28 = vector.load %arg5[%c0_19, %c0_20] : memref<16x30xf32, #tpu.memory_space<vmem>>, vector<16x30xf32>
    %cst_21 = arith.constant dense<0.000000e+00> : vector<16x1040xf32>
    %29 = tpu.matmul %28, %2, %cst_21 {dimension_numbers = #tpu.dot_dimension_numbers<[1], [0], [0], [1], [0, 0, 1, 1], [], []>} : vector<16x30xf32>, vector<30x1040xf32>, vector<16x1040xf32> -> vector<16x1040xf32>
    %30 = vector.broadcast %26 : vector<1x1040xf32> to vector<16x1040xf32>
    %31 = arith.mulf %29, %30 : vector<16x1040xf32>
    %cst_22 = arith.constant dense<0.000000e+00> : vector<16xf32>
    %32 = vector.multi_reduction <add>, %28, %cst_22 [1] : vector<16x30xf32> to vector<16xf32>
    %33 = vector.shape_cast %32 : vector<16xf32> to vector<16x1xf32>
    %34 = vector.broadcast %33 : vector<16x1xf32> to vector<16x1040xf32>
    %35 = vector.broadcast %27 : vector<1x1040xf32> to vector<16x1040xf32>
    %36 = arith.mulf %34, %35 : vector<16x1040xf32>
    %37 = arith.addf %31, %36 : vector<16x1040xf32>
    %c0_23 = arith.constant 0 : index
    %c0_24 = arith.constant 0 : index
    %38 = vector.load %arg6[%c0_23, %c0_24] : memref<16x1040xf32, #tpu.memory_space<vmem>>, vector<16x1040xf32>
    %39 = arith.mulf %37, %38 : vector<16x1040xf32>
    %c0_25 = arith.constant 0 : index
    %c0_26 = arith.constant 0 : index
    %40 = vector.load %arg7[%c0_25, %c0_26] : memref<130x1040xf32, #tpu.memory_space<vmem>>, vector<130x1040xf32>
    %cst_27 = arith.constant dense<0.000000e+00> : vector<16x130xf32>
    %41 = tpu.matmul %39, %40, %cst_27 {dimension_numbers = #tpu.dot_dimension_numbers<[1], [1], [0], [0], [0, 0, 1, 0], [], []>} : vector<16x1040xf32>, vector<130x1040xf32>, vector<16x130xf32> -> vector<16x130xf32>
    %cst_28 = arith.constant dense<0.000000e+00> : vector<16xf32>
    %42 = vector.multi_reduction <add>, %41, %cst_28 [1] : vector<16x130xf32> to vector<16xf32>
    %43 = vector.shape_cast %42 : vector<16xf32> to vector<16x1xf32>
    %cst_29 = arith.constant 1.300000e+02 : f32
    %44 = vector.broadcast %cst_29 : f32 to vector<16x1xf32>
    %45 = arith.divf %43, %44 : vector<16x1xf32>
    %46 = vector.broadcast %45 : vector<16x1xf32> to vector<16x130xf32>
    %47 = arith.subf %41, %46 : vector<16x130xf32>
    %48 = arith.mulf %47, %47 : vector<16x130xf32>
    %cst_30 = arith.constant dense<0.000000e+00> : vector<16xf32>
    %49 = vector.multi_reduction <add>, %48, %cst_30 [1] : vector<16x130xf32> to vector<16xf32>
    %50 = vector.shape_cast %49 : vector<16xf32> to vector<16x1xf32>
    %cst_31 = arith.constant 1.300000e+02 : f32
    %51 = vector.broadcast %cst_31 : f32 to vector<16x1xf32>
    %52 = arith.divf %50, %51 : vector<16x1xf32>
    %c0_32 = arith.constant 0 : index
    %c0_33 = arith.constant 0 : index
    %53 = vector.load %arg8[%c0_32, %c0_33] : memref<16x1xf32, #tpu.memory_space<vmem>>, vector<16x1xf32>
    %cst_34 = arith.constant 9.99999974E-6 : f32
    %54 = vector.broadcast %cst_34 : f32 to vector<16x1xf32>
    %55 = arith.addf %52, %54 : vector<16x1xf32>
    %56 = math.rsqrt %55 : vector<16x1xf32>
    %57 = arith.mulf %53, %56 : vector<16x1xf32>
    %58 = vector.broadcast %57 : vector<16x1xf32> to vector<16x130xf32>
    %59 = arith.mulf %47, %58 : vector<16x130xf32>
    %c0_35 = arith.constant 0 : index
    %c0_36 = arith.constant 0 : index
    %60 = vector.load %arg9[%c0_35, %c0_36] : memref<16x1xf32, #tpu.memory_space<vmem>>, vector<16x1xf32>
    %61 = vector.broadcast %60 : vector<16x1xf32> to vector<16x130xf32>
    %62 = arith.addf %59, %61 : vector<16x130xf32>
    %cst_37 = arith.constant 0.000000e+00 : f32
    %63 = vector.broadcast %cst_37 : f32 to vector<16x130xf32>
    %64 = arith.cmpf ogt, %62, %63 : vector<16x130xf32>
    %cst_38 = arith.constant 0.000000e+00 : f32
    %65 = vector.broadcast %cst_38 : f32 to vector<16x130xf32>
    %66 = arith.minimumf %62, %65 : vector<16x130xf32>
    %67 = math.exp %66 : vector<16x130xf32>
    %cst_39 = arith.constant 1.000000e+00 : f32
    %68 = vector.broadcast %cst_39 : f32 to vector<16x130xf32>
    %69 = arith.subf %67, %68 : vector<16x130xf32>
    %70 = arith.select %64, %62, %69 : vector<16x130xi1>, vector<16x130xf32>
    %c0_40 = arith.constant 0 : index
    %c0_41 = arith.constant 0 : index
    %71 = vector.load %arg10[%c0_40, %c0_41] : memref<130x80xf32, #tpu.memory_space<vmem>>, vector<130x80xf32>
    %cst_42 = arith.constant dense<0.000000e+00> : vector<16x80xf32>
    %72 = tpu.matmul %70, %71, %cst_42 {dimension_numbers = #tpu.dot_dimension_numbers<[1], [0], [0], [1], [0, 0, 1, 1], [], []>} : vector<16x130xf32>, vector<130x80xf32>, vector<16x80xf32> -> vector<16x80xf32>
    %c0_43 = arith.constant 0 : index
    %c0_44 = arith.constant 0 : index
    %73 = vector.load %arg11[%c0_43, %c0_44] : memref<16x16xf32, #tpu.memory_space<vmem>>, vector<16x16xf32>
    %cst_45 = arith.constant 0.000000e+00 : f32
    %74 = vector.broadcast %cst_45 : f32 to vector<16x64xf32>
    %75 = vector.extract_strided_slice %73 {offsets = [0, 0], sizes = [16, 1], strides = [1, 1]} : vector<16x16xf32> to vector<16x1xf32>
    %76 = vector.extract_strided_slice %72 {offsets = [0, 0], sizes = [16, 64], strides = [1, 1]} : vector<16x80xf32> to vector<16x64xf32>
    %77 = vector.broadcast %75 : vector<16x1xf32> to vector<16x64xf32>
    %78 = arith.mulf %77, %76 : vector<16x64xf32>
    %79 = arith.addf %74, %78 : vector<16x64xf32>
    %80 = vector.extract_strided_slice %73 {offsets = [0, 1], sizes = [16, 1], strides = [1, 1]} : vector<16x16xf32> to vector<16x1xf32>
    %81 = vector.extract_strided_slice %72 {offsets = [0, 1], sizes = [16, 64], strides = [1, 1]} : vector<16x80xf32> to vector<16x64xf32>
    %82 = vector.broadcast %80 : vector<16x1xf32> to vector<16x64xf32>
    %83 = arith.mulf %82, %81 : vector<16x64xf32>
    %84 = arith.addf %79, %83 : vector<16x64xf32>
    %85 = vector.extract_strided_slice %73 {offsets = [0, 2], sizes = [16, 1], strides = [1, 1]} : vector<16x16xf32> to vector<16x1xf32>
    %86 = vector.extract_strided_slice %72 {offsets = [0, 2], sizes = [16, 64], strides = [1, 1]} : vector<16x80xf32> to vector<16x64xf32>
    %87 = vector.broadcast %85 : vector<16x1xf32> to vector<16x64xf32>
    %88 = arith.mulf %87, %86 : vector<16x64xf32>
    %89 = arith.addf %84, %88 : vector<16x64xf32>
    %90 = vector.extract_strided_slice %73 {offsets = [0, 3], sizes = [16, 1], strides = [1, 1]} : vector<16x16xf32> to vector<16x1xf32>
    %91 = vector.extract_strided_slice %72 {offsets = [0, 3], sizes = [16, 64], strides = [1, 1]} : vector<16x80xf32> to vector<16x64xf32>
    %92 = vector.broadcast %90 : vector<16x1xf32> to vector<16x64xf32>
    %93 = arith.mulf %92, %91 : vector<16x64xf32>
    %94 = arith.addf %89, %93 : vector<16x64xf32>
    %95 = vector.extract_strided_slice %73 {offsets = [0, 4], sizes = [16, 1], strides = [1, 1]} : vector<16x16xf32> to vector<16x1xf32>
    %96 = vector.extract_strided_slice %72 {offsets = [0, 4], sizes = [16, 64], strides = [1, 1]} : vector<16x80xf32> to vector<16x64xf32>
    %97 = vector.broadcast %95 : vector<16x1xf32> to vector<16x64xf32>
    %98 = arith.mulf %97, %96 : vector<16x64xf32>
    %99 = arith.addf %94, %98 : vector<16x64xf32>
    %100 = vector.extract_strided_slice %73 {offsets = [0, 5], sizes = [16, 1], strides = [1, 1]} : vector<16x16xf32> to vector<16x1xf32>
    %101 = vector.extract_strided_slice %72 {offsets = [0, 5], sizes = [16, 64], strides = [1, 1]} : vector<16x80xf32> to vector<16x64xf32>
    %102 = vector.broadcast %100 : vector<16x1xf32> to vector<16x64xf32>
    %103 = arith.mulf %102, %101 : vector<16x64xf32>
    %104 = arith.addf %99, %103 : vector<16x64xf32>
    %105 = vector.extract_strided_slice %73 {offsets = [0, 6], sizes = [16, 1], strides = [1, 1]} : vector<16x16xf32> to vector<16x1xf32>
    %106 = vector.extract_strided_slice %72 {offsets = [0, 6], sizes = [16, 64], strides = [1, 1]} : vector<16x80xf32> to vector<16x64xf32>
    %107 = vector.broadcast %105 : vector<16x1xf32> to vector<16x64xf32>
    %108 = arith.mulf %107, %106 : vector<16x64xf32>
    %109 = arith.addf %104, %108 : vector<16x64xf32>
    %110 = vector.extract_strided_slice %73 {offsets = [0, 7], sizes = [16, 1], strides = [1, 1]} : vector<16x16xf32> to vector<16x1xf32>
    %111 = vector.extract_strided_slice %72 {offsets = [0, 7], sizes = [16, 64], strides = [1, 1]} : vector<16x80xf32> to vector<16x64xf32>
    %112 = vector.broadcast %110 : vector<16x1xf32> to vector<16x64xf32>
    %113 = arith.mulf %112, %111 : vector<16x64xf32>
    %114 = arith.addf %109, %113 : vector<16x64xf32>
    %115 = vector.extract_strided_slice %73 {offsets = [0, 8], sizes = [16, 1], strides = [1, 1]} : vector<16x16xf32> to vector<16x1xf32>
    %116 = vector.extract_strided_slice %72 {offsets = [0, 8], sizes = [16, 64], strides = [1, 1]} : vector<16x80xf32> to vector<16x64xf32>
    %117 = vector.broadcast %115 : vector<16x1xf32> to vector<16x64xf32>
    %118 = arith.mulf %117, %116 : vector<16x64xf32>
    %119 = arith.addf %114, %118 : vector<16x64xf32>
    %120 = vector.extract_strided_slice %73 {offsets = [0, 9], sizes = [16, 1], strides = [1, 1]} : vector<16x16xf32> to vector<16x1xf32>
    %121 = vector.extract_strided_slice %72 {offsets = [0, 9], sizes = [16, 64], strides = [1, 1]} : vector<16x80xf32> to vector<16x64xf32>
    %122 = vector.broadcast %120 : vector<16x1xf32> to vector<16x64xf32>
    %123 = arith.mulf %122, %121 : vector<16x64xf32>
    %124 = arith.addf %119, %123 : vector<16x64xf32>
    %125 = vector.extract_strided_slice %73 {offsets = [0, 10], sizes = [16, 1], strides = [1, 1]} : vector<16x16xf32> to vector<16x1xf32>
    %126 = vector.extract_strided_slice %72 {offsets = [0, 10], sizes = [16, 64], strides = [1, 1]} : vector<16x80xf32> to vector<16x64xf32>
    %127 = vector.broadcast %125 : vector<16x1xf32> to vector<16x64xf32>
    %128 = arith.mulf %127, %126 : vector<16x64xf32>
    %129 = arith.addf %124, %128 : vector<16x64xf32>
    %130 = vector.extract_strided_slice %73 {offsets = [0, 11], sizes = [16, 1], strides = [1, 1]} : vector<16x16xf32> to vector<16x1xf32>
    %131 = vector.extract_strided_slice %72 {offsets = [0, 11], sizes = [16, 64], strides = [1, 1]} : vector<16x80xf32> to vector<16x64xf32>
    %132 = vector.broadcast %130 : vector<16x1xf32> to vector<16x64xf32>
    %133 = arith.mulf %132, %131 : vector<16x64xf32>
    %134 = arith.addf %129, %133 : vector<16x64xf32>
    %135 = vector.extract_strided_slice %73 {offsets = [0, 12], sizes = [16, 1], strides = [1, 1]} : vector<16x16xf32> to vector<16x1xf32>
    %136 = vector.extract_strided_slice %72 {offsets = [0, 12], sizes = [16, 64], strides = [1, 1]} : vector<16x80xf32> to vector<16x64xf32>
    %137 = vector.broadcast %135 : vector<16x1xf32> to vector<16x64xf32>
    %138 = arith.mulf %137, %136 : vector<16x64xf32>
    %139 = arith.addf %134, %138 : vector<16x64xf32>
    %140 = vector.extract_strided_slice %73 {offsets = [0, 13], sizes = [16, 1], strides = [1, 1]} : vector<16x16xf32> to vector<16x1xf32>
    %141 = vector.extract_strided_slice %72 {offsets = [0, 13], sizes = [16, 64], strides = [1, 1]} : vector<16x80xf32> to vector<16x64xf32>
    %142 = vector.broadcast %140 : vector<16x1xf32> to vector<16x64xf32>
    %143 = arith.mulf %142, %141 : vector<16x64xf32>
    %144 = arith.addf %139, %143 : vector<16x64xf32>
    %145 = vector.extract_strided_slice %73 {offsets = [0, 14], sizes = [16, 1], strides = [1, 1]} : vector<16x16xf32> to vector<16x1xf32>
    %146 = vector.extract_strided_slice %72 {offsets = [0, 14], sizes = [16, 64], strides = [1, 1]} : vector<16x80xf32> to vector<16x64xf32>
    %147 = vector.broadcast %145 : vector<16x1xf32> to vector<16x64xf32>
    %148 = arith.mulf %147, %146 : vector<16x64xf32>
    %149 = arith.addf %144, %148 : vector<16x64xf32>
    %150 = vector.extract_strided_slice %73 {offsets = [0, 15], sizes = [16, 1], strides = [1, 1]} : vector<16x16xf32> to vector<16x1xf32>
    %151 = vector.extract_strided_slice %72 {offsets = [0, 15], sizes = [16, 64], strides = [1, 1]} : vector<16x80xf32> to vector<16x64xf32>
    %152 = vector.broadcast %150 : vector<16x1xf32> to vector<16x64xf32>
    %153 = arith.mulf %152, %151 : vector<16x64xf32>
    %154 = arith.addf %149, %153 : vector<16x64xf32>
    %c0_46 = arith.constant 0 : index
    %c0_47 = arith.constant 0 : index
    %155 = vector.load %arg12[%c0_46, %c0_47] : memref<1x64xf32, #tpu.memory_space<vmem>>, vector<1x64xf32>
    %156 = vector.broadcast %155 : vector<1x64xf32> to vector<16x64xf32>
    %157 = arith.mulf %154, %156 : vector<16x64xf32>
    %cst_48 = arith.constant dense<0.000000e+00> : vector<16xf32>
    %158 = vector.multi_reduction <add>, %157, %cst_48 [1] : vector<16x64xf32> to vector<16xf32>
    %159 = vector.shape_cast %158 : vector<16xf32> to vector<16x1xf32>
    %cst_49 = arith.constant 3.400000e+01 : f32
    %160 = vector.broadcast %cst_49 : f32 to vector<16x1xf32>
    %161 = arith.divf %159, %160 : vector<16x1xf32>
    %162 = vector.broadcast %161 : vector<16x1xf32> to vector<16x64xf32>
    %163 = arith.subf %154, %162 : vector<16x64xf32>
    %164 = vector.broadcast %155 : vector<1x64xf32> to vector<16x64xf32>
    %165 = arith.mulf %163, %164 : vector<16x64xf32>
    %166 = arith.mulf %165, %165 : vector<16x64xf32>
    %cst_50 = arith.constant dense<0.000000e+00> : vector<16xf32>
    %167 = vector.multi_reduction <add>, %166, %cst_50 [1] : vector<16x64xf32> to vector<16xf32>
    %168 = vector.shape_cast %167 : vector<16xf32> to vector<16x1xf32>
    %cst_51 = arith.constant 3.400000e+01 : f32
    %169 = vector.broadcast %cst_51 : f32 to vector<16x1xf32>
    %170 = arith.divf %168, %169 : vector<16x1xf32>
    %c0_52 = arith.constant 0 : index
    %c0_53 = arith.constant 0 : index
    %171 = vector.load %arg13[%c0_52, %c0_53] : memref<16x1xf32, #tpu.memory_space<vmem>>, vector<16x1xf32>
    %cst_54 = arith.constant 9.99999974E-6 : f32
    %172 = vector.broadcast %cst_54 : f32 to vector<16x1xf32>
    %173 = arith.addf %170, %172 : vector<16x1xf32>
    %174 = math.rsqrt %173 : vector<16x1xf32>
    %175 = arith.mulf %171, %174 : vector<16x1xf32>
    %176 = vector.broadcast %175 : vector<16x1xf32> to vector<16x64xf32>
    %177 = arith.mulf %163, %176 : vector<16x64xf32>
    %c0_55 = arith.constant 0 : index
    %c0_56 = arith.constant 0 : index
    %178 = vector.load %arg14[%c0_55, %c0_56] : memref<16x1xf32, #tpu.memory_space<vmem>>, vector<16x1xf32>
    %179 = vector.broadcast %178 : vector<16x1xf32> to vector<16x64xf32>
    %180 = arith.addf %177, %179 : vector<16x64xf32>
    %cst_57 = arith.constant 0.000000e+00 : f32
    %181 = vector.broadcast %cst_57 : f32 to vector<16x64xf32>
    %182 = arith.cmpf ogt, %180, %181 : vector<16x64xf32>
    %cst_58 = arith.constant 0.000000e+00 : f32
    %183 = vector.broadcast %cst_58 : f32 to vector<16x64xf32>
    %184 = arith.minimumf %180, %183 : vector<16x64xf32>
    %185 = math.exp %184 : vector<16x64xf32>
    %cst_59 = arith.constant 1.000000e+00 : f32
    %186 = vector.broadcast %cst_59 : f32 to vector<16x64xf32>
    %187 = arith.subf %185, %186 : vector<16x64xf32>
    %188 = arith.select %182, %180, %187 : vector<16x64xi1>, vector<16x64xf32>
    %cst_60 = arith.constant 0.000000e+00 : f32
    %189 = vector.broadcast %cst_60 : f32 to vector<2x32xf32>
    %c0_61 = arith.constant 0 : index
    %c0_62 = arith.constant 0 : index
    %c0_63 = arith.constant 0 : index
    %190 = vector.load %arg15[%c0_61, %c0_62, %c0_63] : memref<2x2x64xf32, #tpu.memory_space<vmem>>, vector<1x2x64xf32>
    %191 = vector.shape_cast %190 : vector<1x2x64xf32> to vector<2x64xf32>
    %cst_64 = arith.constant dense<0.000000e+00> : vector<2x16xf32>
    %192 = tpu.matmul %191, %188, %cst_64 {dimension_numbers = #tpu.dot_dimension_numbers<[1], [1], [0], [0], [0, 0, 1, 0], [], []>} : vector<2x64xf32>, vector<16x64xf32>, vector<2x16xf32> -> vector<2x16xf32>
    %c0_65 = arith.constant 0 : index
    %c0_66 = arith.constant 0 : index
    %c0_67 = arith.constant 0 : index
    %193 = vector.load %arg16[%c0_65, %c0_66, %c0_67] : memref<2x16x32xf32, #tpu.memory_space<vmem>>, vector<1x16x32xf32>
    %194 = vector.shape_cast %193 : vector<1x16x32xf32> to vector<16x32xf32>
    %cst_68 = arith.constant dense<0.000000e+00> : vector<2x32xf32>
    %195 = tpu.matmul %192, %194, %cst_68 {dimension_numbers = #tpu.dot_dimension_numbers<[1], [0], [0], [1], [0, 0, 1, 1], [], []>} : vector<2x16xf32>, vector<16x32xf32>, vector<2x32xf32> -> vector<2x32xf32>
    %196 = arith.addf %189, %195 : vector<2x32xf32>
    %c1 = arith.constant 1 : index
    %c0_69 = arith.constant 0 : index
    %c0_70 = arith.constant 0 : index
    %197 = vector.load %arg15[%c1, %c0_69, %c0_70] : memref<2x2x64xf32, #tpu.memory_space<vmem>>, vector<1x2x64xf32>
    %198 = vector.shape_cast %197 : vector<1x2x64xf32> to vector<2x64xf32>
    %cst_71 = arith.constant dense<0.000000e+00> : vector<2x16xf32>
    %199 = tpu.matmul %198, %188, %cst_71 {dimension_numbers = #tpu.dot_dimension_numbers<[1], [1], [0], [0], [0, 0, 1, 0], [], []>} : vector<2x64xf32>, vector<16x64xf32>, vector<2x16xf32> -> vector<2x16xf32>
    %c1_72 = arith.constant 1 : index
    %c0_73 = arith.constant 0 : index
    %c0_74 = arith.constant 0 : index
    %200 = vector.load %arg16[%c1_72, %c0_73, %c0_74] : memref<2x16x32xf32, #tpu.memory_space<vmem>>, vector<1x16x32xf32>
    %201 = vector.shape_cast %200 : vector<1x16x32xf32> to vector<16x32xf32>
    %cst_75 = arith.constant dense<0.000000e+00> : vector<2x32xf32>
    %202 = tpu.matmul %199, %201, %cst_75 {dimension_numbers = #tpu.dot_dimension_numbers<[1], [0], [0], [1], [0, 0, 1, 1], [], []>} : vector<2x16xf32>, vector<16x32xf32>, vector<2x32xf32> -> vector<2x32xf32>
    %203 = arith.addf %196, %202 : vector<2x32xf32>
    %cst_76 = arith.constant dense<0xFF800000> : vector<2xf32>
    %204 = vector.multi_reduction <maximumf>, %203, %cst_76 [1] : vector<2x32xf32> to vector<2xf32>
    %205 = vector.shape_cast %204 : vector<2xf32> to vector<2x1xf32>
    %206 = vector.broadcast %205 : vector<2x1xf32> to vector<2x32xf32>
    %207 = arith.subf %203, %206 : vector<2x32xf32>
    %208 = math.exp %207 : vector<2x32xf32>
    %cst_77 = arith.constant dense<0.000000e+00> : vector<2xf32>
    %209 = vector.multi_reduction <add>, %208, %cst_77 [1] : vector<2x32xf32> to vector<2xf32>
    %210 = vector.shape_cast %209 : vector<2xf32> to vector<2x1xf32>
    %211 = math.log %210 : vector<2x1xf32>
    %212 = vector.broadcast %211 : vector<2x1xf32> to vector<2x32xf32>
    %213 = arith.subf %207, %212 : vector<2x32xf32>
    %c0_78 = arith.constant 0 : index
    %c0_79 = arith.constant 0 : index
    %214 = vector.load %arg17[%c0_78, %c0_79] : memref<2x32xf32, #tpu.memory_space<vmem>>, vector<2x32xf32>
    tpu.vector_store %arg17[%c0_78, %c0_79], %213 {strides = array<i32>} : memref<2x32xf32, #tpu.memory_space<vmem>>, vector<2x32xf32>,
    return
  }
}

</mosaic_0001>

<bundles_post_ra>
// kernel: eegnet_forward_pallas.1
= control target key start
LH: loop header
LB: loop body
LE: loop exit
PB: predicated region body
PF: predicated region fallthrough
CT: control target
= control target key end

     0   :  { %s7655_s0 = inlined_call_operand.vmem [shape: bf16[30,256], index: 0, kind: input, shape index: {}]   ;;  %s7656_s1 = inlined_call_operand.vmem [shape: bf16[256,1040], index: 1, kind: input, shape index: {}]   ;;  %s7657_s2 = inlined_call_operand.vmem [shape: f32[8,1040], index: 2, kind: input, shape index: {}]   ;;  %s7658_s3 = inlined_call_operand.vmem [shape: f32[1,8], index: 3, kind: input, shape index: {}]   ;;  %s7659_s4 = inlined_call_operand.vmem [shape: f32[1,8], index: 4, kind: input, shape index: {}]   ;;  %s7660_s5 = inlined_call_operand.vmem [shape: f32[16,30], index: 5, kind: input, shape index: {}]   ;;  %s7661_s6 = inlined_call_operand.vmem [shape: f32[16,1040], index: 6, kind: input, shape index: {}]   ;;  %s7662_s7 = inlined_call_operand.vmem [shape: f32[130,1040], index: 7, kind: input, shape index: {}]   ;;  %s7663_s8 = inlined_call_operand.vmem [shape: f32[16,1], index: 8, kind: input, shape index: {}]   ;;  %s7664_s9 = inlined_call_operand.vmem [shape: f32[16,1], index: 9, kind: input, shape index: {}]   ;;  %s7665_s10 = inlined_call_operand.vmem [shape: f32[130,80], index: 10, kind: input, shape index: {}]   ;;  %s7666_s11 = inlined_call_operand.vmem [shape: f32[16,16], index: 11, kind: input, shape index: {}]   ;;  %s7667_s12 = inlined_call_operand.vmem [shape: f32[1,64], index: 12, kind: input, shape index: {}]   ;;  %s7668_s13 = inlined_call_operand.vmem [shape: f32[16,1], index: 13, kind: input, shape index: {}]   ;;  %s7669_s14 = inlined_call_operand.vmem [shape: f32[16,1], index: 14, kind: input, shape index: {}]   ;;  %s7670_s15 = inlined_call_operand.vmem [shape: f32[2,2,64], index: 15, kind: input, shape index: {}]   ;;  %s7671_s16 = inlined_call_operand.vmem [shape: f32[2,16,32], index: 16, kind: input, shape index: {}]   ;;  %s7672_s17 = inlined_call_operand.hbm [shape: f32[2,32], index: 17, kind: output, shape index: {}]  }
   0x1   :  { %7699 = sst [smem:[#allocation25_spill]] %s7655_s0 }
   0x2   :  { %7700 = sst [smem:[#allocation26_spill]] %s7656_s1 }
   0x3   :  { %s7701_s26 = sld [smem:[#allocation26_spill]] }
   0x4   :  { %s7702_s29 = sld [smem:[#allocation25_spill]] }
   0x9   :  { %v4534_v0 = vld [vmem:[%s7701_s26 + $0x1f8] sm:$0xf]  ;;  %v5026_v1 = vld [vmem:[%s7701_s26 + $0x218] sm:$0xf0]  ;;  %v4536_v6 = vld [vmem:[%s7701_s26 + $0x21c] sm:$0xf0] }
   0xa   :  { %v4822_v2 = vld [vmem:[%s7701_s26 + $0x438] sm:$0xf]  ;;  %v4535_v3 = vor.u32 %v5026_v1, %v4534_v0  ;;  %v5098_v4 = vld [vmem:[%s7701_s26 + $0x458] sm:$0xf0]  ;;  %v4824_v10 = vld [vmem:[%s7701_s26 + $0x45c] sm:$0xf0] }
   0xb   :  { %v5022_v5 = vld [vmem:[%s7701_s26 + $0x1fc] sm:$0xf]  ;;  %v4823_v7 = vor.u32 %v5098_v4, %v4822_v2  ;;  %v4498_v11 = vld [vmem:[%s7701_s26 + $0x1b0] sm:$0xf]  ;;  %v5017_v13 = vld [vmem:[%s7701_s26 + $0x1d0] sm:$0xf0] }
   0xc   :  { %v4539_v8 = vor.u32 %v5022_v5, %v4536_v6  ;;  %v5094_v9 = vld [vmem:[%s7701_s26 + $0x43c] sm:$0xf]  ;;  %977 = vmatpush.bf16.msra.mxu0 %v4535_v3  ;;  %v4786_v14 = vld [vmem:[%s7701_s26 + $0x3f0] sm:$0xf]  ;;  %v5089_v15 = vld [vmem:[%s7701_s26 + $0x410] sm:$0xf0]  ;;  %v4499_v16 = vor.u32 %v5017_v13, %v4498_v11 }
   0xd   :  { %v4827_v12 = vor.u32 %v5094_v9, %v4824_v10  ;;  %996 = vmatpush.bf16.msra.mxu1 %v4823_v7  ;;  %v4787_v17 = vor.u32 %v5089_v15, %v4786_v14  ;;  %v5013_v18 = vld [vmem:[%s7701_s26 + $0x1b4] sm:$0xf]  ;;  %v4500_v19 = vld [vmem:[%s7701_s26 + $0x1d4] sm:$0xf0]  ;;  %v4462_v23 = vld [vmem:[%s7701_s26 + $0x168] sm:$0xf] }
   0xe   :  { %1015 = vmatpush.bf16.msra.mxu2 %v4539_v8  ;;  %v5085_v20 = vld [vmem:[%s7701_s26 + $0x3f4] sm:$0xf]  ;;  %v4503_v21 = vor.u32 %v5013_v18, %v4500_v19  ;;  %v4788_v22 = vld [vmem:[%s7701_s26 + $0x414] sm:$0xf0]  ;;  %v5008_v24 = vld [vmem:[%s7701_s26 + $0x188] sm:$0xf0] }
   0xf   :  { %1034 = vmatpush.bf16.msra.mxu3 %v4827_v12  ;;  %v4791_v25 = vor.u32 %v5085_v20, %v4788_v22  ;;  %v4750_v26 = vld [vmem:[%s7701_s26 + $0x3a8] sm:$0xf]  ;;  %v5080_v27 = vld [vmem:[%s7701_s26 + $0x3c8] sm:$0xf0]  ;;  %v4463_v29 = vor.u32 %v5008_v24, %v4462_v23  ;;  %v4464_v30 = vld [vmem:[%s7701_s26 + $0x18c] sm:$0xf0] }
  0x10   :  { %v5004_v28 = vld [vmem:[%s7701_s26 + $0x16c] sm:$0xf]  ;;  %978 = vmatpush.bf16.msra.mxu0 %v4499_v16  ;;  %v4752_v32 = vld [vmem:[%s7701_s26 + $0x3cc] sm:$0xf0]  ;;  %v4751_v33 = vor.u32 %v5080_v27, %v4750_v26  ;;  %v4426_v35 = vld [vmem:[%s7701_s26 + $0x120] sm:$0xf] }
  0x11   :  { %v5076_v31 = vld [vmem:[%s7701_s26 + $0x3ac] sm:$0xf]  ;;  %997 = vmatpush.bf16.msra.mxu1 %v4787_v17  ;;  %v4467_v34 = vor.u32 %v5004_v28, %v4464_v30  ;;  %v4999_v36 = vld [vmem:[%s7701_s26 + $0x140] sm:$0xf0]  ;;  %v4714_v37 = vld [vmem:[%s7701_s26 + $0x360] sm:$0xf] }
  0x12   :  { %1016 = vmatpush.bf16.msra.mxu2 %v4503_v21  ;;  %v4755_v38 = vor.u32 %v5076_v31, %v4752_v32  ;;  %v5071_v39 = vld [vmem:[%s7701_s26 + $0x380] sm:$0xf0]  ;;  %v4428_v41 = vld [vmem:[%s7701_s26 + $0x144] sm:$0xf0]  ;;  %v4427_v44 = vor.u32 %v4999_v36, %v4426_v35  ;;  %v4390_v47 = vld [vmem:[%s7701_s26 + $0xd8] sm:$0xf] }
  0x13   :  { %1035 = vmatpush.bf16.msra.mxu3 %v4791_v25  ;;  %v4995_v40 = vld [vmem:[%s7701_s26 + $0x124] sm:$0xf]  ;;  %v4716_v43 = vld [vmem:[%s7701_s26 + $0x384] sm:$0xf0]  ;;  %v4715_v45 = vor.u32 %v5071_v39, %v4714_v37  ;;  %v4990_v48 = vld [vmem:[%s7701_s26 + $0xf8] sm:$0xf0] }
  0x14   :  { %v5067_v42 = vld [vmem:[%s7701_s26 + $0x364] sm:$0xf]  ;;  %979 = vmatpush.bf16.msra.mxu0 %v4463_v29  ;;  %v4431_v46 = vor.u32 %v4995_v40, %v4428_v41  ;;  %v4678_v49 = vld [vmem:[%s7701_s26 + $0x318] sm:$0xf]  ;;  %v5062_v51 = vld [vmem:[%s7701_s26 + $0x338] sm:$0xf0]  ;;  %v4391_v56 = vor.u32 %v4990_v48, %v4390_v47 }
  0x15   :  { %998 = vmatpush.bf16.msra.mxu1 %v4751_v33  ;;  %v4719_v50 = vor.u32 %v5067_v42, %v4716_v43  ;;  %v4986_v52 = vld [vmem:[%s7701_s26 + $0xdc] sm:$0xf]  ;;  %v4392_v53 = vld [vmem:[%s7701_s26 + $0xfc] sm:$0xf0]  ;;  %v4679_v57 = vor.u32 %v5062_v51, %v4678_v49  ;;  %v4354_v59 = vld [vmem:[%s7701_s26 + $0x90] sm:$0xf] }
  0x16   :  { %1017 = vmatpush.bf16.msra.mxu2 %v4467_v34  ;;  %v5058_v54 = vld [vmem:[%s7701_s26 + $0x31c] sm:$0xf]  ;;  %v4680_v55 = vld [vmem:[%s7701_s26 + $0x33c] sm:$0xf0]  ;;  %v4395_v58 = vor.u32 %v4986_v52, %v4392_v53  ;;  %v4981_v60 = vld [vmem:[%s7701_s26 + $0xb0] sm:$0xf0] }
  0x17   :  { %1036 = vmatpush.bf16.msra.mxu3 %v4755_v38  ;;  %v4642_v61 = vld [vmem:[%s7701_s26 + $0x2d0] sm:$0xf]  ;;  %v4683_v62 = vor.u32 %v5058_v54, %v4680_v55  ;;  %v5053_v63 = vld [vmem:[%s7701_s26 + $0x2f0] sm:$0xf0]  ;;  %v4356_v1 = vld [vmem:[%s7701_s26 + $0xb4] sm:$0xf0]  ;;  %v4355_v4 = vor.u32 %v4981_v60, %v4354_v59 }
  0x18   :  { %980 = vmatpush.bf16.msra.mxu0 %v4427_v44  ;;  %v4977_v0 = vld [vmem:[%s7701_s26 + $0x94] sm:$0xf]  ;;  %v4644_v3 = vld [vmem:[%s7701_s26 + $0x2f4] sm:$0xf0]  ;;  %v4643_v5 = vor.u32 %v5053_v63, %v4642_v61  ;;  %v4318_v7 = vld [vmem:[%s7701_s26 + $0x48] sm:$0xf] }
  0x19   :  { %999 = vmatpush.bf16.msra.mxu1 %v4715_v45  ;;  %v5049_v2 = vld [vmem:[%s7701_s26 + $0x2d4] sm:$0xf]  ;;  %v4359_v6 = vor.u32 %v4977_v0, %v4356_v1  ;;  %v4972_v8 = vld [vmem:[%s7701_s26 + $0x68] sm:$0xf0]  ;;  %v4606_v9 = vld [vmem:[%s7701_s26 + $0x288] sm:$0xf] }
  0x1a   :  { %1018 = vmatpush.bf16.msra.mxu2 %v4431_v46  ;;  %v4647_v10 = vor.u32 %v5049_v2, %v4644_v3  ;;  %v5044_v11 = vld [vmem:[%s7701_s26 + $0x2a8] sm:$0xf0]  ;;  %v4320_v13 = vld [vmem:[%s7701_s26 + $0x6c] sm:$0xf0]  ;;  %v4319_v16 = vor.u32 %v4972_v8, %v4318_v7  ;;  %v4282_v17 = vld [vmem:[%s7701_s26] sm:$0xf] }
  0x1b   :  { %1037 = vmatpush.bf16.msra.mxu3 %v4719_v50  ;;  %v4968_v12 = vld [vmem:[%s7701_s26 + $0x4c] sm:$0xf]  ;;  %v4608_v15 = vld [vmem:[%s7701_s26 + $0x2ac] sm:$0xf0]  ;;  %v4963_v18 = vld [vmem:[%s7701_s26 + $0x20] sm:$0xf0]  ;;  %v4607_v19 = vor.u32 %v5044_v11, %v4606_v9 }
  0x1c   :  { %981 = vmatpush.bf16.msra.mxu0 %v4391_v56  ;;  %v5040_v14 = vld [vmem:[%s7701_s26 + $0x28c] sm:$0xf]  ;;  %v4323_v20 = vor.u32 %v4968_v12, %v4320_v13  ;;  %v4570_v21 = vld [vmem:[%s7701_s26 + $0x240] sm:$0xf]  ;;  %v5035_v22 = vld [vmem:[%s7701_s26 + $0x260] sm:$0xf0]  ;;  %v4283_v31 = vor.u32 %v4963_v18, %v4282_v17 }
  0x1d   :  { %1000 = vmatpush.bf16.msra.mxu1 %v4679_v57  ;;  %v4959_v23 = vld [vmem:[%s7701_s26 + $0x4] sm:$0xf]  ;;  %v4611_v24 = vor.u32 %v5040_v14, %v4608_v15  ;;  %v4284_v25 = vld [vmem:[%s7701_s26 + $0x24] sm:$0xf0]  ;;  %v4266_v28 = vld [vmem:[%s7702_s29] sm:$0xf]  ;;  %v4571_v35 = vor.u32 %v5035_v22, %v4570_v21 }
  0x1e   :  { %1019 = vmatpush.bf16.msra.mxu2 %v4395_v58  ;;  %v5031_v26 = vld [vmem:[%s7701_s26 + $0x244] sm:$0xf]  ;;  %v4572_v27 = vld [vmem:[%s7701_s26 + $0x264] sm:$0xf0]  ;;  %v4542_v29 = vld [vmem:[%s7701_s26 + $0x200] sm:$0xf]  ;;  %v4287_v36 = vor.u32 %v4959_v23, %v4284_v25 }
  0x1f   :  { %1038 = vmatpush.bf16.msra.mxu3 %v4683_v62  ;;  %v5027_v30 = vld [vmem:[%s7701_s26 + $0x220] sm:$0xf0]  ;;  %v4956_v32 = vld [vmem:[%s7702_s29 + $0x4] sm:$0xf0]  ;;  %v4830_v33 = vld [vmem:[%s7701_s26 + $0x440] sm:$0xf]  ;;  %v4575_v39 = vor.u32 %v5031_v26, %v4572_v27 }
  0x20   :  { %982 = vmatpush.bf16.msra.mxu0 %v4355_v4  ;;  %v5099_v34 = vld [vmem:[%s7701_s26 + $0x460] sm:$0xf0]  ;;  %v4268_v38 = vld [vmem:[%s7702_s29 + $0x8] sm:$0xf0]  ;;  %v4543_v40 = vor.u32 %v5027_v30, %v4542_v29  ;;  %v4544_v42 = vld [vmem:[%s7701_s26 + $0x224] sm:$0xf0]  ;;  %v5579_v44 = vor.u32 %v4956_v32, %v4266_v28 }
  0x21   :  { %1001 = vmatpush.bf16.msra.mxu1 %v4643_v5  ;;  %v4955_v37 = vld [vmem:[%s7702_s29 + $0x4] sm:$0xf]  ;;  %v4831_v45 = vor.u32 %v5099_v34, %v4830_v33  ;;  %v4832_v46 = vld [vmem:[%s7701_s26 + $0x464] sm:$0xf0]  ;;  %v4506_v47 = vld [vmem:[%s7701_s26 + $0x1b8] sm:$0xf] }
  0x22   :  { %1020 = vmatpush.bf16.msra.mxu2 %v4359_v6  ;;  %v5023_v41 = vld [vmem:[%s7701_s26 + $0x204] sm:$0xf]  ;;  %v5018_v48 = vld [vmem:[%s7701_s26 + $0x1d8] sm:$0xf0]  ;;  %v5590_v49 = vor.u32 %v4955_v37, %v4268_v38  ;;  %v4794_v50 = vld [vmem:[%s7701_s26 + $0x3f8] sm:$0xf] }
  0x23   :  { %1039 = vmatpush.bf16.msra.mxu3 %v4647_v10  ;;  %v5095_v43 = vld [vmem:[%s7701_s26 + $0x444] sm:$0xf]  ;;  %v5090_v51 = vld [vmem:[%s7701_s26 + $0x418] sm:$0xf0]  ;;  %v4547_v52 = vor.u32 %v5023_v41, %v4544_v42  ;;  %v4507_v54 = vor.u32 %v5018_v48, %v4506_v47  ;;  %v4508_v56 = vld [vmem:[%s7701_s26 + $0x1dc] sm:$0xf0] }
  0x24   :  { %983 = vmatpush.bf16.msra.mxu0 %v4319_v16  ;;  %v4835_v53 = vor.u32 %v5095_v43, %v4832_v46  ;;  %v5014_v55 = vld [vmem:[%s7701_s26 + $0x1bc] sm:$0xf]  ;;  %v4795_v58 = vor.u32 %v5090_v51, %v4794_v50  ;;  %v4796_v59 = vld [vmem:[%s7701_s26 + $0x41c] sm:$0xf0]  ;;  %v4470_v60 = vld [vmem:[%s7701_s26 + $0x170] sm:$0xf] }
  0x25   :  { %1002 = vmatpush.bf16.msra.mxu1 %v4607_v19  ;;  %v5086_v57 = vld [vmem:[%s7701_s26 + $0x3fc] sm:$0xf]  ;;  %v5009_v61 = vld [vmem:[%s7701_s26 + $0x190] sm:$0xf0]  ;;  %v4758_v62 = vld [vmem:[%s7701_s26 + $0x3b0] sm:$0xf]  ;;  %v4511_v0 = vor.u32 %v5014_v55, %v4508_v56 }
  0x26   :  { %1021 = vmatpush.bf16.msra.mxu2 %v4323_v20  ;;  %v5081_v63 = vld [vmem:[%s7701_s26 + $0x3d0] sm:$0xf0]  ;;  %v4799_v1 = vor.u32 %v5086_v57, %v4796_v59  ;;  %v4471_v2 = vor.u32 %v5009_v61, %v4470_v60  ;;  %v4472_v4 = vld [vmem:[%s7701_s26 + $0x194] sm:$0xf0]  ;;  %v4434_v8 = vld [vmem:[%s7701_s26 + $0x128] sm:$0xf] }
  0x27   :  { %1040 = vmatpush.bf16.msra.mxu3 %v4611_v24  ;;  %v5005_v3 = vld [vmem:[%s7701_s26 + $0x174] sm:$0xf]  ;;  %v4759_v6 = vor.u32 %v5081_v63, %v4758_v62  ;;  %v4760_v7 = vld [vmem:[%s7701_s26 + $0x3d4] sm:$0xf0]  ;;  %v5000_v9 = vld [vmem:[%s7701_s26 + $0x148] sm:$0xf0] }
  0x28   :  { %984 = vmatpush.bf16.msra.mxu0 %v4283_v31  ;;  %v5077_v5 = vld [vmem:[%s7701_s26 + $0x3b4] sm:$0xf]  ;;  %v4722_v10 = vld [vmem:[%s7701_s26 + $0x368] sm:$0xf]  ;;  %v5072_v11 = vld [vmem:[%s7701_s26 + $0x388] sm:$0xf0]  ;;  %v4475_v12 = vor.u32 %v5005_v3, %v4472_v4  ;;  %v4435_v15 = vor.u32 %v5000_v9, %v4434_v8 }
  0x29   :  { %1003 = vmatpush.bf16.msra.mxu1 %v4571_v35  ;;  %v4996_v13 = vld [vmem:[%s7701_s26 + $0x12c] sm:$0xf]  ;;  %v4763_v14 = vor.u32 %v5077_v5, %v4760_v7  ;;  %v4436_v16 = vld [vmem:[%s7701_s26 + $0x14c] sm:$0xf0]  ;;  %v4723_v19 = vor.u32 %v5072_v11, %v4722_v10  ;;  %v4398_v21 = vld [vmem:[%s7701_s26 + $0xe0] sm:$0xf] }
  0x2a   :  { %1022 = vmatpush.bf16.msra.mxu2 %v4287_v36  ;;  %v5068_v17 = vld [vmem:[%s7701_s26 + $0x36c] sm:$0xf]  ;;  %v4724_v18 = vld [vmem:[%s7701_s26 + $0x38c] sm:$0xf0]  ;;  %v4991_v22 = vld [vmem:[%s7701_s26 + $0x100] sm:$0xf0]  ;;  %v4439_v26 = vor.u32 %v4996_v13, %v4436_v16 }
  0x2b   :  { %1041 = vmatpush.bf16.msra.mxu3 %v4575_v39  ;;  %985 = vmatmul.bf16.vlgmr.msra.gmra.mxu0 %v5579_v44  ;;  %v4274_v20 = vld [vmem:[%s7702_s29 + $0x10] sm:$0xf]  ;;  %v4958_v23 = vld [vmem:[%s7702_s29 + $0x14] sm:$0x70]  ;;  %v4686_v24 = vld [vmem:[%s7701_s26 + $0x320] sm:$0xf]  ;;  %v4727_v29 = vor.u32 %v5068_v17, %v4724_v18  ;;  %v4399_v30 = vor.u32 %v4991_v22, %v4398_v21 }
  0x2c   :  { %1053 = vmatpush.bf16.msrb.mxu0 %v4543_v40  ;;  %1004 = vmatmul.bf16.vlgmr.msra.gmra.mxu1 %v5590_v49  ;;  %v5063_v25 = vld [vmem:[%s7701_s26 + $0x340] sm:$0xf0]  ;;  %v4957_v27 = vld [vmem:[%s7702_s29 + $0x14] sm:$0xf]  ;;  %v4276_v28 = vld [vmem:[%s7702_s29 + $0x18] sm:$0x70]  ;;  %v5695_v34 = vor.u32 %v4958_v23, %v4274_v20 }
  0x2d   :  { %1072 = vmatpush.bf16.msrb.mxu1 %v4831_v45  ;;  %1023 = vmatmul.bf16.vlgmr.msra.gmra.mxu2 %v5579_v44  ;;  %v4987_v31 = vld [vmem:[%s7701_s26 + $0xe4] sm:$0xf]  ;;  %v4400_v32 = vld [vmem:[%s7701_s26 + $0x104] sm:$0xf0]  ;;  %v4687_v35 = vor.u32 %v5063_v25, %v4686_v24  ;;  %v4362_v37 = vld [vmem:[%s7701_s26 + $0x98] sm:$0xf]  ;;  %v5706_v39 = vor.u32 %v4957_v27, %v4276_v28 }
  0x2e   :  { %1042 = vmatmul.bf16.vlgmr.msra.gmra.mxu3 %v5590_v49  ;;  %1091 = vmatpush.bf16.msrb.mxu2 %v4547_v52  ;;  %v5059_v33 = vld [vmem:[%s7701_s26 + $0x324] sm:$0xf]  ;;  %v4688_v36 = vld [vmem:[%s7701_s26 + $0x344] sm:$0xf0]  ;;  %v4982_v38 = vld [vmem:[%s7701_s26 + $0xb8] sm:$0xf0]  ;;  %v4403_v42 = vor.u32 %v4987_v31, %v4400_v32 }
  0x2f   :  { %1110 = vmatpush.bf16.msrb.mxu3 %v4835_v53  ;;  %v4650_v40 = vld [vmem:[%s7701_s26 + $0x2d8] sm:$0xf]  ;;  %v5054_v41 = vld [vmem:[%s7701_s26 + $0x2f8] sm:$0xf0]  ;;  %v4691_v43 = vor.u32 %v5059_v33, %v4688_v36  ;;  %v4363_v45 = vor.u32 %v4982_v38, %v4362_v37  ;;  %v4364_v47 = vld [vmem:[%s7701_s26 + $0xbc] sm:$0xf0] }
  0x30   :  { %1054 = vmatpush.bf16.msrb.mxu0 %v4507_v54  ;;  %v4978_v46 = vld [vmem:[%s7701_s26 + $0x9c] sm:$0xf]  ;;  %v4651_v50 = vor.u32 %v5054_v41, %v4650_v40  ;;  %v4652_v51 = vld [vmem:[%s7701_s26 + $0x2fc] sm:$0xf0]  ;;  %v4326_v52 = vld [vmem:[%s7701_s26 + $0x50] sm:$0xf] }
  0x31   :  { %1073 = vmatpush.bf16.msrb.mxu1 %v4795_v58  ;;  %v5050_v48 = vld [vmem:[%s7701_s26 + $0x2dc] sm:$0xf]  ;;  %v4973_v53 = vld [vmem:[%s7701_s26 + $0x70] sm:$0xf0]  ;;  %v4614_v54 = vld [vmem:[%s7701_s26 + $0x290] sm:$0xf]  ;;  %v4367_v56 = vor.u32 %v4978_v46, %v4364_v47 }
  0x32   :  { %1092 = vmatpush.bf16.msrb.mxu2 %v4511_v0  ;;  %v5045_v55 = vld [vmem:[%s7701_s26 + $0x2b0] sm:$0xf0]  ;;  %v4655_v58 = vor.u32 %v5050_v48, %v4652_v51  ;;  %v4327_v59 = vor.u32 %v4973_v53, %v4326_v52  ;;  %v4328_v60 = vld [vmem:[%s7701_s26 + $0x74] sm:$0xf0]  ;;  %v4290_v0 = vld [vmem:[%s7701_s26 + $0x8] sm:$0xf] }
  0x33   :  { %1111 = vmatpush.bf16.msrb.mxu3 %v4799_v1  ;;  %v4969_v57 = vld [vmem:[%s7701_s26 + $0x54] sm:$0xf]  ;;  %v4616_v62 = vld [vmem:[%s7701_s26 + $0x2b4] sm:$0xf0]  ;;  %v4615_v63 = vor.u32 %v5045_v55, %v4614_v54  ;;  %v4964_v1 = vld [vmem:[%s7701_s26 + $0x28] sm:$0xf0] }
  0x34   :  { %1055 = vmatpush.bf16.msrb.mxu0 %v4471_v2  ;;  %v5041_v61 = vld [vmem:[%s7701_s26 + $0x294] sm:$0xf]  ;;  %v4578_v2 = vld [vmem:[%s7701_s26 + $0x248] sm:$0xf]  ;;  %v5036_v3 = vld [vmem:[%s7701_s26 + $0x268] sm:$0xf0]  ;;  %v4291_v10 = vor.u32 %v4964_v1, %v4290_v0 }
  0x35   :  { %1074 = vmatpush.bf16.msrb.mxu1 %v4759_v6  ;;  %v4550_v4 = vld [vmem:[%s7701_s26 + $0x208] sm:$0xf]  ;;  %v5028_v5 = vld [vmem:[%s7701_s26 + $0x228] sm:$0xf0]  ;;  %v4331_v6 = vor.u32 %v4969_v57, %v4328_v60  ;;  %v4619_v9 = vor.u32 %v5041_v61, %v4616_v62  ;;  %v4552_v18 = vld [vmem:[%s7701_s26 + $0x22c] sm:$0xf0] }
  0x36   :  { %1093 = vmatpush.bf16.msrb.mxu2 %v4475_v12  ;;  %v4838_v7 = vld [vmem:[%s7701_s26 + $0x448] sm:$0xf]  ;;  %v5100_v8 = vld [vmem:[%s7701_s26 + $0x468] sm:$0xf0]  ;;  %v4292_v12 = vld [vmem:[%s7701_s26 + $0x2c] sm:$0xf0]  ;;  %v4551_v16 = vor.u32 %v5028_v5, %v4550_v4 }
  0x37   :  { %1112 = vmatpush.bf16.msrb.mxu3 %v4763_v14  ;;  %v4960_v11 = vld [vmem:[%s7701_s26 + $0xc] sm:$0xf]  ;;  %v4579_v14 = vor.u32 %v5036_v3, %v4578_v2  ;;  %v4840_v21 = vld [vmem:[%s7701_s26 + $0x46c] sm:$0xf0]  ;;  %v4514_v25 = vld [vmem:[%s7701_s26 + $0x1c0] sm:$0xf] }
  0x38   :  { %1056 = vmatpush.bf16.msrb.mxu0 %v4435_v15  ;;  %v5032_v13 = vld [vmem:[%s7701_s26 + $0x24c] sm:$0xf]  ;;  %v4580_v15 = vld [vmem:[%s7701_s26 + $0x26c] sm:$0xf0]  ;;  %v4295_v22 = vor.u32 %v4960_v11, %v4292_v12  ;;  %v4802_v27 = vld [vmem:[%s7701_s26 + $0x400] sm:$0xf] }
  0x39   :  { %1075 = vmatpush.bf16.msrb.mxu1 %v4723_v19  ;;  %v5024_v17 = vld [vmem:[%s7701_s26 + $0x20c] sm:$0xf]  ;;  %v4839_v19 = vor.u32 %v5100_v8, %v4838_v7  ;;  %v4583_v23 = vor.u32 %v5032_v13, %v4580_v15  ;;  %v4516_v31 = vld [vmem:[%s7701_s26 + $0x1e4] sm:$0xf0]  ;;  %v5087_v32 = vld [vmem:[%s7701_s26 + $0x404] sm:$0xf] }
  0x3a   :  { %1094 = vmatpush.bf16.msrb.mxu2 %v4439_v26  ;;  %v5096_v20 = vld [vmem:[%s7701_s26 + $0x44c] sm:$0xf]  ;;  %v4555_v24 = vor.u32 %v5024_v17, %v4552_v18  ;;  %v5019_v26 = vld [vmem:[%s7701_s26 + $0x1e0] sm:$0xf0]  ;;  %v4804_v33 = vld [vmem:[%s7701_s26 + $0x424] sm:$0xf0] }
  0x3b   :  { %1113 = vmatpush.bf16.msrb.mxu3 %v4727_v29  ;;  %990 = vmatmul.bf16.gmra.mxu0 %v5695_v34  ;;  %v4843_v28 = vor.u32 %v5096_v20, %v4840_v21  ;;  %v5091_v29 = vld [vmem:[%s7701_s26 + $0x420] sm:$0xf0]  ;;  %v4478_v38 = vld [vmem:[%s7701_s26 + $0x178] sm:$0xf]  ;;  %v5010_v40 = vld [vmem:[%s7701_s26 + $0x198] sm:$0xf0] }
  0x3c   :  { %1057 = vmatpush.bf16.msrb.mxu0 %v4399_v30  ;;  %1009 = vmatmul.bf16.gmra.mxu1 %v5706_v39  ;;  %v5015_v30 = vld [vmem:[%s7701_s26 + $0x1c4] sm:$0xf]  ;;  %v4803_v36 = vor.u32 %v5091_v29, %v4802_v27  ;;  %v4766_v41 = vld [vmem:[%s7701_s26 + $0x3b8] sm:$0xf]  ;;  %v4480_v46 = vld [vmem:[%s7701_s26 + $0x19c] sm:$0xf0] }
  0x3d   :  { %1076 = vmatpush.bf16.msrb.mxu1 %v4687_v35  ;;  %1028 = vmatmul.bf16.gmra.mxu2 %v5695_v34  ;;  %v4515_v35 = vor.u32 %v5019_v26, %v4514_v25  ;;  %v4519_v37 = vor.u32 %v5015_v30, %v4516_v31  ;;  %v5078_v47 = vld [vmem:[%s7701_s26 + $0x3bc] sm:$0xf]  ;;  %v4768_v48 = vld [vmem:[%s7701_s26 + $0x3dc] sm:$0xf0]  ;;  %v4442_v53 = vld [vmem:[%s7701_s26 + $0x130] sm:$0xf] }
  0x3e   :  { %1047 = vmatmul.bf16.gmra.mxu3 %v5706_v39  ;;  %1095 = vmatpush.bf16.msrb.mxu2 %v4403_v42  ;;  %v4807_v42 = vor.u32 %v5087_v32, %v4804_v33  ;;  %v5001_v54 = vld [vmem:[%s7701_s26 + $0x150] sm:$0xf0]  ;;  %v4730_v55 = vld [vmem:[%s7701_s26 + $0x370] sm:$0xf]  ;;  %v4732_v61 = vld [vmem:[%s7701_s26 + $0x394] sm:$0xf0] }
  0x3f   :  { %1114 = vmatpush.bf16.msrb.mxu3 %v4691_v43  ;;  %v5082_v43 = vld [vmem:[%s7701_s26 + $0x3d8] sm:$0xf0]  ;;  %v5073_v57 = vld [vmem:[%s7701_s26 + $0x390] sm:$0xf0]  ;;  %v4443_v62 = vor.u32 %v5001_v54, %v4442_v53  ;;  %v4992_v2 = vld [vmem:[%s7701_s26 + $0x108] sm:$0xf0] }
  0x40   :  { %1058 = vmatpush.bf16.msrb.mxu0 %v4363_v45  ;;  %v5006_v45 = vld [vmem:[%s7701_s26 + $0x17c] sm:$0xf]  ;;  %v4767_v51 = vor.u32 %v5082_v43, %v4766_v41  ;;  %v5069_v60 = vld [vmem:[%s7701_s26 + $0x374] sm:$0xf]  ;;  %v4731_v0 = vor.u32 %v5073_v57, %v4730_v55  ;;  %v4694_v3 = vld [vmem:[%s7701_s26 + $0x328] sm:$0xf] }
  0x41   :  { %1077 = vmatpush.bf16.msrb.mxu1 %v4651_v50  ;;  %v4479_v50 = vor.u32 %v5010_v40, %v4478_v38  ;;  %v4483_v52 = vor.u32 %v5006_v45, %v4480_v46  ;;  %v5064_v4 = vld [vmem:[%s7701_s26 + $0x348] sm:$0xf0]  ;;  %v4735_v5 = vor.u32 %v5069_v60, %v4732_v61  ;;  %v4408_v7 = vld [vmem:[%s7701_s26 + $0x10c] sm:$0xf0] }
  0x42   :  { %1096 = vmatpush.bf16.msrb.mxu2 %v4367_v56  ;;  %v4771_v56 = vor.u32 %v5078_v47, %v4768_v48  ;;  %v5060_v8 = vld [vmem:[%s7701_s26 + $0x32c] sm:$0xf] }
  0x43   :  { %1115 = vmatpush.bf16.msrb.mxu3 %v4655_v58  ;;  %v4997_v58 = vld [vmem:[%s7701_s26 + $0x134] sm:$0xf] }
  0x44   :  { %1059 = vmatpush.bf16.msrb.mxu0 %v4327_v59  ;;  %v4444_v59 = vld [vmem:[%s7701_s26 + $0x154] sm:$0xf0] }
  0x45   :  { %1078 = vmatpush.bf16.msrb.mxu1 %v4615_v63  ;;  %v4406_v63 = vld [vmem:[%s7701_s26 + $0xe8] sm:$0xf]  ;;  %v4447_v1 = vor.u32 %v4997_v58, %v4444_v59 }
  0x46   :  { %1097 = vmatpush.bf16.msrb.mxu2 %v4331_v6  ;;  %v4988_v6 = vld [vmem:[%s7701_s26 + $0xec] sm:$0xf] }
  0x47   :  { %1116 = vmatpush.bf16.msrb.mxu3 %v4619_v9  ;;  %v4696_v9 = vld [vmem:[%s7701_s26 + $0x34c] sm:$0xf0] }
  0x48   :  { %1060 = vmatpush.bf16.msrb.mxu0 %v4291_v10 }
  0x49   :  { %1079 = vmatpush.bf16.msrb.mxu1 %v4579_v14 }
  0x4a   :  { %1098 = vmatpush.bf16.msrb.mxu2 %v4295_v22 }
  0x4b   :  { %1117 = vmatpush.bf16.msrb.mxu3 %v4583_v23  ;;  %1061 = vmatmul.bf16.vlgmr.msrb.gmra.mxu0 %v5579_v44 }
  0x4c   :  { %1129 = vmatpush.bf16.msra.mxu0 %v4551_v16  ;;  %1080 = vmatmul.bf16.vlgmr.msrb.gmra.mxu1 %v5590_v49 }
  0x4d   :  { %1148 = vmatpush.bf16.msra.mxu1 %v4839_v19  ;;  %1099 = vmatmul.bf16.vlgmr.msrb.gmra.mxu2 %v5579_v44 }
  0x4e   :  { %1167 = vmatpush.bf16.msra.mxu2 %v4555_v24  ;;  %1118 = vmatmul.bf16.vlgmr.msrb.gmra.mxu3 %v5590_v49 }
  0x4f   :  { %1186 = vmatpush.bf16.msra.mxu3 %v4843_v28 }
  0x50   :  { %1130 = vmatpush.bf16.msra.mxu0 %v4515_v35 }
  0x51   :  { %1149 = vmatpush.bf16.msra.mxu1 %v4803_v36 }
  0x52   :  { %1168 = vmatpush.bf16.msra.mxu2 %v4519_v37 }
  0x53   :  { %1187 = vmatpush.bf16.msra.mxu3 %v4807_v42 }
  0x54   :  { %1131 = vmatpush.bf16.msra.mxu0 %v4479_v50 }
  0x55   :  { %1150 = vmatpush.bf16.msra.mxu1 %v4767_v51 }
  0x56   :  { %1169 = vmatpush.bf16.msra.mxu2 %v4483_v52 }
  0x57   :  { %1188 = vmatpush.bf16.msra.mxu3 %v4771_v56 }
  0x58   :  { %22 = vsyncpa [#allocation3], 0  ;;  %1132 = vmatpush.bf16.msra.mxu0 %v4443_v62  ;;  %v4407_v10 = vor.u32 %v4992_v2, %v4406_v63  ;;  %v4695_v11 = vor.u32 %v5064_v4, %v4694_v3  ;;  %v4411_v12 = vor.u32 %v4988_v6, %v4408_v7  ;;  %v4370_v13 = vld [vmem:[%s7701_s26 + $0xa0] sm:$0xf]  ;;  %v4983_v14 = vld [vmem:[%s7701_s26 + $0xc0] sm:$0xf0]  ;;  %v4699_v16 = vor.u32 %v5060_v8, %v4696_v9 }
  0x59   :  { %1151 = vmatpush.bf16.msra.mxu1 %v4731_v0  ;;  %v4658_v15 = vld [vmem:[%s7701_s26 + $0x2e0] sm:$0xf]  ;;  %v5055_v17 = vld [vmem:[%s7701_s26 + $0x300] sm:$0xf0]  ;;  %v4372_v19 = vld [vmem:[%s7701_s26 + $0xc4] sm:$0xf0]  ;;  %v4371_v22 = vor.u32 %v4983_v14, %v4370_v13 }
  0x5a   :  { %1170 = vmatpush.bf16.msra.mxu2 %v4447_v1  ;;  %v4979_v18 = vld [vmem:[%s7701_s26 + $0xa4] sm:$0xf]  ;;  %v4660_v21 = vld [vmem:[%s7701_s26 + $0x304] sm:$0xf0]  ;;  %v4659_v23 = vor.u32 %v5055_v17, %v4658_v15  ;;  %v4334_v25 = vld [vmem:[%s7701_s26 + $0x58] sm:$0xf] }
  0x5b   :  { %1189 = vmatpush.bf16.msra.mxu3 %v4735_v5  ;;  %v5051_v20 = vld [vmem:[%s7701_s26 + $0x2e4] sm:$0xf]  ;;  %v4375_v24 = vor.u32 %v4979_v18, %v4372_v19  ;;  %v4974_v26 = vld [vmem:[%s7701_s26 + $0x78] sm:$0xf0]  ;;  %v4622_v27 = vld [vmem:[%s7701_s26 + $0x298] sm:$0xf]  ;;  %1066 = vmatmul.bf16.gmra.mxu0 %v5695_v34 }
  0x5c   :  { %1133 = vmatpush.bf16.msra.mxu0 %v4407_v10  ;;  %v4663_v28 = vor.u32 %v5051_v20, %v4660_v21  ;;  %v5046_v29 = vld [vmem:[%s7701_s26 + $0x2b8] sm:$0xf0]  ;;  %v4336_v31 = vld [vmem:[%s7701_s26 + $0x7c] sm:$0xf0]  ;;  %1085 = vmatmul.bf16.gmra.mxu1 %v5706_v39  ;;  %v4335_v35 = vor.u32 %v4974_v26, %v4334_v25  ;;  %v4298_v36 = vld [vmem:[%s7701_s26 + $0x10] sm:$0xf] }
  0x5d   :  { %1152 = vmatpush.bf16.msra.mxu1 %v4695_v11  ;;  %v4970_v30 = vld [vmem:[%s7701_s26 + $0x5c] sm:$0xf]  ;;  %1104 = vmatmul.bf16.gmra.mxu2 %v5695_v34  ;;  %v4624_v33 = vld [vmem:[%s7701_s26 + $0x2bc] sm:$0xf0]  ;;  %v4965_v37 = vld [vmem:[%s7701_s26 + $0x30] sm:$0xf0]  ;;  %v4623_v38 = vor.u32 %v5046_v29, %v4622_v27 }
  0x5e   :  { %1171 = vmatpush.bf16.msra.mxu2 %v4411_v12  ;;  %v5042_v32 = vld [vmem:[%s7701_s26 + $0x29c] sm:$0xf]  ;;  %1123 = vmatmul.bf16.gmra.mxu3 %v5706_v39  ;;  %v4339_v40 = vor.u32 %v4970_v30, %v4336_v31  ;;  %v4586_v41 = vld [vmem:[%s7701_s26 + $0x250] sm:$0xf]  ;;  %v5037_v42 = vld [vmem:[%s7701_s26 + $0x270] sm:$0xf0]  ;;  %v4299_v53 = vor.u32 %v4965_v37, %v4298_v36 }
  0x5f   :  { %1190 = vmatpush.bf16.msra.mxu3 %v4699_v16  ;;  %v4961_v43 = vld [vmem:[%s7701_s26 + $0x14] sm:$0xf]  ;;  %v4627_v45 = vor.u32 %v5042_v32, %v4624_v33  ;;  %v4300_v46 = vld [vmem:[%s7701_s26 + $0x34] sm:$0xf0]  ;;  %v4558_v50 = vld [vmem:[%s7701_s26 + $0x210] sm:$0xf]  ;;  %v4587_v57 = vor.u32 %v5037_v42, %v4586_v41 }
  0x60   :  { %1134 = vmatpush.bf16.msra.mxu0 %v4371_v22  ;;  %v5033_v47 = vld [vmem:[%s7701_s26 + $0x254] sm:$0xf]  ;;  %v4588_v48 = vld [vmem:[%s7701_s26 + $0x274] sm:$0xf0]  ;;  %v4846_v52 = vld [vmem:[%s7701_s26 + $0x450] sm:$0xf]  ;;  %v4303_v58 = vor.u32 %v4961_v43, %v4300_v46 }
  0x61   :  { %1153 = vmatpush.bf16.msra.mxu1 %v4659_v23  ;;  %v5029_v51 = vld [vmem:[%s7701_s26 + $0x230] sm:$0xf0]  ;;  %v4560_v56 = vld [vmem:[%s7701_s26 + $0x234] sm:$0xf0]  ;;  %v4591_v61 = vor.u32 %v5033_v47, %v4588_v48  ;;  %v4522_v2 = vld [vmem:[%s7701_s26 + $0x1c8] sm:$0xf] }
  0x62   :  { %1172 = vmatpush.bf16.msra.mxu2 %v4375_v24  ;;  %v5101_v54 = vld [vmem:[%s7701_s26 + $0x470] sm:$0xf0]  ;;  %v4848_v60 = vld [vmem:[%s7701_s26 + $0x474] sm:$0xf0]  ;;  %v4559_v62 = vor.u32 %v5029_v51, %v4558_v50  ;;  %v5020_v3 = vld [vmem:[%s7701_s26 + $0x1e8] sm:$0xf0] }
  0x63   :  { %1191 = vmatpush.bf16.msra.mxu3 %v4663_v28  ;;  %v5025_v55 = vld [vmem:[%s7701_s26 + $0x214] sm:$0xf]  ;;  %v4847_v63 = vor.u32 %v5101_v54, %v4846_v52  ;;  %v4810_v4 = vld [vmem:[%s7701_s26 + $0x408] sm:$0xf]  ;;  %v5092_v5 = vld [vmem:[%s7701_s26 + $0x428] sm:$0xf0]  ;;  %v4523_v10 = vor.u32 %v5020_v3, %v4522_v2 }
  0x64   :  { %1135 = vmatpush.bf16.msra.mxu0 %v4335_v35  ;;  %v5097_v59 = vld [vmem:[%s7701_s26 + $0x454] sm:$0xf]  ;;  %v4563_v0 = vor.u32 %v5025_v55, %v4560_v56  ;;  %v5016_v6 = vld [vmem:[%s7701_s26 + $0x1cc] sm:$0xf]  ;;  %v4524_v7 = vld [vmem:[%s7701_s26 + $0x1ec] sm:$0xf0]  ;;  %v4811_v11 = vor.u32 %v5092_v5, %v4810_v4 }
  0x65   :  { %1154 = vmatpush.bf16.msra.mxu1 %v4623_v38  ;;  %v4851_v1 = vor.u32 %v5097_v59, %v4848_v60  ;;  %v5088_v8 = vld [vmem:[%s7701_s26 + $0x40c] sm:$0xf]  ;;  %v4812_v9 = vld [vmem:[%s7701_s26 + $0x42c] sm:$0xf0]  ;;  %v4527_v12 = vor.u32 %v5016_v6, %v4524_v7  ;;  %v4486_v13 = vld [vmem:[%s7701_s26 + $0x180] sm:$0xf] }
  0x66   :  { %1173 = vmatpush.bf16.msra.mxu2 %v4339_v40  ;;  %v5011_v14 = vld [vmem:[%s7701_s26 + $0x1a0] sm:$0xf0]  ;;  %v4774_v15 = vld [vmem:[%s7701_s26 + $0x3c0] sm:$0xf]  ;;  %v4815_v16 = vor.u32 %v5088_v8, %v4812_v9  ;;  %v4488_v19 = vld [vmem:[%s7701_s26 + $0x1a4] sm:$0xf0] }
  0x67   :  { %1192 = vmatpush.bf16.msra.mxu3 %v4627_v45  ;;  %v5083_v17 = vld [vmem:[%s7701_s26 + $0x3e0] sm:$0xf0]  ;;  %v4776_v21 = vld [vmem:[%s7701_s26 + $0x3e4] sm:$0xf0]  ;;  %v4487_v22 = vor.u32 %v5011_v14, %v4486_v13  ;;  %v4450_v25 = vld [vmem:[%s7701_s26 + $0x138] sm:$0xf] }
  0x68   :  { %1136 = vmatpush.bf16.msra.mxu0 %v4299_v53  ;;  %v5007_v18 = vld [vmem:[%s7701_s26 + $0x184] sm:$0xf]  ;;  %v4775_v23 = vor.u32 %v5083_v17, %v4774_v15  ;;  %v5002_v26 = vld [vmem:[%s7701_s26 + $0x158] sm:$0xf0]  ;;  %v4738_v27 = vld [vmem:[%s7701_s26 + $0x378] sm:$0xf] }
  0x69   :  { %1155 = vmatpush.bf16.msra.mxu1 %v4587_v57  ;;  %v5079_v20 = vld [vmem:[%s7701_s26 + $0x3c4] sm:$0xf]  ;;  %v4491_v24 = vor.u32 %v5007_v18, %v4488_v19  ;;  %v5074_v29 = vld [vmem:[%s7701_s26 + $0x398] sm:$0xf0]  ;;  %v4452_v31 = vld [vmem:[%s7701_s26 + $0x15c] sm:$0xf0]  ;;  %v4451_v35 = vor.u32 %v5002_v26, %v4450_v25 }
  0x6a   :  { %1174 = vmatpush.bf16.msra.mxu2 %v4303_v58  ;;  %v4779_v28 = vor.u32 %v5079_v20, %v4776_v21  ;;  %v4998_v30 = vld [vmem:[%s7701_s26 + $0x13c] sm:$0xf]  ;;  %v4740_v33 = vld [vmem:[%s7701_s26 + $0x39c] sm:$0xf0]  ;;  %v4739_v36 = vor.u32 %v5074_v29, %v4738_v27  ;;  %v4414_v38 = vld [vmem:[%s7701_s26 + $0xf0] sm:$0xf] }
  0x6b   :  { %1193 = vmatpush.bf16.msra.mxu3 %v4591_v61  ;;  %1137 = vmatmul.bf16.vlgmr.msra.gmra.mxu0 %v5579_v44  ;;  %v5070_v32 = vld [vmem:[%s7701_s26 + $0x37c] sm:$0xf]  ;;  %v4455_v37 = vor.u32 %v4998_v30, %v4452_v31  ;;  %v4993_v40 = vld [vmem:[%s7701_s26 + $0x110] sm:$0xf0]  ;;  %v4702_v41 = vld [vmem:[%s7701_s26 + $0x330] sm:$0xf] }
  0x6c   :  { %1205 = vmatpush.bf16.msrb.mxu0 %v4559_v62  ;;  %1156 = vmatmul.bf16.vlgmr.msra.gmra.mxu1 %v5590_v49  ;;  %v4743_v42 = vor.u32 %v5070_v32, %v4740_v33  ;;  %v5065_v43 = vld [vmem:[%s7701_s26 + $0x350] sm:$0xf0]  ;;  %v4416_v46 = vld [vmem:[%s7701_s26 + $0x114] sm:$0xf0]  ;;  %v4415_v50 = vor.u32 %v4993_v40, %v4414_v38  ;;  %v4378_v53 = vld [vmem:[%s7701_s26 + $0xa8] sm:$0xf] }
  0x6d   :  { %1224 = vmatpush.bf16.msrb.mxu1 %v4847_v63  ;;  %1175 = vmatmul.bf16.vlgmr.msra.gmra.mxu2 %v5579_v44  ;;  %v4989_v45 = vld [vmem:[%s7701_s26 + $0xf4] sm:$0xf]  ;;  %v4704_v48 = vld [vmem:[%s7701_s26 + $0x354] sm:$0xf0]  ;;  %v4703_v51 = vor.u32 %v5065_v43, %v4702_v41  ;;  %v4984_v54 = vld [vmem:[%s7701_s26 + $0xc8] sm:$0xf0] }
  0x6e   :  { %1243 = vmatpush.bf16.msrb.mxu2 %v4563_v0  ;;  %1194 = vmatmul.bf16.vlgmr.msra.gmra.mxu3 %v5590_v49  ;;  %v5061_v47 = vld [vmem:[%s7701_s26 + $0x334] sm:$0xf]  ;;  %v4419_v52 = vor.u32 %v4989_v45, %v4416_v46  ;;  %v4666_v55 = vld [vmem:[%s7701_s26 + $0x2e8] sm:$0xf]  ;;  %v5056_v57 = vld [vmem:[%s7701_s26 + $0x308] sm:$0xf0]  ;;  %v4379_v62 = vor.u32 %v4984_v54, %v4378_v53 }
  0x6f   :  { %1262 = vmatpush.bf16.msrb.mxu3 %v4851_v1  ;;  %v4707_v56 = vor.u32 %v5061_v47, %v4704_v48  ;;  %v4980_v58 = vld [vmem:[%s7701_s26 + $0xac] sm:$0xf]  ;;  %v4380_v59 = vld [vmem:[%s7701_s26 + $0xcc] sm:$0xf0]  ;;  %v4667_v63 = vor.u32 %v5056_v57, %v4666_v55  ;;  %v4342_v1 = vld [vmem:[%s7701_s26 + $0x60] sm:$0xf] }
  0x70   :  { %1206 = vmatpush.bf16.msrb.mxu0 %v4523_v10  ;;  %v5052_v60 = vld [vmem:[%s7701_s26 + $0x2ec] sm:$0xf]  ;;  %v4668_v61 = vld [vmem:[%s7701_s26 + $0x30c] sm:$0xf0]  ;;  %v4383_v0 = vor.u32 %v4980_v58, %v4380_v59  ;;  %v4975_v2 = vld [vmem:[%s7701_s26 + $0x80] sm:$0xf0] }
  0x71   :  { %1225 = vmatpush.bf16.msrb.mxu1 %v4811_v11  ;;  %v4630_v3 = vld [vmem:[%s7701_s26 + $0x2a0] sm:$0xf]  ;;  %v4671_v4 = vor.u32 %v5052_v60, %v4668_v61  ;;  %v5047_v5 = vld [vmem:[%s7701_s26 + $0x2c0] sm:$0xf0]  ;;  %v4344_v7 = vld [vmem:[%s7701_s26 + $0x84] sm:$0xf0]  ;;  %v4343_v10 = vor.u32 %v4975_v2, %v4342_v1 }
  0x72   :  { %1244 = vmatpush.bf16.msrb.mxu2 %v4527_v12  ;;  %v4971_v6 = vld [vmem:[%s7701_s26 + $0x64] sm:$0xf]  ;;  %v4632_v9 = vld [vmem:[%s7701_s26 + $0x2c4] sm:$0xf0]  ;;  %v4306_v11 = vld [vmem:[%s7701_s26 + $0x18] sm:$0xf]  ;;  %v4631_v12 = vor.u32 %v5047_v5, %v4630_v3 }
  0x73   :  { %1263 = vmatpush.bf16.msrb.mxu3 %v4815_v16  ;;  %v5043_v8 = vld [vmem:[%s7701_s26 + $0x2a4] sm:$0xf]  ;;  %v4347_v13 = vor.u32 %v4971_v6, %v4344_v7  ;;  %v4966_v14 = vld [vmem:[%s7701_s26 + $0x38] sm:$0xf0]  ;;  %v4594_v15 = vld [vmem:[%s7701_s26 + $0x258] sm:$0xf] }
  0x74   :  { %1207 = vmatpush.bf16.msrb.mxu0 %v4487_v22  ;;  %v5038_v16 = vld [vmem:[%s7701_s26 + $0x278] sm:$0xf0]  ;;  %v4635_v17 = vor.u32 %v5043_v8, %v4632_v9  ;;  %v4308_v19 = vld [vmem:[%s7701_s26 + $0x3c] sm:$0xf0]  ;;  %v4566_v22 = vld [vmem:[%s7701_s26 + $0x218] sm:$0xf] }
  0x75   :  { %1226 = vmatpush.bf16.msrb.mxu1 %v4775_v23  ;;  %v4962_v18 = vld [vmem:[%s7701_s26 + $0x1c] sm:$0xf]  ;;  %v4596_v21 = vld [vmem:[%s7701_s26 + $0x27c] sm:$0xf0]  ;;  %v4854_v25 = vld [vmem:[%s7701_s26 + $0x458] sm:$0xf]  ;;  %v4595_v27 = vor.u32 %v5038_v16, %v4594_v15 }
  0x76   :  { %1245 = vmatpush.bf16.msrb.mxu2 %v4491_v24  ;;  %v5034_v20 = vld [vmem:[%s7701_s26 + $0x25c] sm:$0xf]  ;;  %v4307_v24 = vor.u32 %v4966_v14, %v4306_v11  ;;  %v4530_v32 = vld [vmem:[%s7701_s26 + $0x1d0] sm:$0xf]  ;;  %v5021_v33 = vld [vmem:[%s7701_s26 + $0x1f0] sm:$0xf0] }
  0x77   :  { %1264 = vmatpush.bf16.msrb.mxu3 %v4779_v28  ;;  %v5030_v23 = vld [vmem:[%s7701_s26 + $0x238] sm:$0xf0]  ;;  %v4311_v28 = vor.u32 %v4962_v18, %v4308_v19  ;;  %v4599_v29 = vor.u32 %v5034_v20, %v4596_v21  ;;  %v4494_v40 = vld [vmem:[%s7701_s26 + $0x188] sm:$0xf]  ;;  %v5012_v41 = vld [vmem:[%s7701_s26 + $0x1a8] sm:$0xf0] }
  0x78   :  { %1208 = vmatpush.bf16.msrb.mxu0 %v4451_v35  ;;  %v5102_v26 = vld [vmem:[%s7701_s26 + $0x478] sm:$0xf0]  ;;  %v4567_v30 = vor.u32 %v5030_v23, %v4566_v22  ;;  %v4818_v35 = vld [vmem:[%s7701_s26 + $0x410] sm:$0xf]  ;;  %v5084_v43 = vld [vmem:[%s7701_s26 + $0x3e8] sm:$0xf0]  ;;  %v4495_v45 = vor.u32 %v5012_v41, %v4494_v40 }
  0x79   :  { %1227 = vmatpush.bf16.msrb.mxu1 %v4739_v36  ;;  %v4855_v31 = vor.u32 %v5102_v26, %v4854_v25  ;;  %v5093_v36 = vld [vmem:[%s7701_s26 + $0x430] sm:$0xf0]  ;;  %v4458_v47 = vld [vmem:[%s7701_s26 + $0x140] sm:$0xf]  ;;  %v5003_v48 = vld [vmem:[%s7701_s26 + $0x160] sm:$0xf0] }
  0x7a   :  { %1246 = vmatpush.bf16.msrb.mxu2 %v4455_v37  ;;  %v4531_v37 = vor.u32 %v5021_v33, %v4530_v32  ;;  %v4819_v38 = vor.u32 %v5093_v36, %v4818_v35  ;;  %v4422_v54 = vld [vmem:[%s7701_s26 + $0xf8] sm:$0xf]  ;;  %v4994_v55 = vld [vmem:[%s7701_s26 + $0x118] sm:$0xf0]  ;;  %v4386_v60 = vld [vmem:[%s7701_s26 + $0xb0] sm:$0xf] }
  0x7b   :  { %1265 = vmatpush.bf16.msrb.mxu3 %v4743_v42  ;;  %1142 = vmatmul.bf16.gmra.mxu0 %v5695_v34  ;;  %v4782_v42 = vld [vmem:[%s7701_s26 + $0x3c8] sm:$0xf]  ;;  %v5066_v57 = vld [vmem:[%s7701_s26 + $0x358] sm:$0xf0]  ;;  %v4423_v58 = vor.u32 %v4994_v55, %v4422_v54  ;;  %v4985_v61 = vld [vmem:[%s7701_s26 + $0xd0] sm:$0xf0] }
  0x7c   :  { %1209 = vmatpush.bf16.msrb.mxu0 %v4415_v50  ;;  %1161 = vmatmul.bf16.gmra.mxu1 %v5706_v39  ;;  %v4783_v46 = vor.u32 %v5084_v43, %v4782_v42  ;;  %v4746_v50 = vld [vmem:[%s7701_s26 + $0x380] sm:$0xf]  ;;  %v4350_v2 = vld [vmem:[%s7701_s26 + $0x68] sm:$0xf]  ;;  %v4976_v3 = vld [vmem:[%s7701_s26 + $0x88] sm:$0xf0] }
  0x7d   :  { %1228 = vmatpush.bf16.msrb.mxu1 %v4703_v51  ;;  %1180 = vmatmul.bf16.gmra.mxu2 %v5695_v34  ;;  %v5075_v51 = vld [vmem:[%s7701_s26 + $0x3a0] sm:$0xf0]  ;;  %v5048_v5 = vld [vmem:[%s7701_s26 + $0x2c8] sm:$0xf0]  ;;  %v4351_v6 = vor.u32 %v4976_v3, %v4350_v2  ;;  %v4314_v8 = vld [vmem:[%s7701_s26 + $0x20] sm:$0xf] }
  0x7e   :  { %1247 = vmatpush.bf16.msrb.mxu2 %v4419_v52  ;;  %1199 = vmatmul.bf16.gmra.mxu3 %v5706_v39  ;;  %v4459_v52 = vor.u32 %v5003_v48, %v4458_v47  ;;  %v4747_v53 = vor.u32 %v5075_v51, %v4746_v50  ;;  %v4967_v9 = vld [vmem:[%s7701_s26 + $0x40] sm:$0xf0]  ;;  %v6294_v21 = vld [vmem:[%s7657_s2 + $0x8] sm:$0xff]  ;;  %vm1330_vm0 = vcmask 1045504   ;;  %vm1409_vm1 = vcmask 130048   ;;  %s5249_s18 = smov 127  }
  0x7f   :  { %1266 = vmatpush.bf16.msrb.mxu3 %v4707_v56  ;;  %v4710_v56 = vld [vmem:[%s7701_s26 + $0x338] sm:$0xf]  ;;  %v5039_v11 = vld [vmem:[%s7701_s26 + $0x280] sm:$0xf0]  ;;  %vm1415_vm2 = vcmask 128000   ;;  %vm1618_vm4 = vcmask 64512  }
  0x80   :  { %1210 = vmatpush.bf16.msrb.mxu0 %v4379_v62  ;;  %v4711_v59 = vor.u32 %v5066_v57, %v4710_v56  ;;  %v4674_v62 = vld [vmem:[%s7701_s26 + $0x2f0] sm:$0xf]  ;;  %v6287_v19 = vld [vmem:[%s7657_s2] sm:$0xff]  ;;  %vm2544_vm5 = vcmask 244736   ;;  %vm3523_vm9 = vcmask 15360   ;;  %s5251_s19 = smov 124  }
  0x81   :  { %1229 = vmatpush.bf16.msrb.mxu1 %v4667_v63  ;;  %v5057_v63 = vld [vmem:[%s7701_s26 + $0x310] sm:$0xf0]  ;;  %s5254_s1 = smov 121   ;;  %s5255_s20 = smov 120  }
  0x82   :  { %1248 = vmatpush.bf16.msrb.mxu2 %v4383_v0  ;;  %v4387_v0 = vor.u32 %v4985_v61, %v4386_v60  ;;  %v4675_v1 = vor.u32 %v5057_v63, %v4674_v62  ;;  %v6328_v60 = vld [vmem:[%s7657_s2 + $0x10] sm:$0xff]  ;;  %s5256_s21 = smov 116   ;;  %s5257_s22 = smov 118  }
  0x83   :  { %1267 = vmatpush.bf16.msrb.mxu3 %v4671_v4  ;;  %v4638_v4 = vld [vmem:[%s7701_s26 + $0x2a8] sm:$0xf]  ;;  %s5260_s23 = smov 113   ;;  %s5261_s24 = smov 114  }
  0x84   :  { %1211 = vmatpush.bf16.msrb.mxu0 %v4343_v10  ;;  %v4639_v7 = vor.u32 %v5048_v5, %v4638_v4  ;;  %v4602_v10 = vld [vmem:[%s7701_s26 + $0x260] sm:$0xf]  ;;  %s5259_s26 = smov 115  }
  0x85   :  { %1230 = vmatpush.bf16.msrb.mxu1 %v4631_v12  ;;  %v4315_v12 = vor.u32 %v4967_v9, %v4314_v8 }
  0x86   :  { %1249 = vmatpush.bf16.msrb.mxu2 %v4347_v13  ;;  %v4603_v13 = vor.u32 %v5039_v11, %v4602_v10 }
  0x87   :  { %1268 = vmatpush.bf16.msrb.mxu3 %v4635_v17 }
  0x88   :  { %1212 = vmatpush.bf16.msrb.mxu0 %v4307_v24 }
  0x89   :  { %1231 = vmatpush.bf16.msrb.mxu1 %v4595_v27 }
  0x8a   :  { %1250 = vmatpush.bf16.msrb.mxu2 %v4311_v28 }
  0x8b   :  { %1269 = vmatpush.bf16.msrb.mxu3 %v4599_v29  ;;  %1213 = vmatmul.bf16.vlgmr.msrb.gmra.mxu0 %v5579_v44 }
  0x8c   :  { %1281 = vmatpush.bf16.msra.mxu0 %v4567_v30  ;;  %1232 = vmatmul.bf16.vlgmr.msrb.gmra.mxu1 %v5590_v49 }
  0x8d   :  { %1300 = vmatpush.bf16.msra.mxu1 %v4855_v31  ;;  %1251 = vmatmul.bf16.vlgmr.msrb.gmra.mxu2 %v5579_v44 }
  0x8e   :  { %1270 = vmatmul.bf16.vlgmr.msrb.gmra.mxu3 %v5590_v49  ;;  %1445 = vmatpush.xpose.msra.mxu2 %v6287_v19 }
  0x8f   :  { %1465 = vmatpush.xpose.msra.mxu3 %v6294_v21 }
  0x90   :  { %1282 = vmatpush.bf16.msra.mxu0 %v4531_v37 }
  0x91   :  { %1301 = vmatpush.bf16.msra.mxu1 %v4819_v38 }
  0x92   :  { %1485 = vmatpush.xpose.msrb.mxu2 %v6328_v60 }
  0x94   :  { %1283 = vmatpush.bf16.msra.mxu0 %v4495_v45 }
  0x95   :  { %1302 = vmatpush.bf16.msra.mxu1 %v4783_v46 }
  0x98   :  { %1284 = vmatpush.bf16.msra.mxu0 %v4459_v52 }
  0x99   :  { %1303 = vmatpush.bf16.msra.mxu1 %v4747_v53 }
  0x9b   :  { %1218 = vmatmul.bf16.gmra.mxu0 %v5695_v34 }
  0x9c   :  { %1285 = vmatpush.bf16.msra.mxu0 %v4423_v58  ;;  %1237 = vmatmul.bf16.gmra.mxu1 %v5706_v39 }
  0x9d   :  { %1304 = vmatpush.bf16.msra.mxu1 %v4711_v59  ;;  %1256 = vmatmul.bf16.gmra.mxu2 %v5695_v34 }
  0x9e   :  { %1275 = vmatmul.bf16.gmra.mxu3 %v5706_v39 }
  0xa0   :  { %1286 = vmatpush.bf16.msra.mxu0 %v4387_v0 }
  0xa1   :  { %1305 = vmatpush.bf16.msra.mxu1 %v4675_v1  ;;  %v6334_v1 = vld [vmem:[%s7657_s2 + $0x18] sm:$0xff] }
  0xa2   :  { %1505 = vmatpush.xpose.msrb.mxu3 %v6334_v1 }
  0xa4   :  { %1287 = vmatpush.bf16.msra.mxu0 %v4351_v6 }
  0xa5   :  { %1306 = vmatpush.bf16.msra.mxu1 %v4639_v7 }
  0xa8   :  { %1288 = vmatpush.bf16.msra.mxu0 %v4315_v12  ;;  %v986_v14 = vpop.f32.mrf.mxu0 }
  0xa9   :  { %1307 = vmatpush.bf16.msra.mxu1 %v4603_v13  ;;  %v1005_v15 = vpop.f32.mrf.mxu1 }
  0xaa   :  { %v6301_v25 = vadd.f32 %v1005_v15, %v986_v14 }
  0xab   :  { %1289 = vmatmul.bf16.vlgmr.msra.gmra.mxu0 %v5579_v44 }
  0xac   :  { %1308 = vmatmul.bf16.vlgmr.msra.gmra.mxu1 %v5590_v49  ;;  %7704 = vst [vmem:[#allocation6_spill] sm:$0xff] %v6301_v25 }
  0xad   :  { %1637 = vmatpush.msrb.mxu1 %v6287_v19 }
  0xb0   :  { %v1024_v16 = vpop.f32.mrf.mxu2  ;;  %v988_v18 = vpop.f32.mrf.mxu0 }
  0xb1   :  { %v1043_v17 = vpop.f32.mrf.mxu3  ;;  %v1007_v20 = vpop.f32.mrf.mxu1 }
  0xb2   :  { %v6299_v24 = vadd.f32 %v1007_v20, %v988_v18  ;;  %v6307_v32 = vadd.f32 %v1043_v17, %v1024_v16 }
  0xb4   :  { %7703 = vst [vmem:[#allocation5_spill] sm:$0xff] %v6299_v24  ;;  %v1328_v30 = vadd.f32 %v6299_v24, %v6301_v25 }
  0xb8   :  { %v1026_v44 = vpop.f32.mrf.mxu2  ;;  %v991_v22 = vpop.f32.mrf.mxu0 }
  0xb9   :  { %v1045_v49 = vpop.f32.mrf.mxu3  ;;  %v1010_v23 = vpop.f32.mrf.mxu1 }
  0xba   :  { %v6303_v26 = vadd.f32 %v1010_v23, %v991_v22  ;;  %v6309_v33 = vadd.f32 %v1045_v49, %v1026_v44 }
  0xbb   :  { %1294 = vmatmul.bf16.gmra.mxu0 %v5695_v34 }
  0xbc   :  { %1313 = vmatmul.bf16.gmra.mxu1 %v5706_v39  ;;  %v1329_v39 = vadd.f32 %v1328_v30, %v6303_v26  ;;  %v1339_v37 = vadd.f32 %v6309_v33, %v6307_v32 }
  0xc0   :  { %v1029_v27 = vpop.f32.mrf.mxu2  ;;  %v993_v29 = vpop.f32.mrf.mxu0 }
  0xc1   :  { %v1048_v28 = vpop.f32.mrf.mxu3  ;;  %v1012_v31 = vpop.f32.mrf.mxu1 }
  0xc2   :  { %v6311_v34 = vadd.f32 %v1012_v31, %v993_v29  ;;  %v6318_v38 = vadd.f32 %v1048_v28, %v1029_v27 }
  0xc4   :  { %v1331_v35 = vsel %vm1330_vm0, %v6311_v34, 0.0  ;;  %v1340_v48 = vadd.f32 %v1339_v37, %v6318_v38 }
  0xc5   :  { %v1332_v36 = vadd.f32 %v1331_v35, %v1329_v39 }
  0xc7   :  { %v1333_v40 = vrot.slane %v1332_v36, 4 }
  0xc8   :  { %v1031_v41 = vpop.f32.mrf.mxu2  ;;  %v1062_v43 = vpop.f32.mrf.mxu0 }
  0xc9   :  { %v1050_v42 = vpop.f32.mrf.mxu3  ;;  %v1334_v45 = vadd.f32 %v1333_v40, %v1332_v36  ;;  %v1081_v47 = vpop.f32.mrf.mxu1 }
  0xca   :  { %v6320_v46 = vadd.f32 %v1050_v42, %v1031_v41  ;;  %v6339_v9 = vadd.f32 %v1081_v47, %v1062_v43 }
  0xcb   :  { %v1335_v50 = vrot.slane %v1334_v45, 2 }
  0xcc   :  { %v1341_v51 = vsel %vm1330_vm0, %v6320_v46, 0.0  ;;  %7705 = vst [vmem:[#allocation7_spill] sm:$0xff] %v6339_v9 }
  0xcd   :  { %v1342_v52 = vadd.f32 %v1341_v51, %v1340_v48  ;;  %v1336_v53 = vadd.f32 %v1335_v50, %v1334_v45 }
  0xcf   :  { %v1343_v54 = vrot.slane %v1342_v52, 4  ;;  %v1337_v56 = vrot.slane %v1336_v53, 1 }
  0xd0   :  { %v1100_v55 = vpop.f32.mrf.mxu2  ;;  %v1064_v59 = vpop.f32.mrf.mxu0 }
  0xd1   :  { %v1344_v57 = vadd.f32 %v1343_v54, %v1342_v52  ;;  %v1119_v58 = vpop.f32.mrf.mxu3  ;;  %v1083_v61 = vpop.f32.mrf.mxu1  ;;  %v1338_v62 = vadd.f32 %v1337_v56, %v1336_v53  ;;  %v6366_v52 = vld [vmem:[%s7657_s2 + $0x20] sm:$0xff] }
  0xd2   :  { %v6337_v8 = vadd.f32 %v1083_v61, %v1064_v59  ;;  %v6345_v16 = vadd.f32 %v1119_v58, %v1100_v55  ;;  %1717 = vmatpush.msra.mxu1 %v6366_v52 }
  0xd3   :  { %v1345_v63 = vrot.slane %v1344_v57, 2  ;;  %1446 = vmatmul.f32.vlgmr.msra.gmra.mxu2 %v1338_v62 }
  0xd4   :  { %v1349_v14 = vadd.f32 %v6337_v8, %v6339_v9  ;;  %7706 = vst [vmem:[#allocation8_spill] sm:$0xff] %v6345_v16  ;;  %1525 = vmatpush.xpose.msra.mxu2 %v6366_v52 }
  0xd5   :  { %v1346_v0 = vadd.f32 %v1345_v63, %v1344_v57  ;;  %v6373_v57 = vld [vmem:[%s7657_s2 + $0x28] sm:$0xff] }
  0xd7   :  { %v1347_v2 = vrot.slane %v1346_v0, 1 }
  0xd8   :  { %v1102_v3 = vpop.f32.mrf.mxu2  ;;  %v1067_v5 = vpop.f32.mrf.mxu0 }
  0xd9   :  { %v1121_v4 = vpop.f32.mrf.mxu3  ;;  %v1348_v6 = vadd.f32 %v1347_v2, %v1346_v0  ;;  %v1086_v7 = vpop.f32.mrf.mxu1 }
  0xda   :  { %v6341_v10 = vadd.f32 %v1086_v7, %v1067_v5  ;;  %v6347_v17 = vadd.f32 %v1121_v4, %v1102_v3 }
  0xdb   :  { %1466 = vmatmul.f32.vlgmr.msra.gmra.mxu3 %v1348_v6 }
  0xdc   :  { %7707 = vst [vmem:[#allocation9_spill] sm:$0xff] %v6347_v17  ;;  %v1350_v20 = vadd.f32 %v1349_v14, %v6341_v10  ;;  %v1359_v22 = vadd.f32 %v6347_v17, %v6345_v16  ;;  %1545 = vmatpush.xpose.msra.mxu3 %v6373_v57 }
  0xe0   :  { %v1105_v11 = vpop.f32.mrf.mxu2  ;;  %v1069_v13 = vpop.f32.mrf.mxu0 }
  0xe1   :  { %v1124_v12 = vpop.f32.mrf.mxu3  ;;  %v1088_v15 = vpop.f32.mrf.mxu1 }
  0xe2   :  { %v6349_v18 = vadd.f32 %v1088_v15, %v1069_v13  ;;  %v6356_v23 = vadd.f32 %v1124_v12, %v1105_v11 }
  0xe4   :  { %v1351_v44 = vsel %vm1330_vm0, %v6349_v18, 0.0  ;;  %7708 = vst [vmem:[#allocation10_spill] sm:$0xff] %v6356_v23  ;;  %v1360_v36 = vadd.f32 %v1359_v22, %v6356_v23 }
  0xe5   :  { %v1352_v49 = vadd.f32 %v1351_v44, %v1350_v20 }
  0xe7   :  { %v1353_v27 = vrot.slane %v1352_v49, 4 }
  0xe8   :  { %v1107_v28 = vpop.f32.mrf.mxu2  ;;  %v1138_v30 = vpop.f32.mrf.mxu0 }
  0xe9   :  { %v1126_v29 = vpop.f32.mrf.mxu3  ;;  %v1354_v31 = vadd.f32 %v1353_v27, %v1352_v49  ;;  %v1157_v35 = vpop.f32.mrf.mxu1 }
  0xea   :  { %v6358_v39 = vadd.f32 %v1126_v29, %v1107_v28  ;;  %v6378_v3 = vadd.f32 %v1157_v35, %v1138_v30 }
  0xeb   :  { %v1355_v37 = vrot.slane %v1354_v31, 2 }
  0xec   :  { %v1361_v40 = vsel %vm1330_vm0, %v6358_v39, 0.0  ;;  %7709 = vst [vmem:[#allocation11_spill] sm:$0xff] %v6378_v3 }
  0xed   :  { %v1362_v41 = vadd.f32 %v1361_v40, %v1360_v36  ;;  %v1356_v42 = vadd.f32 %v1355_v37, %v1354_v31 }
  0xef   :  { %v1363_v43 = vrot.slane %v1362_v41, 4  ;;  %v1357_v47 = vrot.slane %v1356_v42, 1 }
  0xf0   :  { %v1176_v45 = vpop.f32.mrf.mxu2  ;;  %v1140_v51 = vpop.f32.mrf.mxu0 }
  0xf1   :  { %v1364_v48 = vadd.f32 %v1363_v43, %v1362_v41  ;;  %v1195_v50 = vpop.f32.mrf.mxu3  ;;  %v1159_v53 = vpop.f32.mrf.mxu1  ;;  %v1358_v54 = vadd.f32 %v1357_v47, %v1356_v42 }
  0xf2   :  { %v6376_v2 = vadd.f32 %v1159_v53, %v1140_v51  ;;  %v6384_v13 = vadd.f32 %v1195_v50, %v1176_v45 }
  0xf3   :  { %v1365_v55 = vrot.slane %v1364_v48, 2  ;;  %1486 = vmatmul.f32.vlgmr.msrb.gmra.mxu2 %v1358_v54 }
  0xf4   :  { %v1369_v11 = vadd.f32 %v6376_v2, %v6378_v3  ;;  %7710 = vst [vmem:[#allocation12_spill] sm:$0xff] %v6384_v13 }
  0xf5   :  { %v1366_v56 = vadd.f32 %v1365_v55, %v1364_v48  ;;  %v6405_v55 = vld [vmem:[%s7657_s2 + $0x30] sm:$0xff] }
  0xf6   :  { %1565 = vmatpush.xpose.msrb.mxu2 %v6405_v55 }
  0xf7   :  { %v1367_v58 = vrot.slane %v1366_v56, 1 }
  0xf8   :  { %v1178_v59 = vpop.f32.mrf.mxu2  ;;  %v1143_v62 = vpop.f32.mrf.mxu0 }
  0xf9   :  { %v1197_v61 = vpop.f32.mrf.mxu3  ;;  %v1368_v63 = vadd.f32 %v1367_v58, %v1366_v56  ;;  %v1162_v0 = vpop.f32.mrf.mxu1 }
  0xfa   :  { %v6380_v4 = vadd.f32 %v1162_v0, %v1143_v62  ;;  %v6386_v14 = vadd.f32 %v1197_v61, %v1178_v59  ;;  %v6412_v62 = vld [vmem:[%s7657_s2 + $0x38] sm:$0xff] }
  0xfb   :  { %1506 = vmatmul.f32.vlgmr.msrb.gmra.mxu3 %v1368_v63  ;;  %v6417_v63 = vld [vmem:[%s7657_s2 + $0x40] sm:$0xff] }
  0xfc   :  { %v1370_v20 = vadd.f32 %v1369_v11, %v6380_v4  ;;  %v1379_v22 = vadd.f32 %v6386_v14, %v6384_v13  ;;  %1585 = vmatpush.xpose.msrb.mxu3 %v6412_v62  ;;  %4856 = vmatpush.xpose.msk.msrb.mxu0 %vm1409_vm1, %v6417_v63 }
 0x100   :  { %v1181_v5 = vpop.f32.mrf.mxu2  ;;  %v1145_v7 = vpop.f32.mrf.mxu0  ;;  %1697 = vmatpush.msra.mxu0 %v6334_v1 }
 0x101   :  { %v1200_v6 = vpop.f32.mrf.mxu3  ;;  %v1164_v12 = vpop.f32.mrf.mxu1 }
 0x102   :  { %v6388_v15 = vadd.f32 %v1164_v12, %v1145_v7  ;;  %v6395_v27 = vadd.f32 %v1200_v6, %v1181_v5 }
 0x104   :  { %v1371_v44 = vsel %vm1330_vm0, %v6388_v15, 0.0  ;;  %v1380_v40 = vadd.f32 %v1379_v22, %v6395_v27 }
 0x105   :  { %v1372_v49 = vadd.f32 %v1371_v44, %v1370_v20 }
 0x107   :  { %v1373_v28 = vrot.slane %v1372_v49, 4 }
 0x108   :  { %v1183_v29 = vpop.f32.mrf.mxu2  ;;  %v1214_v31 = vpop.f32.mrf.mxu0 }
 0x109   :  { %v1202_v30 = vpop.f32.mrf.mxu3  ;;  %v1374_v35 = vadd.f32 %v1373_v28, %v1372_v49  ;;  %v1233_v37 = vpop.f32.mrf.mxu1 }
 0x10a   :  { %v6397_v36 = vadd.f32 %v1202_v30, %v1183_v29  ;;  %v6426_v44 = vadd.f32 %v1233_v37, %v1214_v31 }
 0x10b   :  { %v1375_v41 = vrot.slane %v1374_v35, 2 }
 0x10c   :  { %v1381_v42 = vsel %vm1330_vm0, %v6397_v36, 0.0  ;;  %7712 = vst [vmem:[#allocation14_spill] sm:$0xff] %v6426_v44 }
 0x10d   :  { %v1382_v43 = vadd.f32 %v1381_v42, %v1380_v40  ;;  %v1376_v45 = vadd.f32 %v1375_v41, %v1374_v35 }
 0x10f   :  { %v1383_v47 = vrot.slane %v1382_v43, 4  ;;  %v1377_v50 = vrot.slane %v1376_v45, 1 }
 0x110   :  { %v1252_v48 = vpop.f32.mrf.mxu2  ;;  %v1216_v54 = vpop.f32.mrf.mxu0 }
 0x111   :  { %v1384_v51 = vadd.f32 %v1383_v47, %v1382_v43  ;;  %v1271_v53 = vpop.f32.mrf.mxu3  ;;  %v1235_v56 = vpop.f32.mrf.mxu1  ;;  %v1378_v58 = vadd.f32 %v1377_v50, %v1376_v45 }
 0x112   :  { %v6424_v20 = vadd.f32 %v1235_v56, %v1216_v54  ;;  %v6432_v40 = vadd.f32 %v1271_v53, %v1252_v48 }
 0x113   :  { %v1385_v59 = vrot.slane %v1384_v51, 2  ;;  %1526 = vmatmul.f32.vlgmr.msra.gmra.mxu2 %v1378_v58 }
 0x114   :  { %1657 = vmatpush.msra.mxu2 %v6294_v21  ;;  %7711 = vst [vmem:[#allocation13_spill] sm:$0xff] %v6424_v20  ;;  %v1389_v30 = vadd.f32 %v6424_v20, %v6426_v44 }
 0x115   :  { %v1386_v61 = vadd.f32 %v1385_v59, %v1384_v51  ;;  %7714 = vst [vmem:[#allocation16_spill] sm:$0xff] %v6432_v40 }
 0x117   :  { %v1387_v0 = vrot.slane %v1386_v61, 1 }
 0x118   :  { %v1254_v5 = vpop.f32.mrf.mxu2  ;;  %v1219_v7 = vpop.f32.mrf.mxu0 }
 0x119   :  { %v1273_v6 = vpop.f32.mrf.mxu3  ;;  %v1388_v11 = vadd.f32 %v1387_v0, %v1386_v61  ;;  %v1238_v12 = vpop.f32.mrf.mxu1 }
 0x11a   :  { %v6428_v49 = vadd.f32 %v1238_v12, %v1219_v7  ;;  %v6434_v41 = vadd.f32 %v1273_v6, %v1254_v5 }
 0x11b   :  { %1546 = vmatmul.f32.vlgmr.msra.gmra.mxu3 %v1388_v11 }
 0x11c   :  { %1677 = vmatpush.msra.mxu3 %v6328_v60  ;;  %7713 = vst [vmem:[#allocation15_spill] sm:$0xff] %v6428_v49  ;;  %v1390_v43 = vadd.f32 %v1389_v30, %v6428_v49  ;;  %v1399_v45 = vadd.f32 %v6434_v41, %v6432_v40 }
 0x11d   :  { %7715 = vst [vmem:[#allocation17_spill] sm:$0xff] %v6434_v41 }
 0x120   :  { %v1257_v22 = vpop.f32.mrf.mxu2  ;;  %v1221_v29 = vpop.f32.mrf.mxu0 }
 0x121   :  { %v1276_v28 = vpop.f32.mrf.mxu3  ;;  %v1240_v35 = vpop.f32.mrf.mxu1 }
 0x122   :  { %v6436_v42 = vadd.f32 %v1240_v35, %v1221_v29  ;;  %v6443_v47 = vadd.f32 %v1276_v28, %v1257_v22 }
 0x124   :  { %7716 = vst [vmem:[#allocation18_spill] sm:$0xff] %v6436_v42  ;;  %v1391_v31 = vsel %vm1330_vm0, %v6436_v42, 0.0  ;;  %v1400_v59 = vadd.f32 %v1399_v45, %v6443_v47 }
 0x125   :  { %v1392_v37 = vadd.f32 %v1391_v31, %v1390_v43  ;;  %7717 = vst [vmem:[#allocation19_spill] sm:$0xff] %v6443_v47 }
 0x127   :  { %v1393_v50 = vrot.slane %v1392_v37, 4 }
 0x128   :  { %v1259_v51 = vpop.f32.mrf.mxu2  ;;  %v1290_v48 = vpop.f32.mrf.mxu0 }
 0x129   :  { %v1278_v54 = vpop.f32.mrf.mxu3  ;;  %v1394_v53 = vadd.f32 %v1393_v50, %v1392_v37  ;;  %v1309_v58 = vpop.f32.mrf.mxu1 }
 0x12a   :  { %v6445_v56 = vadd.f32 %v1278_v54, %v1259_v51  ;;  %v6454_v51 = vadd.f32 %v1309_v58, %v1290_v48 }
 0x12b   :  { %v1395_v61 = vrot.slane %v1394_v53, 2 }
 0x12c   :  { %7718 = vst [vmem:[#allocation20_spill] sm:$0xff] %v6445_v56  ;;  %v1401_v0 = vsel %vm1330_vm0, %v6445_v56, 0.0 }
 0x12d   :  { %v1402_v5 = vadd.f32 %v1401_v0, %v1400_v59  ;;  %v1396_v6 = vadd.f32 %v1395_v61, %v1394_v53  ;;  %7720 = vst [vmem:[#allocation22_spill] sm:$0xff] %v6454_v51  ;;  %v1410_v59 = vsel %vm1409_vm1, %v6454_v51, 0.0 }
 0x12f   :  { %v1403_v7 = vrot.slane %v1402_v5, 4  ;;  %v1397_v11 = vrot.slane %v1396_v6, 1 }
 0x130   :  { %v1292_v22 = vpop.f32.mrf.mxu0 }
 0x131   :  { %v1404_v12 = vadd.f32 %v1403_v7, %v1402_v5  ;;  %v1311_v28 = vpop.f32.mrf.mxu1  ;;  %v1398_v29 = vadd.f32 %v1397_v11, %v1396_v6 }
 0x132   :  { %v6451_v50 = vadd.f32 %v1311_v28, %v1292_v22 }
 0x133   :  { %v1405_v30 = vrot.slane %v1404_v12, 2  ;;  %1566 = vmatmul.f32.vlgmr.msrb.gmra.mxu2 %v1398_v29 }
 0x134   :  { %1737 = vmatpush.msrb.mxu2 %v6373_v57  ;;  %7719 = vst [vmem:[#allocation21_spill] sm:$0xff] %v6451_v50  ;;  %v1411_v53 = vsel %vm1409_vm1, %v6451_v50, 0.0 }
 0x135   :  { %v1406_v35 = vadd.f32 %v1405_v30, %v1404_v12  ;;  %v1412_v5 = vadd.f32 %v1411_v53, %v1410_v59 }
 0x137   :  { %v1407_v43 = vrot.slane %v1406_v35, 1 }
 0x138   :  { %v1295_v31 = vpop.f32.mrf.mxu0 }
 0x139   :  { %v1408_v37 = vadd.f32 %v1407_v43, %v1406_v35  ;;  %v1314_v45 = vpop.f32.mrf.mxu1 }
 0x13a   :  { %v6456_v54 = vadd.f32 %v1314_v45, %v1295_v31 }
 0x13b   :  { %1586 = vmatmul.f32.vlgmr.msrb.gmra.mxu3 %v1408_v37  ;;  %v5229_v37 = vmov 3900.0  }
 0x13c   :  { %1757 = vmatpush.msrb.mxu3 %v6405_v55  ;;  %7721 = vst [vmem:[#allocation23_spill] sm:$0xff] %v6456_v54  ;;  %v1413_v61 = vsel %vm1409_vm1, %v6456_v54, 0.0  ;;  %5169 = vrcp.f32 %v5229_v37 }
 0x13d   :  { %v1414_v11 = vadd.f32 %v1413_v61, %v1412_v5 }
 0x140   :  { %v1297_v0 = vpop.f32.mrf.mxu0 }
 0x141   :  { %v1316_v6 = vpop.f32.mrf.mxu1 }
 0x142   :  { %v6464_v7 = vadd.f32 %v1316_v6, %v1297_v0  ;;  %v5170_v59 = vpop.eup %5169 }
 0x143   :  { %v1611_v61 = vmul.f32 3900.0, %v5170_v59  ;;  %vm1615_vm3 = vweird.f32 %v5170_v59 }
 0x144   :  { %7722 = vst [vmem:[#allocation24_spill] sm:$0xff] %v6464_v7  ;;  %v1416_v48 = vsel %vm1415_vm2, %v6464_v7, 0.0 }
 0x145   :  { %v1417_v58 = vadd.f32 %v1416_v48, %v1414_v11  ;;  %v1612_v11 = vsub.f32 1.0, %v1611_v61 }
 0x147   :  { %v1418_v12 = vrot.slane %v1417_v58, 4 }
 0x149   :  { %v1419_v22 = vadd.f32 %v1418_v12, %v1417_v58  ;;  %v1613_v12 = vmul.f32 %v5170_v59, %v1612_v11 }
 0x14b   :  { %v1420_v28 = vrot.slane %v1419_v22, 2 }
 0x14d   :  { %v1421_v29 = vadd.f32 %v1420_v28, %v1419_v22 }
 0x14f   :  { %v1422_v30 = vrot.slane %v1421_v29, 1 }
 0x151   :  { %v1423_v35 = vadd.f32 %v1422_v30, %v1421_v29 }
 0x153   :  { %4857 = vmatmul.msk.f32.vlgmr.msrb.gmra.mxu0 %vm1409_vm1, %v1423_v35  ;;  %v1614_v35 = vadd.f32 %v5170_v59, %v1613_v12 }
 0x154   :  { %1777 = vmatpush.msrb.mxu0 %v6412_v62 }
 0x155   :  { %v6470_v50 = vsel %vm1615_vm3, %v5170_v59, %v1614_v35 }
 0x156   :  { %v1447_v43 = vpop.f32.mrf.mxu2 }
 0x15e   :  { %v1467_v31 = vpop.f32.mrf.mxu3 }
 0x15f   :  { %v1468_v5 = vadd.f32 %v1467_v31, %v1447_v43 }
 0x176   :  { %v1487_v45 = vpop.f32.mrf.mxu2 }
 0x177   :  { %v1488_v48 = vadd.f32 %v1487_v45, %v1468_v5 }
 0x17e   :  { %v1507_v53 = vpop.f32.mrf.mxu3 }
 0x17f   :  { %v1508_v58 = vadd.f32 %v1507_v53, %v1488_v48 }
 0x196   :  { %v1527_v0 = vpop.f32.mrf.mxu2 }
 0x197   :  { %v1528_v22 = vadd.f32 %v1527_v0, %v1508_v58 }
 0x19e   :  { %v1547_v6 = vpop.f32.mrf.mxu3 }
 0x19f   :  { %v1548_v29 = vadd.f32 %v1547_v6, %v1528_v22 }
 0x1b6   :  { %v1567_v28 = vpop.f32.mrf.mxu2 }
 0x1b7   :  { %v1568_v7 = vadd.f32 %v1567_v28, %v1548_v29 }
 0x1be   :  { %v1587_v30 = vpop.f32.mrf.mxu3 }
 0x1bf   :  { %v1588_v54 = vadd.f32 %v1587_v30, %v1568_v7 }
 0x1d0   :  { %v1607_v37 = vpop.f32.mrf.mxu0 }
 0x1d1   :  { %v1608_v51 = vadd.f32 %v1607_v37, %v1588_v54 }
 0x1d3   :  { %v6473_v43 = vmul.f32 %v6470_v50, %v1608_v51 }
 0x1d5   :  { %4858 = vmatmul.msk.f32.vlgmr.msrb.gmra.mxu1 %vm1618_vm4, %v6473_v43  ;;  %4859 = vmatmul.msk.f32.vlgmr.msra.gmra.mxu2 %vm1618_vm4, %v6473_v43 }
 0x1d6   :  { %4860 = vmatmul.msk.f32.vlgmr.msra.gmra.mxu3 %vm1618_vm4, %v6473_v43  ;;  %4861 = vmatmul.msk.f32.vlgmr.msra.gmra.mxu0 %vm1618_vm4, %v6473_v43 }
 0x1d7   :  { %1797 = vmatpush.msrb.mxu1 %v6417_v63  ;;  %1994 = vmatpush.xpose.msra.mxu2 %v6287_v19 }
 0x1d8   :  { %2014 = vmatpush.xpose.msra.mxu3 %v6294_v21  ;;  %2034 = vmatpush.xpose.msra.mxu0 %v6328_v60 }
 0x1dd   :  { %4862 = vmatmul.msk.f32.vlgmr.msra.gmra.mxu1 %vm1618_vm4, %v6473_v43  ;;  %4863 = vmatmul.msk.f32.vlgmr.msrb.gmra.mxu2 %vm1618_vm4, %v6473_v43 }
 0x1de   :  { %4864 = vmatmul.msk.f32.vlgmr.msrb.gmra.mxu3 %vm1618_vm4, %v6473_v43  ;;  %4865 = vmatmul.msk.f32.vlgmr.msrb.gmra.mxu0 %vm1618_vm4, %v6473_v43 }
 0x1df   :  { %2054 = vmatpush.xpose.msra.mxu1 %v6334_v1  ;;  %2074 = vmatpush.xpose.msrb.mxu2 %v6366_v52 }
 0x1e0   :  { %2094 = vmatpush.xpose.msrb.mxu3 %v6373_v57  ;;  %2114 = vmatpush.xpose.msrb.mxu0 %v6405_v55 }
 0x1e5   :  { %4866 = vmatmul.msk.f32.vlgmr.msrb.gmra.mxu1 %vm1618_vm4, %v6473_v43 }
 0x1e6   :  { %2134 = vmatpush.xpose.msrb.mxu1 %v6412_v62 }
 0x252   :  { %v1639_v51 = vpop.f32.mrf.mxu1 }
 0x253   :  { %v1802_v54 = vperm.slane %v1639_v51, 0  ;;  %v1699_v7 = vpop.f32.mrf.mxu0 }
 0x254   :  { %v1805_v31 = vperm.slane %v1699_v7, 0 }
 0x255   :  { %v1811_v45 = vsub.f32 %v6301_v25, %v1802_v54  ;;  %v1820_v53 = vsub.f32 %v6299_v24, %v1802_v54  ;;  %v1829_v59 = vsub.f32 %v6303_v26, %v1802_v54  ;;  %v1838_v61 = vsub.f32 %v6311_v34, %v1802_v54 }
 0x256   :  { %v1814_v0 = vsub.f32 %v6345_v16, %v1805_v31  ;;  %v1823_v5 = vsub.f32 %v6347_v17, %v1805_v31  ;;  %v1832_v6 = vsub.f32 %v6356_v23, %v1805_v31  ;;  %v1841_v11 = vsub.f32 %v6358_v39, %v1805_v31 }
 0x257   :  { %v1847_v48 = vmul.f32 %v1811_v45, %v1811_v45  ;;  %v1856_v58 = vmul.f32 %v1820_v53, %v1820_v53  ;;  %v1874_v12 = vmul.f32 %v1838_v61, %v1838_v61  ;;  %v1865_v35 = vmul.f32 %v1829_v59, %v1829_v59 }
 0x258   :  { %v1850_v22 = vmul.f32 %v1814_v0, %v1814_v0  ;;  %v1859_v28 = vmul.f32 %v1823_v5, %v1823_v5  ;;  %v1877_v29 = vmul.f32 %v1841_v11, %v1841_v11  ;;  %v1659_v30 = vpop.f32.mrf.mxu2  ;;  %v1868_v51 = vmul.f32 %v1832_v6, %v1832_v6 }
 0x259   :  { %v1883_v37 = vadd.f32 %v1856_v58, %v1847_v48  ;;  %v1803_v7 = vperm.slane %v1659_v30, 0  ;;  %v1679_v54 = vpop.f32.mrf.mxu3  ;;  %v1885_v16 = vsel %vm1330_vm0, %v1874_v12, 0.0 }
 0x25a   :  { %v1913_v25 = vadd.f32 %v1859_v28, %v1850_v22  ;;  %v1915_v17 = vsel %vm1330_vm0, %v1877_v29, 0.0  ;;  %v1804_v23 = vperm.slane %v1679_v54, 0  ;;  %v1719_v24 = vpop.f32.mrf.mxu1 }
 0x25b   :  { %v1884_v31 = vadd.f32 %v1883_v37, %v1865_v35  ;;  %v1812_v45 = vsub.f32 %v6307_v32, %v1803_v7  ;;  %v1821_v53 = vsub.f32 %v6309_v33, %v1803_v7  ;;  %v1830_v61 = vsub.f32 %v6318_v38, %v1803_v7  ;;  %v1779_v22 = vpop.f32.mrf.mxu0 }
 0x25c   :  { %v1914_v0 = vadd.f32 %v1913_v25, %v1868_v51  ;;  %v1839_v59 = vsub.f32 %v6320_v46, %v1803_v7  ;;  %v1813_v5 = vsub.f32 %v6339_v9, %v1804_v23  ;;  %v1822_v6 = vsub.f32 %v6337_v8, %v1804_v23 }
 0x25d   :  { %v6518_v11 = vadd.f32 %v1885_v16, %v1884_v31  ;;  %v1848_v48 = vmul.f32 %v1812_v45, %v1812_v45  ;;  %v1857_v58 = vmul.f32 %v1821_v53, %v1821_v53  ;;  %v1866_v12 = vmul.f32 %v1830_v61, %v1830_v61 }
 0x25e   :  { %v6520_v28 = vadd.f32 %v1915_v17, %v1914_v0  ;;  %v1875_v29 = vmul.f32 %v1839_v59, %v1839_v59  ;;  %v1831_v30 = vsub.f32 %v6341_v10, %v1804_v23  ;;  %v1840_v35 = vsub.f32 %v6349_v18, %v1804_v23 }
 0x25f   :  { %v1893_v25 = vadd.f32 %v1857_v58, %v1848_v48  ;;  %v1849_v37 = vmul.f32 %v1813_v5, %v1813_v5  ;;  %v1858_v51 = vmul.f32 %v1822_v6, %v1822_v6  ;;  %v1806_v7 = vperm.slane %v1719_v24, 0 }
 0x260   :  { %v1895_v54 = vsel %vm1330_vm0, %v1875_v29, 0.0  ;;  %v1867_v9 = vmul.f32 %v1831_v30, %v1831_v30  ;;  %v1876_v16 = vmul.f32 %v1840_v35, %v1840_v35  ;;  %v1809_v31 = vperm.slane %v1779_v22, 0  ;;  %v1739_v22 = vpop.f32.mrf.mxu2 }
 0x261   :  { %v1894_v45 = vadd.f32 %v1893_v25, %v1866_v12  ;;  %v1903_v53 = vadd.f32 %v1858_v51, %v1849_v37  ;;  %v1815_v61 = vsub.f32 %v6378_v3, %v1806_v7  ;;  %v1824_v17 = vsub.f32 %v6376_v2, %v1806_v7  ;;  %v1759_v25 = vpop.f32.mrf.mxu3 }
 0x262   :  { %v1905_v0 = vsel %vm1330_vm0, %v1876_v16, 0.0  ;;  %v1833_v59 = vsub.f32 %v6380_v4, %v1806_v7  ;;  %v1842_v23 = vsub.f32 %v6388_v15, %v1806_v7  ;;  %v1818_v5 = vsub.f32 %v6432_v40, %v1809_v31  ;;  %v1799_v37 = vpop.f32.mrf.mxu1 }
 0x263   :  { %v6531_v24 = vadd.f32 %v1895_v54, %v1894_v45  ;;  %v1904_v6 = vadd.f32 %v1903_v53, %v1867_v9  ;;  %v1851_v48 = vmul.f32 %v1815_v61, %v1815_v61  ;;  %v1860_v58 = vmul.f32 %v1824_v17, %v1824_v17 }
 0x264   :  { %v1869_v12 = vmul.f32 %v1833_v59, %v1833_v59  ;;  %v1878_v29 = vmul.f32 %v1842_v23, %v1842_v23  ;;  %v1827_v30 = vsub.f32 %v6434_v41, %v1809_v31  ;;  %v1836_v35 = vsub.f32 %v6443_v47, %v1809_v31 }
 0x265   :  { %v6535_v51 = vadd.f32 %v1905_v0, %v1904_v6  ;;  %v1923_v16 = vadd.f32 %v1860_v58, %v1851_v48  ;;  %v1845_v7 = vsub.f32 %v6445_v56, %v1809_v31  ;;  %v1854_v40 = vmul.f32 %v1818_v5, %v1818_v5 }
 0x266   :  { %v1925_v54 = vsel %vm1330_vm0, %v1878_v29, 0.0  ;;  %v1863_v9 = vmul.f32 %v1827_v30, %v1827_v30  ;;  %v1872_v45 = vmul.f32 %v1836_v35, %v1836_v35  ;;  %v1807_v53 = vperm.slane %v1739_v22, 0 }
 0x267   :  { %v1924_v61 = vadd.f32 %v1923_v16, %v1869_v12  ;;  %v1881_v17 = vmul.f32 %v1845_v7, %v1845_v7  ;;  %v1808_v59 = vperm.slane %v1759_v25, 0  ;;  %v1810_v23 = vperm.slane %v1799_v37, 0 }
 0x268   :  { %v1953_v41 = vadd.f32 %v1863_v9, %v1854_v40  ;;  %v1816_v47 = vsub.f32 %v6384_v13, %v1807_v53  ;;  %v1825_v3 = vsub.f32 %v6386_v14, %v1807_v53  ;;  %v1834_v0 = vsub.f32 %v6395_v27, %v1807_v53 }
 0x269   :  { %v1926_v6 = vadd.f32 %v1925_v54, %v1924_v61  ;;  %v1955_v31 = vsel %vm1330_vm0, %v1881_v17, 0.0  ;;  %v1843_v5 = vsub.f32 %v6397_v36, %v1807_v53  ;;  %v1817_v48 = vsub.f32 %v6426_v44, %v1808_v59  ;;  %v7723_v54 = vld [vmem:[#allocation22_spill] sm:$0xff] }
 0x26a   :  { %v1954_v58 = vadd.f32 %v1953_v41, %v1872_v45  ;;  %v1852_v22 = vmul.f32 %v1816_v47, %v1816_v47  ;;  %v1861_v12 = vmul.f32 %v1825_v3, %v1825_v3  ;;  %v1870_v29 = vmul.f32 %v1834_v0, %v1834_v0  ;;  %v7724_v45 = vld [vmem:[#allocation21_spill] sm:$0xff] }
 0x26b   :  { %v1879_v30 = vmul.f32 %v1843_v5, %v1843_v5  ;;  %v1826_v40 = vsub.f32 %v6424_v20, %v1808_v59  ;;  %v1835_v35 = vsub.f32 %v6428_v49, %v1808_v59  ;;  %v1844_v25 = vsub.f32 %v6436_v42, %v1808_v59  ;;  %v7725_v5 = vld [vmem:[#allocation23_spill] sm:$0xff]  ;;  %v7726_v59 = vld [vmem:[#allocation24_spill] sm:$0xff] }
 0x26c   :  { %v1956_v37 = vadd.f32 %v1955_v31, %v1954_v58  ;;  %v1933_v16 = vadd.f32 %v1861_v12, %v1852_v22  ;;  %v1853_v7 = vmul.f32 %v1817_v48, %v1817_v48  ;;  %v1819_v9 = vsub.f32 %v7723_v54, %v1810_v23 }
 0x26d   :  { %v1935_v53 = vsel %vm1330_vm0, %v1879_v30, 0.0  ;;  %v1862_v61 = vmul.f32 %v1826_v40, %v1826_v40  ;;  %v1871_v17 = vmul.f32 %v1835_v35, %v1835_v35  ;;  %v1880_v41 = vmul.f32 %v1844_v25, %v1844_v25 }
 0x26e   :  { %v1957_v47 = vrot.slane %v1956_v37, 4  ;;  %v1934_v3 = vadd.f32 %v1933_v16, %v1870_v29  ;;  %v1828_v0 = vsub.f32 %v7724_v45, %v1810_v23  ;;  %v1837_v44 = vsub.f32 %v7725_v5, %v1810_v23 }
 0x26f   :  { %v1943_v20 = vadd.f32 %v1862_v61, %v1853_v7  ;;  %v1945_v49 = vsel %vm1330_vm0, %v1880_v41, 0.0  ;;  %v1846_v31 = vsub.f32 %v7726_v59, %v1810_v23  ;;  %v1855_v58 = vmul.f32 %v1819_v9, %v1819_v9 }
 0x270   :  { %v1958_v48 = vadd.f32 %v1957_v47, %v1956_v37  ;;  %v1936_v22 = vadd.f32 %v1935_v53, %v1934_v3  ;;  %v1864_v12 = vmul.f32 %v1828_v0, %v1828_v0  ;;  %v1873_v54 = vmul.f32 %v1837_v44, %v1837_v44 }
 0x271   :  { %v1944_v30 = vadd.f32 %v1943_v20, %v1871_v17  ;;  %v1882_v40 = vmul.f32 %v1846_v31, %v1846_v31  ;;  %v1963_v35 = vsel %vm1409_vm1, %v1855_v58, 0.0  ;;  %v1887_v29 = vrot.slane %v6518_v11, 4 }
 0x272   :  { %v1964_v25 = vsel %vm1409_vm1, %v1864_v12, 0.0  ;;  %v1966_v16 = vsel %vm1409_vm1, %v1873_v54, 0.0  ;;  %v1917_v7 = vrot.slane %v6520_v28, 4  ;;  %v1897_v61 = vrot.slane %v6531_v24, 4 }
 0x273   :  { %v1946_v23 = vadd.f32 %v1945_v49, %v1944_v30  ;;  %v1965_v9 = vadd.f32 %v1964_v25, %v1963_v35  ;;  %v1968_v37 = vsel %vm1415_vm2, %v1882_v40, 0.0  ;;  %v1888_v44 = vadd.f32 %v1887_v29, %v6518_v11 }
 0x274   :  { %v1918_v20 = vadd.f32 %v1917_v7, %v6520_v28  ;;  %v1898_v53 = vadd.f32 %v1897_v61, %v6531_v24  ;;  %v1907_v17 = vrot.slane %v6535_v51, 4  ;;  %v1927_v41 = vrot.slane %v1926_v6, 4 }
 0x275   :  { %v1947_v47 = vrot.slane %v1946_v23, 4  ;;  %v1967_v3 = vadd.f32 %v1966_v16, %v1965_v9  ;;  %v1889_v54 = vrot.slane %v1888_v44, 2  ;;  %v1959_v0 = vrot.slane %v1958_v48, 2 }
 0x276   :  { %v1919_v31 = vrot.slane %v1918_v20, 2  ;;  %v1899_v58 = vrot.slane %v1898_v53, 2  ;;  %v1908_v49 = vadd.f32 %v1907_v17, %v6535_v51  ;;  %v1928_v12 = vadd.f32 %v1927_v41, %v1926_v6 }
 0x277   :  { %v1948_v30 = vadd.f32 %v1947_v47, %v1946_v23  ;;  %v1969_v40 = vadd.f32 %v1968_v37, %v1967_v3  ;;  %v1890_v35 = vadd.f32 %v1889_v54, %v1888_v44  ;;  %v1960_v61 = vadd.f32 %v1959_v0, %v1958_v48 }
 0x278   :  { %v1920_v11 = vadd.f32 %v1919_v31, %v1918_v20  ;;  %v1900_v29 = vadd.f32 %v1899_v58, %v1898_v53  ;;  %v1909_v28 = vrot.slane %v1908_v49, 2  ;;  %v1929_v25 = vrot.slane %v1928_v12, 2 }
 0x279   :  { %v1970_v24 = vrot.slane %v1969_v40, 4  ;;  %v1891_v7 = vrot.slane %v1890_v35, 1  ;;  %v1937_v45 = vrot.slane %v1936_v22, 4  ;;  %v1949_v53 = vrot.slane %v1948_v30, 2 }
 0x27a   :  { %v1921_v5 = vrot.slane %v1920_v11, 1  ;;  %v1901_v16 = vrot.slane %v1900_v29, 1  ;;  %v1910_v9 = vadd.f32 %v1909_v28, %v1908_v49  ;;  %v1930_v59 = vadd.f32 %v1929_v25, %v1928_v12 }
 0x27b   :  { %v1971_v56 = vadd.f32 %v1970_v24, %v1969_v40  ;;  %v1892_v42 = vadd.f32 %v1891_v7, %v1890_v35  ;;  %v1938_v13 = vadd.f32 %v1937_v45, %v1936_v22  ;;  %v1961_v48 = vrot.slane %v1960_v61, 1 }
 0x27c   :  { %v1922_v51 = vadd.f32 %v1921_v5, %v1920_v11  ;;  %v1902_v6 = vadd.f32 %v1901_v16, %v1900_v29  ;;  %v1911_v23 = vrot.slane %v1910_v9, 1  ;;  %v1931_v44 = vrot.slane %v1930_v59, 1 }
 0x27d   :  { %v1972_v37 = vrot.slane %v1971_v56, 2  ;;  %1995 = vmatmul.f32.vlgmr.msra.gmra.mxu2 %v1892_v42  ;;  %v1939_v20 = vrot.slane %v1938_v13, 2  ;;  %v1950_v47 = vadd.f32 %v1949_v53, %v1948_v30  ;;  %v1962_v3 = vadd.f32 %v1961_v48, %v1960_v61 }
 0x27e   :  { %2055 = vmatmul.f32.vlgmr.msra.gmra.mxu1 %v1922_v51  ;;  %2015 = vmatmul.f32.vlgmr.msra.gmra.mxu3 %v1902_v6  ;;  %v1912_v17 = vadd.f32 %v1911_v23, %v1910_v9  ;;  %v1932_v5 = vadd.f32 %v1931_v44, %v1930_v59  ;;  %v6581_v23 = vld [vmem:[%s7660_s5] sm:$0xff]  ;;  %vm3662_vm2 = vcmask 1041408  }
 0x27f   :  { %v1940_v41 = vadd.f32 %v1939_v20, %v1938_v13  ;;  %4867 = vmatpush.xpose.msk.msra.mxu2 %vm1409_vm1, %v6417_v63  ;;  %2194 = vmatpush.msra.mxu3 %v6287_v19  ;;  %v1973_v45 = vadd.f32 %v1972_v37, %v1971_v56  ;;  %v1951_v22 = vrot.slane %v1950_v47, 1  ;;  %v2812_v44 = vsel %vm2544_vm5, %v6581_v23, 0.0 }
 0x280   :  { %2035 = vmatmul.f32.vlgmr.msra.gmra.mxu0 %v1912_v17  ;;  %2234 = vmatpush.msra.mxu1 %v6328_v60 }
 0x281   :  { %v1941_v42 = vrot.slane %v1940_v41, 1  ;;  %2214 = vmatpush.msra.mxu0 %v6294_v21  ;;  %v1952_v0 = vadd.f32 %v1951_v22, %v1950_v47  ;;  %v1974_v31 = vrot.slane %v1973_v45, 1  ;;  %2813 = vadd.xlane.f32.xlu0 %v2812_v44  ;;  %v6591_v47 = vld [vmem:[%s7660_s5 + $0x8] sm:$0xff]  ;;  %v2173_v22 = vld [vmem:[%s7659_s4] sm:$0x1]  ;;  %s5253_s4 = smov 119  }
 0x282   :  { %v2992_v44 = vld [vmem:[%s7662_s7 + $0x2e8] sm:$0xff] }
 0x283   :  { %v1942_v54 = vadd.f32 %v1941_v42, %v1940_v41  ;;  %v1975_v19 = vadd.f32 %v1974_v31, %v1973_v45  ;;  %v2815_v45 = vsel %vm2544_vm5, %v6591_v47, 0.0  ;;  %v5202_v42 = vld [vmem:[%s7657_s2] sm:$0xff] }
 0x284   :  { %v3007_v31 = vld [vmem:[%s7662_s7 + $0x360] sm:$0xff] }
 0x285   :  { %2075 = vmatmul.f32.vlgmr.msrb.gmra.mxu2 %v1932_v5  ;;  %v5201_v5 = vld [vmem:[%s7657_s2 + $0x8] sm:$0xff]  ;;  %s5252_s2 = smov 123  }
 0x286   :  { %2135 = vmatmul.f32.vlgmr.msrb.gmra.mxu1 %v1962_v3  ;;  %2095 = vmatmul.f32.vlgmr.msrb.gmra.mxu3 %v1942_v54  ;;  %v3035_v54 = vld [vmem:[%s7662_s7 + $0x440] sm:$0xff] }
 0x287   :  { %2254 = vmatpush.msrb.mxu2 %v6334_v1  ;;  %2274 = vmatpush.msrb.mxu3 %v6366_v52 }
 0x288   :  { %2115 = vmatmul.f32.vlgmr.msrb.gmra.mxu0 %v1952_v0  ;;  %2314 = vmatpush.msrb.mxu1 %v6405_v55  ;;  %v3036_v0 = vld [vmem:[%s7662_s7 + $0x448] sm:$0xff] }
 0x289   :  { %2294 = vmatpush.msrb.mxu0 %v6373_v57  ;;  %2816 = vadd.xlane.f32.xlu0 %v2815_v45  ;;  %v2974_v45 = vld [vmem:[%s7662_s7 + $0x258] sm:$0xff] }
 0x28d   :  { %4868 = vmatmul.msk.f32.vlgmr.msra.gmra.mxu2 %vm1409_vm1, %v1975_v19  ;;  %v3026_v19 = vld [vmem:[%s7662_s7 + $0x3f8] sm:$0xff] }
 0x28e   :  { %2334 = vmatpush.msra.mxu2 %v6412_v62 }
 0x2fb   :  { %v2056_v58 = vpop.f32.mrf.mxu1 }
 0x2fd   :  { %v2036_v56 = vpop.f32.mrf.mxu0 }
 0x300   :  { %v1996_v21 = vpop.f32.mrf.mxu2 }
 0x301   :  { %v2016_v13 = vpop.f32.mrf.mxu3 }
 0x302   :  { %v2017_v59 = vadd.f32 %v2016_v13, %v1996_v21  ;;  %v3027_v21 = vld [vmem:[%s7662_s7 + $0x400] sm:$0xff]  ;;  %v2998_v13 = vld [vmem:[%s7662_s7 + $0x318] sm:$0xff] }
 0x303   :  { %v2136_v25 = vpop.f32.mrf.mxu1 }
 0x304   :  { %v2037_v49 = vadd.f32 %v2036_v56, %v2017_v59  ;;  %v3037_v56 = vld [vmem:[%s7662_s7 + $0x450] sm:$0xff] }
 0x305   :  { %v2116_v29 = vpop.f32.mrf.mxu0  ;;  %v3017_v59 = vld [vmem:[%s7662_s7 + $0x3b0] sm:$0xff] }
 0x306   :  { %v2057_v12 = vadd.f32 %v2056_v58, %v2037_v49  ;;  %v3018_v58 = vld [vmem:[%s7662_s7 + $0x3b8] sm:$0xff]  ;;  %v2989_v49 = vld [vmem:[%s7662_s7 + $0x2d0] sm:$0xff] }
 0x308   :  { %v2076_v30 = vpop.f32.mrf.mxu2 }
 0x309   :  { %v2077_v40 = vadd.f32 %v2076_v30, %v2057_v12  ;;  %v2096_v35 = vpop.f32.mrf.mxu3  ;;  %v3028_v12 = vld [vmem:[%s7662_s7 + $0x408] sm:$0xff] }
 0x30a   :  { %v3008_v30 = vld [vmem:[%s7662_s7 + $0x368] sm:$0xff] }
 0x30b   :  { %v2097_v11 = vadd.f32 %v2096_v35, %v2077_v40  ;;  %v3009_v40 = vld [vmem:[%s7662_s7 + $0x370] sm:$0xff]  ;;  %v2980_v35 = vld [vmem:[%s7662_s7 + $0x288] sm:$0xff] }
 0x30d   :  { %v2117_v28 = vadd.f32 %v2116_v29, %v2097_v11  ;;  %v3019_v11 = vld [vmem:[%s7662_s7 + $0x3c0] sm:$0xff] }
 0x30e   :  { %v2999_v29 = vld [vmem:[%s7662_s7 + $0x320] sm:$0xff] }
 0x30f   :  { %v2137_v24 = vadd.f32 %v2136_v25, %v2117_v28  ;;  %v3000_v28 = vld [vmem:[%s7662_s7 + $0x328] sm:$0xff]  ;;  %v2971_v25 = vld [vmem:[%s7662_s7 + $0x240] sm:$0xff] }
 0x310   :  { %v2156_v7 = vpop.f32.mrf.mxu2 }
 0x311   :  { %v2157_v61 = vadd.f32 %v2156_v7, %v2137_v24  ;;  %v3010_v24 = vld [vmem:[%s7662_s7 + $0x378] sm:$0xff] }
 0x312   :  { %v2990_v7 = vld [vmem:[%s7662_s7 + $0x2d8] sm:$0xff] }
 0x313   :  { %v2159_v16 = vmul.f32 %v2157_v61, %v6470_v50  ;;  %v2160_v50 = vld [vmem:[%s7658_s3] sm:$0x1] }
 0x314   :  { %v2991_v61 = vld [vmem:[%s7662_s7 + $0x2e0] sm:$0xff] }
 0x315   :  { %v2161_v9 = vadd.f32 1e-05, %v2159_v16  ;;  %v2962_v16 = vld [vmem:[%s7662_s7 + $0x1f8] sm:$0xff] }
 0x317   :  { %5171 = vrsqrt.f32 %v2161_v9  ;;  %vm2168_vm7 = vweird.f32 %v2161_v9 }
 0x31d   :  { %v5172_v51 = vpop.eup %5171 }
 0x31e   :  { %v2163_v6 = vmul.f32 %v5172_v51, %v2161_v9  ;;  %vm2169_vm6 = vweird.f32 %v5172_v51  ;;  %v3001_v9 = vld [vmem:[%s7662_s7 + $0x330] sm:$0xff] }
 0x31f   :  { %vm2170_vm8 = vmor %vm2168_vm7, %vm2169_vm6  ;;  %vm4034_vm7 = vcmask 523264  }
 0x320   :  { %v2164_v37 = vmul.f32 %v5172_v51, %v2163_v6  ;;  %v2982_v6 = vld [vmem:[%s7662_s7 + $0x298] sm:$0xff] }
 0x322   :  { %v2165_v20 = vmul.f32 0.5, %v2164_v37  ;;  %v2953_v37 = vld [vmem:[%s7662_s7 + $0x1b0] sm:$0xff] }
 0x324   :  { %v2166_v53 = vsub.f32 1.5, %v2165_v20  ;;  %v2973_v20 = vld [vmem:[%s7662_s7 + $0x250] sm:$0xff] }
 0x326   :  { %v2167_v17 = vmul.f32 %v5172_v51, %v2166_v53  ;;  %v2944_v53 = vld [vmem:[%s7662_s7 + $0x168] sm:$0xff] }
 0x328   :  { %v2171_v48 = vsel %vm2170_vm8, %v5172_v51, %v2167_v17  ;;  %v2981_v51 = vld [vmem:[%s7662_s7 + $0x290] sm:$0xff]  ;;  %v2963_v17 = vld [vmem:[%s7662_s7 + $0x200] sm:$0xff] }
 0x329   :  { %v2172_v41 = vmul.f32 %v2171_v48, %v2160_v50  ;;  %v2983_v50 = vld [vmem:[%s7662_s7 + $0x2a0] sm:$0xff]  ;;  %v2964_v48 = vld [vmem:[%s7662_s7 + $0x208] sm:$0xff] }
 0x32b   :  { %4869 = vmatmul.msk.f32.vlgmr.msra.gmra.mxu3 %vm1618_vm4, %v2172_v41  ;;  %4870 = vmatmul.msk.f32.vlgmr.msra.gmra.mxu0 %vm1618_vm4, %v2172_v41 }
 0x32c   :  { %4871 = vmatmul.msk.f32.vlgmr.msra.gmra.mxu1 %vm1618_vm4, %v2172_v41  ;;  %4872 = vmatmul.msk.f32.vlgmr.msrb.gmra.mxu2 %vm1618_vm4, %v2172_v41 }
 0x32d   :  { %2354 = vmatpush.msra.mxu3 %v6417_v63  ;;  %2417 = vmatpush.msrb.mxu2 %v6328_v60  ;;  %v2174_v60 = vmul.f32 %v2172_v41, %v6473_v43  ;;  %v7746_v43 = vld [vmem:[#allocation22_spill] sm:$0xff] }
 0x32e   :  { %2397 = vmatpush.msra.mxu1 %v5201_v5  ;;  %2377 = vmatpush.msra.mxu0 %v5202_v42  ;;  %v2954_v5 = vld [vmem:[%s7662_s7 + $0x1b8] sm:$0xff] }
 0x32f   :  { %v2175_v3 = vsub.f32 %v2173_v22, %v2174_v60  ;;  %v2926_v42 = vld [vmem:[%s7662_s7 + $0xd8] sm:$0xff]  ;;  %v2965_v60 = vld [vmem:[%s7662_s7 + $0x210] sm:$0xff] }
 0x330   :  { %v2945_v22 = vld [vmem:[%s7662_s7 + $0x170] sm:$0xff] }
 0x333   :  { %4873 = vmatmul.msk.f32.vlgmr.msrb.gmra.mxu3 %vm1618_vm4, %v2172_v41  ;;  %4874 = vmatmul.msk.f32.vlgmr.msrb.gmra.mxu0 %vm1618_vm4, %v2172_v41 }
 0x334   :  { %4875 = vmatmul.msk.f32.vlgmr.msrb.gmra.mxu1 %vm1618_vm4, %v2172_v41  ;;  %4876 = vmatmul.msk.f32.vlgmr.msra.gmra.mxu2 %vm1618_vm4, %v2172_v41 }
 0x335   :  { %2477 = vmatpush.msrb.mxu1 %v6373_v57  ;;  %2497 = vmatpush.msra.mxu2 %v6405_v55  ;;  %v7738_v57 = vld [vmem:[#allocation15_spill] sm:$0xff]  ;;  %v7744_v55 = vld [vmem:[#allocation14_spill] sm:$0xff] }
 0x336   :  { %2437 = vmatpush.msrb.mxu3 %v6334_v1  ;;  %2457 = vmatpush.msrb.mxu0 %v6366_v52  ;;  %v7727_v1 = vld [vmem:[#allocation5_spill] sm:$0xff]  ;;  %v7728_v52 = vld [vmem:[#allocation6_spill] sm:$0xff] }
 0x33b   :  { %4877 = vmatmul.msk.f32.vlgmr.msra.gmra.mxu3 %vm1618_vm4, %v2172_v41  ;;  %4878 = vmatmul.msk.f32.vlgmr.msra.gmra.mxu0 %vm1618_vm4, %v2175_v3  ;;  %v2935_v41 = vld [vmem:[%s7662_s7 + $0x120] sm:$0xff] }
 0x33c   :  { %4879 = vmatmul.msk.f32.vlgmr.msra.gmra.mxu1 %vm1618_vm4, %v2175_v3  ;;  %4880 = vmatmul.msk.f32.vlgmr.msrb.gmra.mxu2 %vm1618_vm4, %v2175_v3 }
 0x33d   :  { %4887 = vmatpush.msk.msra.mxu1 %vm1330_vm0, %v6311_v34  ;;  %4890 = vmatpush.msk.msrb.mxu2 %vm1330_vm0, %v6320_v46  ;;  %v7732_v34 = vld [vmem:[#allocation8_spill] sm:$0xff] }
 0x33e   :  { %2517 = vmatpush.msra.mxu3 %v6412_v62  ;;  %2537 = vmatpush.msra.mxu0 %v6417_v63  ;;  %v7734_v46 = vld [vmem:[#allocation12_spill] sm:$0xff]  ;;  %v3016_v63 = vld [vmem:[%s7662_s7 + $0x3a8] sm:$0xff] }
 0x33f   :  { %2591 = vmatpush.msra.mxu1 %v6303_v26  ;;  %2614 = vmatpush.msrb.mxu2 %v6318_v38  ;;  %v7729_v26 = vld [vmem:[#allocation10_spill] sm:$0xff]  ;;  %v7733_v38 = vld [vmem:[#allocation11_spill] sm:$0xff]  ;;  %v7745_v62 = vld [vmem:[#allocation16_spill] sm:$0xff] }
 0x341   :  { %2592 = vmatpush.msra.mxu1 %v7727_v1  ;;  %2615 = vmatpush.msrb.mxu2 %v6309_v33  ;;  %v7731_v33 = vld [vmem:[#allocation7_spill] sm:$0xff] }
 0x342   :  { %v2917_v1 = vld [vmem:[%s7662_s7 + $0x90] sm:$0xff] }
 0x343   :  { %2593 = vmatpush.msra.mxu1 %v7728_v52  ;;  %2616 = vmatpush.msrb.mxu2 %v6307_v32  ;;  %v7730_v32 = vld [vmem:[#allocation9_spill] sm:$0xff] }
 0x344   :  { %4881 = vmatmul.msk.f32.vlgmr.msrb.gmra.mxu3 %vm1618_vm4, %v2175_v3  ;;  %4882 = vmatmul.msk.f32.vlgmr.msrb.gmra.mxu0 %vm1618_vm4, %v2175_v3  ;;  %v2956_v52 = vld [vmem:[%s7662_s7 + $0x1c8] sm:$0xff] }
 0x345   :  { %4883 = vmatmul.msk.f32.vlgmr.msrb.gmra.mxu1 %vm1618_vm4, %v2175_v3  ;;  %4884 = vmatmul.msk.f32.vlgmr.msra.gmra.mxu2 %vm1618_vm4, %v2175_v3 }
 0x346   :  { %4893 = vmatpush.msk.msrb.mxu3 %vm1330_vm0, %v6349_v18  ;;  %4896 = vmatpush.msk.msrb.mxu0 %vm1330_vm0, %v6358_v39  ;;  %v7736_v18 = vld [vmem:[#allocation20_spill] sm:$0xff] }
 0x347   :  { %4899 = vmatpush.msk.msrb.mxu1 %vm1330_vm0, %v6388_v15  ;;  %4902 = vmatpush.msk.msra.mxu2 %vm1330_vm0, %v6397_v36  ;;  %v7737_v39 = vld [vmem:[#allocation24_spill] sm:$0xff]  ;;  %v7741_v15 = vld [vmem:[#allocation13_spill] sm:$0xff] }
 0x348   :  { %2637 = vmatpush.msrb.mxu3 %v6341_v10  ;;  %2660 = vmatpush.msrb.mxu0 %v7729_v26  ;;  %v7735_v10 = vld [vmem:[#allocation18_spill] sm:$0xff]  ;;  %v7743_v36 = vld [vmem:[#allocation21_spill] sm:$0xff] }
 0x349   :  { %2683 = vmatpush.msrb.mxu1 %v6380_v4  ;;  %2706 = vmatpush.msra.mxu2 %v6395_v27  ;;  %v3025_v4 = vld [vmem:[%s7662_s7 + $0x3f0] sm:$0xff]  ;;  %v7742_v27 = vld [vmem:[#allocation17_spill] sm:$0xff] }
 0x34a   :  { %2638 = vmatpush.msrb.mxu3 %v6337_v8  ;;  %2661 = vmatpush.msrb.mxu0 %v7730_v32  ;;  %v3034_v8 = vld [vmem:[%s7662_s7 + $0x438] sm:$0xff]  ;;  %v2936_v26 = vld [vmem:[%s7662_s7 + $0x128] sm:$0xff]  ;;  %v2937_v32 = vld [vmem:[%s7662_s7 + $0x130] sm:$0xff] }
 0x34b   :  { %2684 = vmatpush.msrb.mxu1 %v6376_v2  ;;  %2707 = vmatpush.msra.mxu2 %v6386_v14  ;;  %v7739_v2 = vld [vmem:[#allocation19_spill] sm:$0xff] }
 0x34c   :  { %2639 = vmatpush.msrb.mxu3 %v7731_v33  ;;  %2662 = vmatpush.msrb.mxu0 %v7732_v34  ;;  %v7740_v14 = vld [vmem:[#allocation23_spill] sm:$0xff]  ;;  %v2908_v33 = vld [vmem:[%s7662_s7 + $0x48] sm:$0xff]  ;;  %v2947_v34 = vld [vmem:[%s7662_s7 + $0x180] sm:$0xff] }
 0x34d   :  { %2685 = vmatpush.msrb.mxu1 %v7733_v38  ;;  %2708 = vmatpush.msra.mxu2 %v7734_v46  ;;  %v2927_v38 = vld [vmem:[%s7662_s7 + $0xe0] sm:$0xff]  ;;  %v2928_v46 = vld [vmem:[%s7662_s7 + $0xe8] sm:$0xff] }
 0x34e   :  { %4885 = vmatmul.msk.f32.vlgmr.msra.gmra.mxu3 %vm1618_vm4, %v2175_v3  ;;  %4886 = vmatmul.msk.f32.vlgmr.msra.gmra.mxu0 %vm1618_vm4, %v2175_v3  ;;  %v2946_v3 = vld [vmem:[%s7662_s7 + $0x178] sm:$0xff] }
 0x34f   :  { %4888 = vmatmul.msk.f32.vlgmr.msra.gmra.mxu1 %vm2544_vm5, %v6581_v23  ;;  %4891 = vmatmul.msk.f32.vlgmr.msrb.gmra.mxu2 %vm2544_vm5, %v6581_v23 }
 0x350   :  { %4905 = vmatpush.msk.msra.mxu3 %vm1330_vm0, %v7735_v10  ;;  %4908 = vmatpush.msk.msra.mxu0 %vm1330_vm0, %v7736_v18  ;;  %v3038_v10 = vld [vmem:[%s7662_s7 + $0x458] sm:$0xff] }
 0x351   :  { %4911 = vmatpush.msk.msra.mxu1 %vm1330_vm0, %v7737_v39  ;;  %3109 = vmatpush.xpose.msrb.mxu2 %v3034_v8  ;;  %v2899_v8 = vld [vmem:[%s7662_s7] sm:$0xff]  ;;  %v2938_v18 = vld [vmem:[%s7662_s7 + $0x138] sm:$0xff] }
 0x352   :  { %2729 = vmatpush.msra.mxu3 %v7738_v57  ;;  %2752 = vmatpush.msra.mxu0 %v7739_v2  ;;  %v2918_v39 = vld [vmem:[%s7662_s7 + $0x98] sm:$0xff]  ;;  %v2919_v57 = vld [vmem:[%s7662_s7 + $0xa0] sm:$0xff]  ;;  %v3029_v2 = vld [vmem:[%s7662_s7 + $0x410] sm:$0xff] }
 0x353   :  { %2775 = vmatpush.msra.mxu1 %v7740_v14  ;;  %v2909_v14 = vld [vmem:[%s7662_s7 + $0x50] sm:$0xff] }
 0x354   :  { %2730 = vmatpush.msra.mxu3 %v7741_v15  ;;  %2753 = vmatpush.msra.mxu0 %v7742_v27  ;;  %v2910_v15 = vld [vmem:[%s7662_s7 + $0x58] sm:$0xff]  ;;  %v3020_v27 = vld [vmem:[%s7662_s7 + $0x3c8] sm:$0xff] }
 0x355   :  { %2776 = vmatpush.msra.mxu1 %v7743_v36  ;;  %3110 = vmatpush.xpose.msrb.mxu2 %v3025_v4  ;;  %v2929_v4 = vld [vmem:[%s7662_s7 + $0xf0] sm:$0xff]  ;;  %v2920_v36 = vld [vmem:[%s7662_s7 + $0xa8] sm:$0xff] }
 0x356   :  { %2731 = vmatpush.msra.mxu3 %v7744_v55  ;;  %2754 = vmatpush.msra.mxu0 %v7745_v62  ;;  %v2900_v55 = vld [vmem:[%s7662_s7 + $0x8] sm:$0xff]  ;;  %v2901_v62 = vld [vmem:[%s7662_s7 + $0x10] sm:$0xff] }
 0x357   :  { %2777 = vmatpush.msra.mxu1 %v7746_v43  ;;  %4892 = vmatmul.msk.f32.gmra.mxu2 %vm2544_vm5, %v6591_v47  ;;  %v3040_v43 = vld [vmem:[%s7662_s7 + $0x468] sm:$0xff] }
 0x358   :  { %4889 = vmatmul.msk.f32.gmra.mxu1 %vm2544_vm5, %v6591_v47  ;;  %4894 = vmatmul.msk.f32.vlgmr.msrb.gmra.mxu3 %vm2544_vm5, %v6581_v23 }
 0x359   :  { %4897 = vmatmul.msk.f32.vlgmr.msrb.gmra.mxu0 %vm2544_vm5, %v6581_v23  ;;  %3111 = vmatpush.xpose.msrb.mxu2 %v3016_v63  ;;  %v3039_v63 = vld [vmem:[%s7662_s7 + $0x460] sm:$0xff] }
 0x35a   :  { %3132 = vmatpush.xpose.msrb.mxu3 %v3035_v54  ;;  %3155 = vmatpush.xpose.msrb.mxu0 %v3036_v0  ;;  %v3011_v54 = vld [vmem:[%s7662_s7 + $0x380] sm:$0xff] }
 0x35b   :  { %v2911_v0 = vld [vmem:[%s7662_s7 + $0x60] sm:$0xff] }
 0x35d   :  { %3112 = vmatpush.xpose.msrb.mxu2 %v3007_v31  ;;  %v3030_v31 = vld [vmem:[%s7662_s7 + $0x418] sm:$0xff] }
 0x35e   :  { %3133 = vmatpush.xpose.msrb.mxu3 %v3026_v19  ;;  %3156 = vmatpush.xpose.msrb.mxu0 %v3027_v21  ;;  %v3031_v19 = vld [vmem:[%s7662_s7 + $0x420] sm:$0xff]  ;;  %v3002_v21 = vld [vmem:[%s7662_s7 + $0x338] sm:$0xff] }
 0x35f   :  { %4903 = vmatmul.msk.f32.vlgmr.msra.gmra.mxu2 %vm2544_vm5, %v6581_v23 }
 0x360   :  { %4895 = vmatmul.msk.f32.gmra.mxu3 %vm2544_vm5, %v6591_v47  ;;  %4900 = vmatmul.msk.f32.vlgmr.msrb.gmra.mxu1 %vm2544_vm5, %v6581_v23 }
 0x361   :  { %4898 = vmatmul.msk.f32.gmra.mxu0 %vm2544_vm5, %v6591_v47  ;;  %3113 = vmatpush.xpose.msrb.mxu2 %v2998_v13  ;;  %v2902_v13 = vld [vmem:[%s7662_s7 + $0x18] sm:$0xff] }
 0x362   :  { %3178 = vmatpush.xpose.msrb.mxu1 %v3037_v56  ;;  %3134 = vmatpush.xpose.msrb.mxu3 %v3017_v59  ;;  %v3041_v56 = vld [vmem:[%s7662_s7 + $0x470] sm:$0xff] }
 0x363   :  { %3157 = vmatpush.xpose.msrb.mxu0 %v3018_v58  ;;  %v3021_v59 = vld [vmem:[%s7662_s7 + $0x3d0] sm:$0xff]  ;;  %v3022_v58 = vld [vmem:[%s7662_s7 + $0x3d8] sm:$0xff] }
 0x365   :  { %3114 = vmatpush.xpose.msrb.mxu2 %v2989_v49  ;;  %v2993_v49 = vld [vmem:[%s7662_s7 + $0x2f0] sm:$0xff] }
 0x366   :  { %3179 = vmatpush.xpose.msrb.mxu1 %v3028_v12  ;;  %3135 = vmatpush.xpose.msrb.mxu3 %v3008_v30  ;;  %v3032_v12 = vld [vmem:[%s7662_s7 + $0x428] sm:$0xff] }
 0x367   :  { %4904 = vmatmul.msk.f32.gmra.mxu2 %vm2544_vm5, %v6591_v47  ;;  %3158 = vmatpush.xpose.msrb.mxu0 %v3009_v40  ;;  %v3012_v30 = vld [vmem:[%s7662_s7 + $0x388] sm:$0xff]  ;;  %v3013_v40 = vld [vmem:[%s7662_s7 + $0x390] sm:$0xff] }
 0x368   :  { %4901 = vmatmul.msk.f32.gmra.mxu1 %vm2544_vm5, %v6591_v47  ;;  %4906 = vmatmul.msk.f32.vlgmr.msra.gmra.mxu3 %vm2544_vm5, %v6581_v23 }
 0x369   :  { %4909 = vmatmul.msk.f32.vlgmr.msra.gmra.mxu0 %vm2544_vm5, %v6581_v23  ;;  %3115 = vmatpush.xpose.msrb.mxu2 %v2980_v35  ;;  %v2984_v35 = vld [vmem:[%s7662_s7 + $0x2a8] sm:$0xff] }
 0x36a   :  { %3180 = vmatpush.xpose.msrb.mxu1 %v3019_v11  ;;  %3136 = vmatpush.xpose.msrb.mxu3 %v2999_v29  ;;  %v3023_v11 = vld [vmem:[%s7662_s7 + $0x3e0] sm:$0xff] }
 0x36b   :  { %3159 = vmatpush.xpose.msrb.mxu0 %v3000_v28  ;;  %v3003_v29 = vld [vmem:[%s7662_s7 + $0x340] sm:$0xff]  ;;  %v3004_v28 = vld [vmem:[%s7662_s7 + $0x348] sm:$0xff] }
 0x36d   :  { %3116 = vmatpush.xpose.msrb.mxu2 %v2971_v25  ;;  %v2975_v25 = vld [vmem:[%s7662_s7 + $0x260] sm:$0xff] }
 0x36e   :  { %3181 = vmatpush.xpose.msrb.mxu1 %v3010_v24  ;;  %3137 = vmatpush.xpose.msrb.mxu3 %v2990_v7  ;;  %v3014_v7 = vld [vmem:[%s7662_s7 + $0x398] sm:$0xff] }
 0x36f   :  { %3160 = vmatpush.xpose.msrb.mxu0 %v2991_v61 }
 0x370   :  { %4907 = vmatmul.msk.f32.gmra.mxu3 %vm2544_vm5, %v6591_v47  ;;  %4912 = vmatmul.msk.f32.vlgmr.msra.gmra.mxu1 %vm2544_vm5, %v6581_v23  ;;  %v2972_v23 = vld [vmem:[%s7662_s7 + $0x248] sm:$0xff] }
 0x371   :  { %4910 = vmatmul.msk.f32.gmra.mxu0 %vm2544_vm5, %v6591_v47  ;;  %3117 = vmatpush.xpose.msrb.mxu2 %v2962_v16  ;;  %v2994_v16 = vld [vmem:[%s7662_s7 + $0x2f8] sm:$0xff] }
 0x372   :  { %3182 = vmatpush.xpose.msrb.mxu1 %v3001_v9  ;;  %3138 = vmatpush.xpose.msrb.mxu3 %v2981_v51  ;;  %v2995_v9 = vld [vmem:[%s7662_s7 + $0x300] sm:$0xff]  ;;  %v2966_v51 = vld [vmem:[%s7662_s7 + $0x218] sm:$0xff] }
 0x373   :  { %3161 = vmatpush.xpose.msrb.mxu0 %v2982_v6  ;;  %v3005_v6 = vld [vmem:[%s7662_s7 + $0x350] sm:$0xff] }
 0x375   :  { %3118 = vmatpush.xpose.msrb.mxu2 %v2953_v37  ;;  %v2985_v37 = vld [vmem:[%s7662_s7 + $0x2b0] sm:$0xff] }
 0x376   :  { %3183 = vmatpush.xpose.msrb.mxu1 %v2992_v44  ;;  %3139 = vmatpush.xpose.msrb.mxu3 %v2972_v23  ;;  %v2986_v44 = vld [vmem:[%s7662_s7 + $0x2b8] sm:$0xff] }
 0x377   :  { %3162 = vmatpush.xpose.msrb.mxu0 %v2973_v20 }
 0x378   :  { %4913 = vmatmul.msk.f32.gmra.mxu1 %vm2544_vm5, %v6591_v47  ;;  %v2955_v47 = vld [vmem:[%s7662_s7 + $0x1c0] sm:$0xff] }
 0x379   :  { %3119 = vmatpush.xpose.msrb.mxu2 %v2944_v53  ;;  %v2957_v53 = vld [vmem:[%s7662_s7 + $0x1d0] sm:$0xff] }
 0x37a   :  { %3184 = vmatpush.xpose.msrb.mxu1 %v2983_v50  ;;  %3140 = vmatpush.xpose.msrb.mxu3 %v2963_v17  ;;  %v2996_v17 = vld [vmem:[%s7662_s7 + $0x308] sm:$0xff] }
 0x37b   :  { %3163 = vmatpush.xpose.msrb.mxu0 %v2964_v48 }
 0x37d   :  { %3120 = vmatpush.xpose.msrb.mxu2 %v2935_v41  ;;  %v2976_v41 = vld [vmem:[%s7662_s7 + $0x268] sm:$0xff] }
 0x37e   :  { %3185 = vmatpush.xpose.msrb.mxu1 %v2974_v45  ;;  %3141 = vmatpush.xpose.msrb.mxu3 %v2954_v5  ;;  %v2977_v45 = vld [vmem:[%s7662_s7 + $0x270] sm:$0xff]  ;;  %v2948_v5 = vld [vmem:[%s7662_s7 + $0x188] sm:$0xff] }
 0x37f   :  { %3164 = vmatpush.xpose.msrb.mxu0 %v2955_v47  ;;  %v2987_v47 = vld [vmem:[%s7662_s7 + $0x2c0] sm:$0xff] }
 0x381   :  { %3121 = vmatpush.xpose.msrb.mxu2 %v2926_v42  ;;  %v2967_v42 = vld [vmem:[%s7662_s7 + $0x220] sm:$0xff] }
 0x382   :  { %3186 = vmatpush.xpose.msrb.mxu1 %v2965_v60  ;;  %3142 = vmatpush.xpose.msrb.mxu3 %v2945_v22  ;;  %v2968_v60 = vld [vmem:[%s7662_s7 + $0x228] sm:$0xff] }
 0x383   :  { %3165 = vmatpush.xpose.msrb.mxu0 %v2946_v3 }
 0x385   :  { %3122 = vmatpush.xpose.msrb.mxu2 %v2917_v1  ;;  %v2939_v1 = vld [vmem:[%s7662_s7 + $0x140] sm:$0xff] }
 0x386   :  { %3187 = vmatpush.xpose.msrb.mxu1 %v2956_v52  ;;  %3143 = vmatpush.xpose.msrb.mxu3 %v2936_v26  ;;  %v2978_v26 = vld [vmem:[%s7662_s7 + $0x278] sm:$0xff] }
 0x387   :  { %3166 = vmatpush.xpose.msrb.mxu0 %v2937_v32 }
 0x389   :  { %3123 = vmatpush.xpose.msrb.mxu2 %v2908_v33  ;;  %v2958_v33 = vld [vmem:[%s7662_s7 + $0x1d8] sm:$0xff] }
 0x38a   :  { %3188 = vmatpush.xpose.msrb.mxu1 %v2947_v34  ;;  %3144 = vmatpush.xpose.msrb.mxu3 %v2927_v38  ;;  %v2959_v34 = vld [vmem:[%s7662_s7 + $0x1e0] sm:$0xff]  ;;  %v2930_v38 = vld [vmem:[%s7662_s7 + $0xf8] sm:$0xff] }
 0x38b   :  { %3167 = vmatpush.xpose.msrb.mxu0 %v2928_v46  ;;  %v2969_v46 = vld [vmem:[%s7662_s7 + $0x230] sm:$0xff] }
 0x38d   :  { %3124 = vmatpush.xpose.msrb.mxu2 %v2899_v8  ;;  %v2949_v8 = vld [vmem:[%s7662_s7 + $0x190] sm:$0xff] }
 0x38e   :  { %3189 = vmatpush.xpose.msrb.mxu1 %v2938_v18  ;;  %3145 = vmatpush.xpose.msrb.mxu3 %v2918_v39 }
 0x38f   :  { %3168 = vmatpush.xpose.msrb.mxu0 %v2919_v57  ;;  %v2921_v57 = vld [vmem:[%s7662_s7 + $0xb0] sm:$0xff] }
 0x391   :  { %3201 = vmatpush.xpose.msra.mxu2 %v3038_v10  ;;  %v2950_v10 = vld [vmem:[%s7662_s7 + $0x198] sm:$0xff] }
 0x392   :  { %3190 = vmatpush.xpose.msrb.mxu1 %v2929_v4  ;;  %3146 = vmatpush.xpose.msrb.mxu3 %v2909_v14  ;;  %v2940_v4 = vld [vmem:[%s7662_s7 + $0x148] sm:$0xff]  ;;  %v2941_v14 = vld [vmem:[%s7662_s7 + $0x150] sm:$0xff] }
 0x393   :  { %3169 = vmatpush.xpose.msrb.mxu0 %v2910_v15 }
 0x395   :  { %3202 = vmatpush.xpose.msra.mxu2 %v3029_v2  ;;  %v2960_v2 = vld [vmem:[%s7662_s7 + $0x1e8] sm:$0xff] }
 0x396   :  { %3191 = vmatpush.xpose.msrb.mxu1 %v2920_v36  ;;  %3147 = vmatpush.xpose.msrb.mxu3 %v2900_v55  ;;  %v2912_v36 = vld [vmem:[%s7662_s7 + $0x68] sm:$0xff]  ;;  %v2951_v55 = vld [vmem:[%s7662_s7 + $0x1a0] sm:$0xff] }
 0x397   :  { %3170 = vmatpush.xpose.msrb.mxu0 %v2901_v62  ;;  %v2931_v62 = vld [vmem:[%s7662_s7 + $0x100] sm:$0xff] }
 0x399   :  { %3203 = vmatpush.xpose.msra.mxu2 %v3020_v27 }
 0x39a   :  { %3224 = vmatpush.xpose.msra.mxu3 %v3039_v63  ;;  %3192 = vmatpush.xpose.msrb.mxu1 %v2911_v0  ;;  %v2932_v63 = vld [vmem:[%s7662_s7 + $0x108] sm:$0xff] }
 0x39b   :  { %3247 = vmatpush.xpose.msra.mxu0 %v3040_v43 }
 0x39d   :  { %3204 = vmatpush.xpose.msra.mxu2 %v3011_v54  ;;  %v2903_v54 = vld [vmem:[%s7662_s7 + $0x20] sm:$0xff] }
 0x39e   :  { %3225 = vmatpush.xpose.msra.mxu3 %v3030_v31  ;;  %3193 = vmatpush.xpose.msrb.mxu1 %v2902_v13  ;;  %v2942_v31 = vld [vmem:[%s7662_s7 + $0x158] sm:$0xff] }
 0x39f   :  { %3248 = vmatpush.xpose.msra.mxu0 %v3031_v19  ;;  %v7098_v19 = vpop.xlane.xlu0 %2813  ;;  %v2922_v13 = vld [vmem:[%s7662_s7 + $0xb8] sm:$0xff] }
 0x3a1   :  { %3205 = vmatpush.xpose.msra.mxu2 %v3002_v21 }
 0x3a2   :  { %3270 = vmatpush.xpose.msra.mxu1 %v3041_v56  ;;  %3226 = vmatpush.xpose.msra.mxu3 %v3021_v59  ;;  %v2923_v56 = vld [vmem:[%s7662_s7 + $0xc0] sm:$0xff] }
 0x3a3   :  { %3249 = vmatpush.xpose.msra.mxu0 %v3022_v58 }
 0x3a5   :  { %3206 = vmatpush.xpose.msra.mxu2 %v2993_v49 }
 0x3a6   :  { %3271 = vmatpush.xpose.msra.mxu1 %v3032_v12  ;;  %3227 = vmatpush.xpose.msra.mxu3 %v3012_v30  ;;  %v2933_v12 = vld [vmem:[%s7662_s7 + $0x110] sm:$0xff] }
 0x3a7   :  { %3250 = vmatpush.xpose.msra.mxu0 %v3013_v40 }
 0x3a8   :  { %v6967_v24 = vpop.f32.mrf.mxu0 }
 0x3a9   :  { %3207 = vmatpush.xpose.msra.mxu2 %v2984_v35  ;;  %v6972_v61 = vpop.f32.mrf.mxu1  ;;  %v2913_v35 = vld [vmem:[%s7662_s7 + $0x70] sm:$0xff] }
 0x3aa   :  { %3272 = vmatpush.xpose.msra.mxu1 %v3023_v11  ;;  %3228 = vmatpush.xpose.msra.mxu3 %v3003_v29  ;;  %v2914_v11 = vld [vmem:[%s7662_s7 + $0x78] sm:$0xff]  ;;  %v2863_v29 = vld [vmem:[%s7661_s6] sm:$0xff] }
 0x3ab   :  { %3251 = vmatpush.xpose.msra.mxu0 %v3004_v28 }
 0x3ad   :  { %3208 = vmatpush.xpose.msra.mxu2 %v2975_v25 }
 0x3ae   :  { %3273 = vmatpush.xpose.msra.mxu1 %v3014_v7  ;;  %3229 = vmatpush.xpose.msra.mxu3 %v2994_v16  ;;  %v6992_v23 = vpop.f32.mrf.mxu3  ;;  %v2924_v7 = vld [vmem:[%s7662_s7 + $0xc8] sm:$0xff]  ;;  %v2786_v16 = vperm.slane %v6967_v24, 0  ;;  %v7142_v24 = vpop.xlane.xlu0 %2816 }
 0x3af   :  { %3252 = vmatpush.xpose.msra.mxu0 %v2995_v9  ;;  %v6994_v20 = vpop.f32.mrf.mxu2  ;;  %v2785_v59 = vperm.slane %v6992_v23, 0  ;;  %v2905_v23 = vld [vmem:[%s7662_s7 + $0x30] sm:$0xff] }
 0x3b0   :  { %v6999_v50 = vpop.f32.mrf.mxu0 }
 0x3b1   :  { %3209 = vmatpush.xpose.msra.mxu2 %v2966_v51  ;;  %v7004_v48 = vpop.f32.mrf.mxu1 }
 0x3b2   :  { %3274 = vmatpush.xpose.msra.mxu1 %v3005_v6  ;;  %3230 = vmatpush.xpose.msra.mxu3 %v2985_v37  ;;  %v3042_v6 = vld [vmem:[%s7662_s7 + $0x478] sm:$0xff]  ;;  %v2904_v37 = vld [vmem:[%s7662_s7 + $0x28] sm:$0xff] }
 0x3b3   :  { %3253 = vmatpush.xpose.msra.mxu0 %v2986_v44 }
 0x3b5   :  { %3210 = vmatpush.xpose.msra.mxu2 %v2957_v53 }
 0x3b6   :  { %3275 = vmatpush.xpose.msra.mxu1 %v2996_v17  ;;  %3231 = vmatpush.xpose.msra.mxu3 %v2976_v41  ;;  %v7024_v22 = vpop.f32.mrf.mxu3 }
 0x3b7   :  { %3254 = vmatpush.xpose.msra.mxu0 %v2977_v45  ;;  %v7026_v3 = vpop.f32.mrf.mxu2  ;;  %v2864_v45 = vld [vmem:[%s7661_s6 + $0x8] sm:$0xff] }
 0x3b8   :  { %v7031_v52 = vpop.f32.mrf.mxu0 }
 0x3b9   :  { %3211 = vmatpush.xpose.msra.mxu2 %v2948_v5  ;;  %v7036_v32 = vpop.f32.mrf.mxu1  ;;  %v2818_v21 = vperm.slane %v7031_v52, 0  ;;  %v2915_v5 = vld [vmem:[%s7662_s7 + $0x80] sm:$0xff] }
 0x3ba   :  { %3276 = vmatpush.xpose.msra.mxu1 %v2987_v47  ;;  %3232 = vmatpush.xpose.msra.mxu3 %v2967_v42  ;;  %v2819_v28 = vperm.slane %v7036_v32, 0  ;;  %v2788_v47 = vperm.slane %v6994_v20, 0  ;;  %v2872_v20 = vld [vmem:[%s7661_s6 + $0x48] sm:$0xff] }
 0x3bb   :  { %3255 = vmatpush.xpose.msra.mxu0 %v2968_v60  ;;  %v2827_v30 = vmul.f32 %v2818_v21, %v7098_v19 }
 0x3bc   :  { %v2828_v53 = vmul.f32 %v2819_v28, %v7098_v19 }
 0x3bd   :  { %3212 = vmatpush.xpose.msra.mxu2 %v2939_v1  ;;  %v3033_v1 = vld [vmem:[%s7662_s7 + $0x430] sm:$0xff] }
 0x3be   :  { %3277 = vmatpush.xpose.msra.mxu1 %v2978_v26  ;;  %3233 = vmatpush.xpose.msra.mxu3 %v2958_v33  ;;  %v7056_v18 = vpop.f32.mrf.mxu3  ;;  %v2836_v26 = vmul.f32 %v2818_v21, %v7142_v24 }
 0x3bf   :  { %3256 = vmatpush.xpose.msra.mxu0 %v2959_v34  ;;  %v7058_v39 = vpop.f32.mrf.mxu2 }
 0x3c1   :  { %3213 = vmatpush.xpose.msra.mxu2 %v2930_v38  ;;  %v7072_v15 = vpop.f32.mrf.mxu0 }
 0x3c2   :  { %3278 = vmatpush.xpose.msra.mxu1 %v2969_v46  ;;  %3234 = vmatpush.xpose.msra.mxu3 %v2949_v8  ;;  %v7074_v27 = vpop.f32.mrf.mxu1  ;;  %v3043_v46 = vld [vmem:[%s7662_s7 + $0x480] sm:$0x3]  ;;  %v2820_v8 = vperm.slane %v7058_v39, 0 }
 0x3c3   :  { %3257 = vmatpush.xpose.msra.mxu0 %v2950_v10 }
 0x3c4   :  { %v2829_v21 = vmul.f32 %v2820_v8, %v7098_v19 }
 0x3c5   :  { %3214 = vmatpush.xpose.msra.mxu2 %v2921_v57  ;;  %v2866_v57 = vld [vmem:[%s7661_s6 + $0x18] sm:$0xff] }
 0x3c6   :  { %3279 = vmatpush.xpose.msra.mxu1 %v2960_v2  ;;  %3235 = vmatpush.xpose.msra.mxu3 %v2940_v4  ;;  %v2906_v2 = vld [vmem:[%s7662_s7 + $0x38] sm:$0xff] }
 0x3c7   :  { %3258 = vmatpush.xpose.msra.mxu0 %v2941_v14  ;;  %v7088_v43 = vpop.f32.mrf.mxu3  ;;  %v2787_v14 = vperm.slane %v6972_v61, 0  ;;  %v3045_v61 = vld [vmem:[%s7662_s7 + $0x490] sm:$0x3] }
 0x3c8   :  { %v7093_v0 = vpop.f32.mrf.mxu2  ;;  %v2821_v17 = vperm.slane %v7088_v43, 0 }
 0x3c9   :  { %3215 = vmatpush.xpose.msra.mxu2 %v2912_v36  ;;  %v2822_v36 = vperm.slane %v7072_v15, 0  ;;  %v2789_v15 = vperm.slane %v7024_v22, 0 }
 0x3ca   :  { %3280 = vmatpush.xpose.msra.mxu1 %v2951_v55  ;;  %3236 = vmatpush.xpose.msra.mxu3 %v2931_v62  ;;  %v2830_v33 = vmul.f32 %v2821_v17, %v7098_v19  ;;  %v3024_v62 = vld [vmem:[%s7662_s7 + $0x3e8] sm:$0xff] }
 0x3cb   :  { %3259 = vmatpush.xpose.msra.mxu0 %v2932_v63  ;;  %v7108_v58 = vpop.f32.mrf.mxu0  ;;  %v2831_v22 = vmul.f32 %v2822_v36, %v7098_v19 }
 0x3cc   :  { %v2595_v49 = vpop.f32.mrf.mxu1 }
 0x3cd   :  { %3216 = vmatpush.xpose.msra.mxu2 %v2903_v54  ;;  %v2794_v40 = vmul.f32 %v2785_v59, %v2595_v49  ;;  %v2837_v54 = vmul.f32 %v2819_v28, %v7142_v24  ;;  %v2865_v49 = vld [vmem:[%s7661_s6 + $0x10] sm:$0xff]  ;;  %v2839_v28 = vmul.f32 %v2821_v17, %v7142_v24 }
 0x3ce   :  { %3281 = vmatpush.xpose.msra.mxu1 %v2942_v31  ;;  %3237 = vmatpush.xpose.msra.mxu3 %v2922_v13 }
 0x3cf   :  { %3260 = vmatpush.xpose.msra.mxu0 %v2923_v56  ;;  %v2845_v25 = vadd.f32 %v2827_v30, %v2794_v40  ;;  %v2873_v56 = vld [vmem:[%s7661_s6 + $0x50] sm:$0xff] }
 0x3d1   :  { %v7128_v9 = vmul.f32 %v2863_v29, %v2845_v25  ;;  %v7130_v51 = vpop.f32.mrf.mxu3  ;;  %v2823_v29 = vperm.slane %v7074_v27, 0  ;;  %v3044_v27 = vld [vmem:[%s7662_s7 + $0x488] sm:$0x3] }
 0x3d2   :  { %3282 = vmatpush.xpose.msra.mxu1 %v2933_v12  ;;  %3238 = vmatpush.xpose.msra.mxu3 %v2913_v35  ;;  %v2618_v44 = vpop.f32.mrf.mxu2 }
 0x3d3   :  { %3261 = vmatpush.xpose.msra.mxu0 %v2914_v11  ;;  %v2795_v41 = vmul.f32 %v2786_v16, %v2618_v44  ;;  %3125 = vmatmul.f32.vlgmr.msrb.gmra.mxu2 %v7128_v9  ;;  %v3015_v11 = vld [vmem:[%s7662_s7 + $0x3a0] sm:$0xff] }
 0x3d4   :  { %4914 = vmatpush.xpose.msk.msrb.mxu2 %vm1409_vm1, %v3042_v6  ;;  %v2875_v44 = vld [vmem:[%s7661_s6 + $0x60] sm:$0xff] }
 0x3d5   :  { %v2846_v42 = vadd.f32 %v2828_v53, %v2795_v41  ;;  %v2598_v60 = vpop.f32.mrf.mxu1 }
 0x3d6   :  { %3283 = vmatpush.xpose.msra.mxu1 %v2924_v7  ;;  %3239 = vmatpush.xpose.msra.mxu3 %v2904_v37  ;;  %v2803_v52 = vmul.f32 %v2785_v59, %v2598_v60  ;;  %v2664_v32 = vpop.f32.mrf.mxu0  ;;  %v2867_v7 = vld [vmem:[%s7661_s6 + $0x20] sm:$0xff] }
 0x3d7   :  { %3262 = vmatpush.xpose.msra.mxu0 %v2905_v23  ;;  %v7159_v34 = vmul.f32 %v2864_v45, %v2846_v42  ;;  %v2797_v38 = vmul.f32 %v2788_v47, %v2664_v32  ;;  %v2790_v23 = vperm.slane %v6999_v50, 0  ;;  %v3006_v45 = vld [vmem:[%s7662_s7 + $0x358] sm:$0xff]  ;;  %v2792_v32 = vperm.slane %v7026_v3, 0 }
 0x3d8   :  { %v2854_v10 = vadd.f32 %v2836_v26, %v2803_v52  ;;  %4915 = vmatpush.xpose.msk.msrb.mxu2 %vm1409_vm1, %v3033_v1  ;;  %v2838_v1 = vmul.f32 %v2820_v8, %v7142_v24  ;;  %v2868_v26 = vld [vmem:[%s7661_s6 + $0x28] sm:$0xff] }
 0x3d9   :  { %v2848_v4 = vadd.f32 %v2830_v33, %v2797_v38  ;;  %3148 = vmatmul.f32.vlgmr.msrb.gmra.mxu3 %v7159_v34  ;;  %v2874_v38 = vld [vmem:[%s7661_s6 + $0x58] sm:$0xff] }
 0x3da   :  { %3284 = vmatpush.xpose.msra.mxu1 %v2915_v5  ;;  %v2621_v55 = vpop.f32.mrf.mxu2  ;;  %v7178_v39 = vmul.f32 %v2872_v20, %v2854_v10  ;;  %3331 = vmatpush.xpose.msrb.mxu3 %v3043_v46  ;;  %v2832_v5 = vmul.f32 %v2823_v29, %v7098_v19  ;;  %v2840_v20 = vmul.f32 %v2822_v36, %v7142_v24  ;;  %v3046_v36 = vld [vmem:[%s7662_s7 + $0x498] sm:$0x3] }
 0x3db   :  { %v7183_v63 = vmul.f32 %v2866_v57, %v2848_v4  ;;  %v2804_v43 = vmul.f32 %v2786_v16, %v2621_v55  ;;  %v2641_v31 = vpop.f32.mrf.mxu3  ;;  %v2997_v57 = vld [vmem:[%s7662_s7 + $0x310] sm:$0xff]  ;;  %v2824_v55 = vperm.slane %v7093_v0, 0 }
 0x3dc   :  { %v2796_v13 = vmul.f32 %v2787_v14, %v2641_v31  ;;  %3128 = vmatmul.f32.gmra.mxu2 %v7178_v39 }
 0x3dd   :  { %v2855_v59 = vadd.f32 %v2837_v54, %v2804_v43  ;;  %3194 = vmatmul.f32.vlgmr.msrb.gmra.mxu1 %v7183_v63  ;;  %4916 = vmatpush.xpose.msk.msrb.mxu2 %vm1409_vm1, %v3024_v62  ;;  %v2687_v12 = vpop.f32.mrf.mxu1  ;;  %v2870_v43 = vld [vmem:[%s7661_s6 + $0x38] sm:$0xff] }
 0x3de   :  { %3285 = vmatpush.xpose.msra.mxu1 %v2906_v2  ;;  %v2847_v30 = vadd.f32 %v2829_v21, %v2796_v13  ;;  %v2667_v40 = vpop.f32.mrf.mxu0  ;;  %v2798_v35 = vmul.f32 %v2789_v15, %v2687_v12  ;;  %v2988_v13 = vld [vmem:[%s7662_s7 + $0x2c8] sm:$0xff] }
 0x3df   :  { %v2806_v25 = vmul.f32 %v2788_v47, %v2667_v40  ;;  %v7209_v16 = vmul.f32 %v2873_v56, %v2855_v59  ;;  %v2825_v47 = vperm.slane %v7130_v51, 0  ;;  %v2841_v56 = vmul.f32 %v2823_v29, %v7142_v24  ;;  %v2869_v29 = vld [vmem:[%s7661_s6 + $0x30] sm:$0xff] }
 0x3e0   :  { %v7211_v6 = vmul.f32 %v2865_v49, %v2847_v30  ;;  %v2849_v37 = vadd.f32 %v2831_v22, %v2798_v35  ;;  %v2793_v22 = vperm.slane %v7056_v18, 0  ;;  %v2833_v30 = vmul.f32 %v2824_v55, %v7098_v19  ;;  %v2877_v35 = vld [vmem:[%s7661_s6 + $0x70] sm:$0xff] }
 0x3e1   :  { %v2857_v53 = vadd.f32 %v2839_v28, %v2806_v25  ;;  %4917 = vmatpush.xpose.msk.msrb.mxu2 %vm1409_vm1, %v3015_v11  ;;  %3151 = vmatmul.f32.gmra.mxu3 %v7209_v16  ;;  %v2834_v3 = vmul.f32 %v2825_v47, %v7098_v19 }
 0x3e2   :  { %3377 = vmatpush.xpose.msrb.mxu1 %v3045_v61  ;;  %v7222_v17 = vmul.f32 %v2867_v7, %v2849_v37  ;;  %3171 = vmatmul.f32.vlgmr.msrb.gmra.mxu0 %v7211_v6  ;;  %v2710_v41 = vpop.f32.mrf.mxu2  ;;  %v2791_v61 = vperm.slane %v7004_v48, 0  ;;  %v3048_v48 = vld [vmem:[%s7662_s7 + $0x4a8] sm:$0x3] }
 0x3e3   :  { %v2644_v42 = vpop.f32.mrf.mxu3  ;;  %v2799_v50 = vmul.f32 %v2790_v23, %v2710_v41  ;;  %v7230_v60 = vmul.f32 %v2875_v44, %v2857_v53  ;;  %3354 = vmatpush.xpose.msrb.mxu0 %v3044_v27  ;;  %v2979_v27 = vld [vmem:[%s7662_s7 + $0x280] sm:$0xff] }
 0x3e4   :  { %v2805_v52 = vmul.f32 %v2787_v14, %v2644_v42  ;;  %3217 = vmatmul.f32.vlgmr.msra.gmra.mxu2 %v7222_v17  ;;  %v2876_v14 = vld [vmem:[%s7661_s6 + $0x68] sm:$0xff]  ;;  %v3047_v42 = vld [vmem:[%s7662_s7 + $0x4a0] sm:$0x3] }
 0x3e5   :  { %v2850_v33 = vadd.f32 %v2832_v5, %v2799_v50  ;;  %3197 = vmatmul.f32.gmra.mxu1 %v7230_v60  ;;  %4918 = vmatpush.xpose.msk.msrb.mxu2 %vm1409_vm1, %v3006_v45  ;;  %v2690_v51 = vpop.f32.mrf.mxu1 }
 0x3e6   :  { %v2856_v46 = vadd.f32 %v2838_v1, %v2805_v52  ;;  %v2807_v8 = vmul.f32 %v2789_v15, %v2690_v51  ;;  %v2756_v10 = vpop.f32.mrf.mxu0  ;;  %v2826_v15 = vperm.slane %v7108_v58, 0 }
 0x3e7   :  { %v7248_v2 = vmul.f32 %v2868_v26, %v2850_v33  ;;  %v2801_v4 = vmul.f32 %v2792_v32, %v2756_v10  ;;  %v2842_v26 = vmul.f32 %v2824_v55, %v7142_v24  ;;  %v2878_v33 = vld [vmem:[%s7661_s6 + $0x78] sm:$0xff]  ;;  %v3051_v10 = vld [vmem:[%s7662_s7 + $0x4c0] sm:$0x3]  ;;  %v2880_v55 = vld [vmem:[%s7661_s6 + $0x88] sm:$0xff] }
 0x3e8   :  { %v2858_v62 = vadd.f32 %v2840_v20, %v2807_v8  ;;  %v7260_v54 = vmul.f32 %v2874_v38, %v2856_v46  ;;  %v2835_v25 = vmul.f32 %v2826_v15, %v7098_v19  ;;  %v2879_v19 = vld [vmem:[%s7661_s6 + $0x80] sm:$0xff]  ;;  %v2961_v38 = vld [vmem:[%s7662_s7 + $0x1f0] sm:$0xff]  ;;  %v2952_v8 = vld [vmem:[%s7662_s7 + $0x1a8] sm:$0xff] }
 0x3e9   :  { %v2852_v31 = vadd.f32 %v2834_v3, %v2801_v4  ;;  %4919 = vmatpush.xpose.msk.msrb.mxu2 %vm1409_vm1, %v2997_v57  ;;  %3240 = vmatmul.f32.vlgmr.msra.gmra.mxu3 %v7248_v2  ;;  %v3049_v20 = vld [vmem:[%s7662_s7 + $0x4b0] sm:$0x3]  ;;  %v2943_v57 = vld [vmem:[%s7662_s7 + $0x160] sm:$0xff] }
 0x3ea   :  { %3174 = vmatmul.f32.gmra.mxu0 %v7260_v54  ;;  %v2713_v21 = vpop.f32.mrf.mxu2  ;;  %v7267_v0 = vmul.f32 %v2876_v14, %v2858_v62  ;;  %3400 = vmatpush.xpose.msra.mxu3 %v3046_v36  ;;  %v2925_v3 = vld [vmem:[%s7662_s7 + $0xd0] sm:$0xff]  ;;  %v2871_v4 = vld [vmem:[%s7661_s6 + $0x40] sm:$0xff]  ;;  %s5250_s6 = smov 122  }
 0x3eb   :  { %v7273_v59 = vmul.f32 %v2870_v43, %v2852_v31  ;;  %v2808_v49 = vmul.f32 %v2790_v23, %v2713_v21  ;;  %v2733_v12 = vpop.f32.mrf.mxu3  ;;  %v2843_v23 = vmul.f32 %v2825_v47, %v7142_v24  ;;  %v2970_v47 = vld [vmem:[%s7662_s7 + $0x238] sm:$0xff] }
 0x3ec   :  { %v2800_v40 = vmul.f32 %v2791_v61, %v2733_v12  ;;  %3220 = vmatmul.f32.gmra.mxu2 %v7267_v0 }
 0x3ed   :  { %v2859_v11 = vadd.f32 %v2841_v56, %v2808_v49  ;;  %3286 = vmatmul.f32.vlgmr.msra.gmra.mxu1 %v7273_v59  ;;  %4920 = vmatpush.xpose.msk.msrb.mxu2 %vm1409_vm1, %v2988_v13  ;;  %v2779_v28 = vpop.f32.mrf.mxu1 }
 0x3ee   :  { %v2851_v7 = vadd.f32 %v2833_v30, %v2800_v40  ;;  %v2759_v37 = vpop.f32.mrf.mxu0  ;;  %v2802_v44 = vmul.f32 %v2793_v22, %v2779_v28  ;;  %3446 = vmatpush.xpose.msra.mxu1 %v3048_v48 }
 0x3ef   :  { %v2810_v53 = vmul.f32 %v2792_v32, %v2759_v37  ;;  %v2895_v41 = vmul.f32 %v2877_v35, %v2859_v11 }
 0x3f0   :  { %v2887_v45 = vmul.f32 %v2869_v29, %v2851_v7  ;;  %v2853_v5 = vadd.f32 %v2835_v25, %v2802_v44 }
 0x3f1   :  { %v2861_v50 = vadd.f32 %v2843_v23, %v2810_v53  ;;  %4921 = vmatpush.xpose.msk.msrb.mxu2 %vm1409_vm1, %v2979_v27  ;;  %3243 = vmatmul.f32.gmra.mxu3 %v2895_v41 }
 0x3f2   :  { %3263 = vmatmul.f32.vlgmr.msra.gmra.mxu0 %v2887_v45 }
 0x3f3   :  { %v2736_v1 = vpop.f32.mrf.mxu3  ;;  %v2897_v52 = vmul.f32 %v2879_v19, %v2861_v50  ;;  %3423 = vmatpush.xpose.msra.mxu0 %v3047_v42 }
 0x3f4   :  { %v2809_v32 = vmul.f32 %v2791_v61, %v2736_v1 }
 0x3f5   :  { %3289 = vmatmul.f32.gmra.mxu1 %v2897_v52  ;;  %4922 = vmatpush.xpose.msk.msrb.mxu2 %vm1409_vm1, %v2970_v47  ;;  %v2782_v14 = vpop.f32.mrf.mxu1 }
 0x3f6   :  { %v2860_v51 = vadd.f32 %v2842_v26, %v2809_v32 }
 0x3f8   :  { %v2896_v46 = vmul.f32 %v2878_v33, %v2860_v51 }
 0x3f9   :  { %4923 = vmatpush.xpose.msk.msrb.mxu2 %vm1409_vm1, %v2961_v38  ;;  %3332 = vmatmul.f32.vlgmr.msrb.gmra.mxu3 %v7128_v9  ;;  %v3050_v9 = vld [vmem:[%s7662_s7 + $0x4b8] sm:$0x3] }
 0x3fa   :  { %3266 = vmatmul.f32.gmra.mxu0 %v2896_v46  ;;  %3469 = vmatpush.xpose.msrb.mxu3 %v3049_v20 }
 0x3fd   :  { %4924 = vmatpush.xpose.msk.msrb.mxu2 %vm1409_vm1, %v2952_v8  ;;  %3378 = vmatmul.f32.vlgmr.msrb.gmra.mxu1 %v7211_v6  ;;  %v2934_v6 = vld [vmem:[%s7662_s7 + $0x118] sm:$0xff] }
 0x3fe   :  { %4932 = vmatpush.xpose.msk.msrb.mxu1 %vm1409_vm1, %v3051_v10 }
 0x401   :  { %4925 = vmatpush.xpose.msk.msrb.mxu2 %vm1409_vm1, %v2943_v57  ;;  %3335 = vmatmul.f32.gmra.mxu3 %v7178_v39  ;;  %v2907_v39 = vld [vmem:[%s7662_s7 + $0x40] sm:$0xff] }
 0x402   :  { %3355 = vmatmul.f32.vlgmr.msrb.gmra.mxu0 %v7159_v34  ;;  %v2916_v34 = vld [vmem:[%s7662_s7 + $0x88] sm:$0xff]  ;;  %s5248_s7 = smov 126  }
 0x403   :  { %3492 = vmatpush.xpose.msrb.mxu0 %v3050_v9 }
 0x405   :  { %4926 = vmatpush.xpose.msk.msrb.mxu2 %vm1409_vm1, %v2934_v6  ;;  %3381 = vmatmul.f32.gmra.mxu1 %v7260_v54 }
 0x409   :  { %4927 = vmatpush.xpose.msk.msrb.mxu2 %vm1409_vm1, %v2925_v3  ;;  %3401 = vmatmul.f32.vlgmr.msra.gmra.mxu3 %v7183_v63  ;;  %v2889_v63 = vmul.f32 %v2871_v4, %v2853_v5 }
 0x40a   :  { %3358 = vmatmul.f32.gmra.mxu0 %v7209_v16  ;;  %v2811_v16 = vmul.f32 %v2793_v22, %v2782_v14 }
 0x40d   :  { %4928 = vmatpush.xpose.msk.msrb.mxu2 %vm1409_vm1, %v2916_v34  ;;  %3447 = vmatmul.f32.vlgmr.msra.gmra.mxu1 %v7248_v2  ;;  %v2844_v2 = vmul.f32 %v2826_v15, %v7142_v24 }
 0x40f   :  { %v2862_v36 = vadd.f32 %v2844_v2, %v2811_v16 }
 0x411   :  { %4929 = vmatpush.xpose.msk.msrb.mxu2 %vm1409_vm1, %v2907_v39  ;;  %3404 = vmatmul.f32.gmra.mxu3 %v7230_v60  ;;  %v2898_v60 = vmul.f32 %v2880_v55, %v2862_v36 }
 0x412   :  { %3424 = vmatmul.f32.vlgmr.msra.gmra.mxu0 %v7222_v17 }
 0x414   :  { %4930 = vmatmul.msk.f32.vlgmr.msrb.gmra.mxu2 %vm1409_vm1, %v2889_v63 }
 0x415   :  { %3450 = vmatmul.f32.gmra.mxu1 %v2895_v41 }
 0x419   :  { %3470 = vmatmul.f32.vlgmr.msrb.gmra.mxu3 %v2887_v45 }
 0x41a   :  { %3427 = vmatmul.f32.gmra.mxu0 %v7267_v0 }
 0x41c   :  { %4931 = vmatmul.msk.f32.gmra.mxu2 %vm1409_vm1, %v2898_v60 }
 0x41d   :  { %4933 = vmatmul.msk.f32.vlgmr.msrb.gmra.mxu1 %vm1409_vm1, %v2889_v63 }
 0x421   :  { %3473 = vmatmul.f32.gmra.mxu3 %v2896_v46 }
 0x422   :  { %3493 = vmatmul.f32.vlgmr.msrb.gmra.mxu0 %v7273_v59 }
 0x425   :  { %4934 = vmatmul.msk.f32.gmra.mxu1 %vm1409_vm1, %v2898_v60 }
 0x42a   :  { %3496 = vmatmul.f32.gmra.mxu0 %v2897_v52 }
 0x456   :  { %v3126_v13 = vpop.f32.mrf.mxu2 }
 0x45a   :  { %v3195_v18 = vpop.f32.mrf.mxu1 }
 0x45c   :  { %v3149_v58 = vpop.f32.mrf.mxu3 }
 0x45d   :  { %v3150_v29 = vadd.f32 %v3149_v58, %v3126_v13 }
 0x45f   :  { %v3172_v24 = vpop.f32.mrf.mxu0  ;;  %v3129_v59 = vpop.f32.mrf.mxu2 }
 0x460   :  { %v3173_v7 = vadd.f32 %v3172_v24, %v3150_v29 }
 0x462   :  { %v3198_v17 = vpop.f32.mrf.mxu1  ;;  %v3196_v53 = vadd.f32 %v3195_v18, %v3173_v7 }
 0x464   :  { %v3152_v62 = vpop.f32.mrf.mxu3 }
 0x465   :  { %v3153_v23 = vadd.f32 %v3152_v62, %v3129_v59 }
 0x467   :  { %v3175_v43 = vpop.f32.mrf.mxu0  ;;  %v3218_v35 = vpop.f32.mrf.mxu2 }
 0x468   :  { %v3219_v19 = vadd.f32 %v3218_v35, %v3196_v53  ;;  %v3176_v47 = vadd.f32 %v3175_v43, %v3153_v23  ;;  %v5231_v53 = vmov 0  }
 0x469   :  { %5138 = vset.pattern.permute.xlu0 %v5231_v53  ;;  %5139 = vset.pattern.permute.xlu1 %v5231_v53 }
 0x46a   :  { %v3287_v54 = vpop.f32.mrf.mxu1  ;;  %v3199_v51 = vadd.f32 %v3198_v17, %v3176_v47  ;;  %5140 = vset.pattern.permute.xlu2 %v5231_v53  ;;  %v7407_v47 = vld [vmem:[%s7666_s11 + $0x8] sm:$0xff] }
 0x46c   :  { %v3241_v31 = vpop.f32.mrf.mxu3 }
 0x46d   :  { %v3242_v1 = vadd.f32 %v3241_v31, %v3219_v19 }
 0x46f   :  { %v3264_v61 = vpop.f32.mrf.mxu0  ;;  %v3221_v5 = vpop.f32.mrf.mxu2 }
 0x470   :  { %v3265_v38 = vadd.f32 %v3264_v61, %v3242_v1  ;;  %v3222_v8 = vadd.f32 %v3221_v5, %v3199_v51  ;;  %v5230_v61 = vmov 130.0   ;;  %v5232_v1 = vmov 1  }
 0x471   :  { %5173 = vrcp.f32 %v5230_v61  ;;  %v3650_v61 = vld [vmem:[%s7665_s10 + $0x58] sm:$0xff] }
 0x472   :  { %v3290_v15 = vpop.f32.mrf.mxu1  ;;  %v3288_v34 = vadd.f32 %v3287_v54, %v3265_v38  ;;  %v7413_v38 = vld [vmem:[%s7666_s11] sm:$0xff]  ;;  %s5258_s11 = smov 117  }
 0x474   :  { %v3244_v21 = vpop.f32.mrf.mxu3 }
 0x475   :  { %v3245_v3 = vadd.f32 %v3244_v21, %v3222_v8 }
 0x477   :  { %v3267_v0 = vpop.f32.mrf.mxu0  ;;  %v5174_v21 = vpop.eup %5173 }
 0x478   :  { %v3268_v2 = vadd.f32 %v3267_v0, %v3245_v3  ;;  %v3533_v13 = vmul.f32 130.0, %v5174_v21  ;;  %vm3537_vm10 = vweird.f32 %v5174_v21 }
 0x47a   :  { %v3379_v56 = vpop.f32.mrf.mxu1  ;;  %v3291_v24 = vadd.f32 %v3290_v15, %v3268_v2 }
 0x47c   :  { %v3333_v49 = vpop.f32.mrf.mxu3 }
 0x47f   :  { %v3356_v12 = vpop.f32.mrf.mxu0 }
 0x480   :  { %v3357_v28 = vadd.f32 %v3356_v12, %v3333_v49 }
 0x482   :  { %v3382_v48 = vpop.f32.mrf.mxu1  ;;  %v3380_v37 = vadd.f32 %v3379_v56, %v3357_v28  ;;  %v3534_v56 = vsub.f32 1.0, %v3533_v13  ;;  %v3648_v13 = vld [vmem:[%s7665_s10 + $0x48] sm:$0xff] }
 0x484   :  { %v3336_v22 = vpop.f32.mrf.mxu3  ;;  %v3535_v0 = vmul.f32 %v5174_v21, %v3534_v56  ;;  %v5240_v56 = vmov 7  }
 0x486   :  { %v3536_v49 = vadd.f32 %v5174_v21, %v3535_v0  ;;  %v3647_v0 = vld [vmem:[%s7665_s10 + $0x40] sm:$0xff] }
 0x487   :  { %v3359_v30 = vpop.f32.mrf.mxu0 }
 0x488   :  { %v3360_v41 = vadd.f32 %v3359_v30, %v3336_v22  ;;  %v3538_v12 = vsel %vm3537_vm10, %v5174_v21, %v3536_v49  ;;  %v3649_v21 = vld [vmem:[%s7665_s10 + $0x50] sm:$0xff]  ;;  %v5241_v49 = vmov 11  }
 0x48a   :  { %v3448_v40 = vpop.f32.mrf.mxu1  ;;  %v3383_v52 = vadd.f32 %v3382_v48, %v3360_v41  ;;  %v3599_v41 = vld [vmem:[%s7664_s9] sm:$0xff] }
 0x48c   :  { %v3402_v11 = vpop.f32.mrf.mxu3 }
 0x48d   :  { %v3403_v44 = vadd.f32 %v3402_v11, %v3380_v37 }
 0x48f   :  { %v3425_v25 = vpop.f32.mrf.mxu0 }
 0x490   :  { %v3426_v42 = vadd.f32 %v3425_v25, %v3403_v44 }
 0x492   :  { %v3451_v45 = vpop.f32.mrf.mxu1  ;;  %v3449_v32 = vadd.f32 %v3448_v40, %v3426_v42 }
 0x494   :  { %v3405_v27 = vpop.f32.mrf.mxu3 }
 0x495   :  { %v3406_v26 = vadd.f32 %v3405_v27, %v3383_v52 }
 0x497   :  { %v3428_v50 = vpop.f32.mrf.mxu0  ;;  %v3310_v46 = vpop.f32.mrf.mxu2 }
 0x498   :  { %v3429_v10 = vadd.f32 %v3428_v50, %v3406_v26  ;;  %v3311_v4 = vadd.f32 %v3310_v46, %v3288_v34 }
 0x49a   :  { %v3517_v57 = vpop.f32.mrf.mxu1  ;;  %v3452_v14 = vadd.f32 %v3451_v45, %v3429_v10  ;;  %v3559_v10 = vld [vmem:[%s7663_s8] sm:$0xff] }
 0x49c   :  { %v3471_v33 = vpop.f32.mrf.mxu3 }
 0x49d   :  { %v3472_v20 = vadd.f32 %v3471_v33, %v3449_v32 }
 0x49f   :  { %v3494_v9 = vpop.f32.mrf.mxu0  ;;  %v3313_v18 = vpop.f32.mrf.mxu2 }
 0x4a0   :  { %v3495_v6 = vadd.f32 %v3494_v9, %v3472_v20  ;;  %v3314_v43 = vadd.f32 %v3313_v18, %v3291_v24  ;;  %v5236_v18 = vmov 2   ;;  %v5238_v24 = vmov 9  }
 0x4a2   :  { %v3518_v39 = vadd.f32 %v3517_v57, %v3495_v6  ;;  %v3520_v17 = vpop.f32.mrf.mxu1 }
 0x4a4   :  { %v3474_v63 = vpop.f32.mrf.mxu3  ;;  %v3524_v16 = vsel %vm3523_vm9, %v3518_v39, 0.0 }
 0x4a5   :  { %v3475_v36 = vadd.f32 %v3474_v63, %v3452_v14  ;;  %v3525_v55 = vadd.f32 %v3524_v16, %v3311_v4  ;;  %v3560_v14 = vld [vmem:[%s7663_s8 + $0x8] sm:$0xff] }
 0x4a7   :  { %v3497_v60 = vpop.f32.mrf.mxu0  ;;  %3526 = vadd.xlane.f32.xlu1 %v3525_v55  ;;  %v5235_v55 = vmov 5  }
 0x4a8   :  { %v3498_v58 = vadd.f32 %v3497_v60, %v3475_v36  ;;  %v5234_v36 = vmov 3   ;;  %v3600_v60 = vld [vmem:[%s7664_s9 + $0x8] sm:$0xff] }
 0x4aa   :  { %v3521_v62 = vadd.f32 %v3520_v17, %v3498_v58  ;;  %v5237_v58 = vmov 6   ;;  %v3654_v17 = vld [vmem:[%s7665_s10 + $0x78] sm:$0xff] }
 0x4ab   :  { %3666 = vmatpush.msra.mxu3 %v3654_v17 }
 0x4ac   :  { %v3528_v54 = vsel %vm3523_vm9, %v3521_v62, 0.0 }
 0x4ad   :  { %v3529_v31 = vadd.f32 %v3528_v54, %v3314_v43  ;;  %v3652_v54 = vld [vmem:[%s7665_s10 + $0x68] sm:$0xff] }
 0x4af   :  { %3530 = vadd.xlane.f32.xlu1 %v3529_v31  ;;  %v3651_v31 = vld [vmem:[%s7665_s10 + $0x60] sm:$0xff] }
 0x4c8   :  { %3603 = vperm.xlu1 %5139, %v3599_v41   ;;  %v5245_v41 = vmov 13  }
 0x4d0   :  { %5141 = vset.pattern.permute.xlu1 %v5232_v1 }
 0x4d1   :  { %3733 = vperm.xlu1 %5141, %v7407_v47  }
 0x4d9   :  { %3729 = vperm.xlu1 %5141, %v7413_v38  }
 0x51a   :  { %v3527_v59 = vpop.xlane.xlu1 %3526 }
 0x51b   :  { %v3539_v48 = vmul.f32 %v3538_v12, %v3527_v59  ;;  %v3645_v59 = vld [vmem:[%s7665_s10 + $0x30] sm:$0xff] }
 0x51d   :  { %v7380_v22 = vsub.f32 %v3311_v4, %v3539_v48  ;;  %v7382_v15 = vsub.f32 %v3518_v39, %v3539_v48  ;;  %v5233_v4 = vmov 4   ;;  %v3644_v48 = vld [vmem:[%s7665_s10 + $0x28] sm:$0xff] }
 0x51e   :  { %5144 = vset.pattern.permute.xlu1 %v5233_v4 }
 0x51f   :  { %v3545_v30 = vmul.f32 %v7380_v22, %v7380_v22  ;;  %v3546_v40 = vmul.f32 %v7382_v15, %v7382_v15  ;;  %3793 = vperm.xlu1 %5144, %v7407_v47  }
 0x521   :  { %v3549_v35 = vsel %vm3523_vm9, %v3546_v40, 0.0  ;;  %v5242_v40 = vmov 8  }
 0x522   :  { %v3531_v11 = vpop.xlane.xlu1 %3530  ;;  %v3550_v29 = vadd.f32 %v3549_v35, %v3545_v30  ;;  %v3643_v30 = vld [vmem:[%s7665_s10 + $0x20] sm:$0xff]  ;;  %v5243_v35 = vmov 14  }
 0x523   :  { %v3540_v28 = vmul.f32 %v3538_v12, %v3531_v11  ;;  %v3642_v11 = vld [vmem:[%s7665_s10 + $0x18] sm:$0xff] }
 0x524   :  { %3551 = vadd.xlane.f32.xlu2 %v3550_v29  ;;  %v3641_v29 = vld [vmem:[%s7665_s10 + $0x10] sm:$0xff] }
 0x525   :  { %v7389_v25 = vsub.f32 %v3314_v43, %v3540_v28  ;;  %v7391_v7 = vsub.f32 %v3521_v62, %v3540_v28  ;;  %v3653_v62 = vld [vmem:[%s7665_s10 + $0x70] sm:$0xff]  ;;  %v5239_v43 = vmov 10   ;;  %v3640_v28 = vld [vmem:[%s7665_s10 + $0x8] sm:$0xff] }
 0x526   :  { %3667 = vmatpush.msra.mxu3 %v3653_v62 }
 0x527   :  { %v3547_v37 = vmul.f32 %v7389_v25, %v7389_v25  ;;  %v3548_v44 = vmul.f32 %v7391_v7, %v7391_v7  ;;  %5146 = vset.pattern.permute.xlu1 %v5235_v55 }
 0x528   :  { %3813 = vperm.xlu1 %5146, %v7407_v47   ;;  %3668 = vmatpush.msra.mxu3 %v3652_v54 }
 0x529   :  { %v3553_v27 = vsel %vm3523_vm9, %v3548_v44, 0.0  ;;  %v3639_v44 = vld [vmem:[%s7665_s10] sm:$0xff] }
 0x52a   :  { %v3554_v23 = vadd.f32 %v3553_v27, %v3547_v37  ;;  %3669 = vmatpush.msra.mxu3 %v3651_v31  ;;  %v3655_v37 = vld [vmem:[%s7665_s10 + $0x80] sm:$0x3] }
 0x52b   :  { %4939 = vmatpush.msk.msra.mxu0 %vm3662_vm2, %v3655_v37  ;;  %vm4234_vm2 = vcmask 254976  }
 0x52c   :  { %3555 = vadd.xlane.f32.xlu2 %v3554_v23  ;;  %3670 = vmatpush.msra.mxu3 %v3650_v61  ;;  %v5244_v23 = vmov 15  }
 0x52e   :  { %3671 = vmatpush.msra.mxu3 %v3649_v21 }
 0x530   :  { %3809 = vperm.xlu1 %5146, %v7413_v38   ;;  %3672 = vmatpush.msra.mxu3 %v3648_v13 }
 0x532   :  { %3673 = vmatpush.msra.mxu3 %v3647_v0 }
 0x538   :  { %5150 = vset.pattern.permute.xlu1 %v5237_v58 }
 0x539   :  { %3829 = vperm.xlu1 %5150, %v7413_v38  }
 0x541   :  { %5152 = vset.pattern.permute.xlu1 %v5238_v24 }
 0x542   :  { %3893 = vperm.xlu1 %5152, %v7407_v47  }
 0x54a   :  { %5154 = vset.pattern.permute.xlu1 %v5239_v43 }
 0x54b   :  { %3913 = vperm.xlu1 %5154, %v7407_v47  }
 0x553   :  { %3909 = vperm.xlu1 %5154, %v7413_v38  }
 0x55b   :  { %5158 = vset.pattern.permute.xlu1 %v5241_v49 }
 0x55c   :  { %3929 = vperm.xlu1 %5158, %v7413_v38  }
 0x564   :  { %5160 = vset.pattern.permute.xlu1 %v5243_v35 }
 0x565   :  { %3993 = vperm.xlu1 %5160, %v7407_v47  }
 0x56d   :  { %5162 = vset.pattern.permute.xlu1 %v5244_v23 }
 0x56e   :  { %4013 = vperm.xlu1 %5162, %v7407_v47  }
 0x576   :  { %5165 = vset.pattern.permute.xlu1 %v5231_v53 }
 0x577   :  { %3721 = vperm.xlu1 %5165, %v7407_v47  }
 0x57f   :  { %3716 = vperm.xlu1 %5165, %v7413_v38  }
 0x597   :  { %v3552_v45 = vpop.xlane.xlu2 %3551 }
 0x598   :  { %v3557_v5 = vmul.f32 %v3552_v45, %v3538_v12 }
 0x59a   :  { %v3561_v19 = vadd.f32 1e-05, %v3557_v5 }
 0x59c   :  { %5175 = vrsqrt.f32 %v3561_v19  ;;  %vm3569_vm12 = vweird.f32 %v3561_v19 }
 0x59f   :  { %v3556_v42 = vpop.xlane.xlu2 %3555 }
 0x5a0   :  { %v3558_v50 = vmul.f32 %v3556_v42, %v3538_v12  ;;  %v3646_v12 = vld [vmem:[%s7665_s10 + $0x38] sm:$0xff]  ;;  %s5247_s10 = smov 125  }
 0x5a1   :  { %3674 = vmatpush.msra.mxu3 %v3646_v12 }
 0x5a2   :  { %v5176_v52 = vpop.eup %5175  ;;  %v3562_v26 = vadd.f32 1e-05, %v3558_v50  ;;  %v3604_v50 = vpop.permute.xlu1 %3603 }
 0x5a3   :  { %v3564_v32 = vmul.f32 %v5176_v52, %v3561_v19  ;;  %vm3570_vm11 = vweird.f32 %v5176_v52  ;;  %3675 = vmatpush.msra.mxu3 %v3645_v59 }
 0x5a4   :  { %5177 = vrsqrt.f32 %v3562_v26  ;;  %vm3571_vm13 = vmor %vm3569_vm12, %vm3570_vm11  ;;  %vm3579_vm15 = vweird.f32 %v3562_v26 }
 0x5a5   :  { %v3565_v33 = vmul.f32 %v5176_v52, %v3564_v32  ;;  %3676 = vmatpush.msra.mxu3 %v3644_v48 }
 0x5a7   :  { %v3566_v51 = vmul.f32 0.5, %v3565_v33  ;;  %3677 = vmatpush.msra.mxu3 %v3643_v30 }
 0x5a9   :  { %v3567_v20 = vsub.f32 1.5, %v3566_v51  ;;  %3678 = vmatpush.msra.mxu3 %v3642_v11 }
 0x5aa   :  { %v5178_v46 = vpop.eup %5177 }
 0x5ab   :  { %v3574_v8 = vmul.f32 %v5178_v46, %v3562_v26  ;;  %v3568_v57 = vmul.f32 %v5176_v52, %v3567_v20  ;;  %vm3580_vm14 = vweird.f32 %v5178_v46  ;;  %3679 = vmatpush.msra.mxu3 %v3641_v29 }
 0x5ac   :  { %vm3581_vm0 = vmor %vm3579_vm15, %vm3580_vm14 }
 0x5ad   :  { %v3575_v9 = vmul.f32 %v5178_v46, %v3574_v8  ;;  %v3572_v6 = vsel %vm3571_vm13, %v5176_v52, %v3568_v57  ;;  %3680 = vmatpush.msra.mxu3 %v3640_v28 }
 0x5ae   :  { %v3583_v3 = vmul.f32 %v3572_v6, %v3559_v10  ;;  %v5246_v10 = vmov 12  }
 0x5af   :  { %v3576_v34 = vmul.f32 0.5, %v3575_v9  ;;  %3681 = vmatpush.msra.mxu3 %v3639_v44 }
 0x5b0   :  { %3587 = vperm.xlu0 %5138, %v3583_v3  }
 0x5b1   :  { %v3577_v39 = vsub.f32 1.5, %v3576_v34 }
 0x5b3   :  { %v3578_v63 = vmul.f32 %v5178_v46, %v3577_v39 }
 0x5b5   :  { %v3582_v16 = vsel %vm3581_vm0, %v5178_v46, %v3578_v63 }
 0x5b6   :  { %v3584_v2 = vmul.f32 %v3582_v16, %v3560_v14 }
 0x5b8   :  { %3592 = vperm.xlu2 %5140, %v3584_v2   ;;  %5143 = vset.pattern.permute.xlu0 %v5234_v36 }
 0x5b9   :  { %3773 = vperm.xlu0 %5143, %v7407_v47  }
 0x5c0   :  { %3608 = vperm.xlu2 %5140, %v3600_v60   ;;  %v7519_v60 = vpop.permute.xlu1 %3733 }
 0x5c1   :  { %5147 = vset.pattern.permute.xlu0 %v5233_v4 }
 0x5c2   :  { %3789 = vperm.xlu0 %5147, %v7413_v38  }
 0x5c8   :  { %5142 = vset.pattern.permute.xlu2 %v5236_v18 }
 0x5c9   :  { %3753 = vperm.xlu2 %5142, %v7407_v47  }
 0x5ca   :  { %5151 = vset.pattern.permute.xlu0 %v5242_v40 }
 0x5cb   :  { %3873 = vperm.xlu0 %5151, %v7407_v47  }
 0x5d1   :  { %3749 = vperm.xlu2 %5142, %v7413_v38  }
 0x5d3   :  { %5155 = vset.pattern.permute.xlu0 %v5238_v24 }
 0x5d4   :  { %3889 = vperm.xlu0 %5155, %v7413_v38  }
 0x5d9   :  { %5145 = vset.pattern.permute.xlu2 %v5234_v36 }
 0x5da   :  { %3769 = vperm.xlu2 %5145, %v7413_v38  }
 0x5dc   :  { %5159 = vset.pattern.permute.xlu0 %v5245_v41 }
 0x5dd   :  { %3973 = vperm.xlu0 %5159, %v7407_v47  }
 0x5e2   :  { %5148 = vset.pattern.permute.xlu2 %v5237_v58  ;;  %v3730_v58 = vpop.permute.xlu1 %3729 }
 0x5e3   :  { %3833 = vperm.xlu2 %5148, %v7407_v47  }
 0x5e5   :  { %5163 = vset.pattern.permute.xlu0 %v5243_v35 }
 0x5e6   :  { %3989 = vperm.xlu0 %5163, %v7413_v38  }
 0x5ea   :  { %v7521_v17 = vpop.permute.xlu1 %3793 }
 0x5eb   :  { %5149 = vset.pattern.permute.xlu2 %v5240_v56 }
 0x5ec   :  { %3853 = vperm.xlu2 %5149, %v7407_v47  }
 0x5ee   :  { %5166 = vset.pattern.permute.xlu0 %v5231_v53 }
 0x5f2   :  { %v7525_v43 = vpop.permute.xlu1 %3813 }
 0x5f4   :  { %3849 = vperm.xlu2 %5149, %v7413_v38  }
 0x5fa   :  { %v3810_v31 = vpop.permute.xlu1 %3809 }
 0x5fc   :  { %5153 = vset.pattern.permute.xlu2 %v5242_v40 }
 0x5fd   :  { %3869 = vperm.xlu2 %5153, %v7413_v38  }
 0x605   :  { %5156 = vset.pattern.permute.xlu2 %v5241_v49 }
 0x606   :  { %3933 = vperm.xlu2 %5156, %v7407_v47  }
 0x60e   :  { %5157 = vset.pattern.permute.xlu2 %v5246_v10 }
 0x60f   :  { %3953 = vperm.xlu2 %5157, %v7407_v47  }
 0x612   :  { %v3593_v27 = vpop.permute.xlu2 %3592 }
 0x613   :  { %v3597_v5 = vmul.f32 %v3593_v27, %v7389_v25  ;;  %v3598_v19 = vmul.f32 %v3593_v27, %v7391_v7 }
 0x617   :  { %3949 = vperm.xlu2 %5157, %v7413_v38  }
 0x61a   :  { %v3609_v45 = vpop.permute.xlu2 %3608 }
 0x61b   :  { %v3613_v1 = vadd.f32 %v3609_v45, %v3597_v5  ;;  %v3614_v32 = vadd.f32 %v3609_v45, %v3598_v19 }
 0x61d   :  { %v3621_v20 = vmin.f32 %v3613_v1, 0.0  ;;  %v3622_v25 = vmin.f32 %v3614_v32, 0.0  ;;  %vm3617_vm5 = vcmp.gt.f32.partialorder %v3613_v1, 0.0  ;;  %vm3618_vm6 = vcmp.gt.f32.partialorder %v3614_v32, 0.0 }
 0x61f   :  { %5161 = vset.pattern.permute.xlu2 %v5245_v41 }
 0x620   :  { %3969 = vperm.xlu2 %5161, %v7413_v38  }
 0x622   :  { %v3588_v42 = vpop.permute.xlu0 %3587 }
 0x623   :  { %v3595_v52 = vmul.f32 %v3588_v42, %v7380_v22  ;;  %v3596_v26 = vmul.f32 %v3588_v42, %v7382_v15  ;;  %v3627_v22 = vmul.f32 1.442695, %v3621_v20  ;;  %v3629_v15 = vmul.f32 1.442695, %v3622_v25  ;;  %v7517_v55 = vpop.permute.xlu2 %3753 }
 0x625   :  { %v3611_v33 = vadd.f32 %v3604_v50, %v3595_v52  ;;  %v3612_v51 = vadd.f32 %v3604_v50, %v3596_v26 }
 0x627   :  { %v3619_v46 = vmin.f32 %v3611_v33, 0.0  ;;  %v3620_v8 = vmin.f32 %v3612_v51, 0.0  ;;  %vm3615_vm3 = vcmp.gt.f32.partialorder %v3611_v33, 0.0  ;;  %vm3616_vm4 = vcmp.gt.f32.partialorder %v3612_v51, 0.0 }
 0x628   :  { %5164 = vset.pattern.permute.xlu2 %v5244_v23 }
 0x629   :  { %v3623_v7 = vmul.f32 1.442695, %v3619_v46  ;;  %v3625_v57 = vmul.f32 1.442695, %v3620_v8  ;;  %4009 = vperm.xlu2 %5164, %v7413_v38   ;;  %v3830_v38 = vpop.permute.xlu1 %3829 }
 0x62b   :  { %5179 = vpow2.f32 %v3623_v7  ;;  %v3750_v18 = vpop.permute.xlu2 %3749  ;;  %v3774_v21 = vpop.permute.xlu0 %3773 }
 0x62c   :  { %5181 = vpow2.f32 %v3625_v57 }
 0x62d   :  { %5183 = vpow2.f32 %v3627_v22 }
 0x62e   :  { %5185 = vpow2.f32 %v3629_v15 }
 0x631   :  { %v5180_v9 = vpop.eup %5179  ;;  %5167 = vset.pattern.permute.xlu2 %v5231_v53  ;;  %v7529_v13 = vpop.permute.xlu1 %3893 }
 0x632   :  { %v5182_v6 = vpop.eup %5181  ;;  %v4935_v47 = vadd.f32 -1.0, %v5180_v9 }
 0x633   :  { %v4936_v3 = vadd.f32 -1.0, %v5182_v6  ;;  %v5184_v39 = vpop.eup %5183 }
 0x634   :  { %v3635_v34 = vsel %vm3615_vm3, %v3611_v33, %v4935_v47  ;;  %v5186_v14 = vpop.eup %5185  ;;  %v4937_v63 = vadd.f32 -1.0, %v5184_v39  ;;  %v3770_v24 = vpop.permute.xlu2 %3769 }
 0x635   :  { %v3636_v4 = vsel %vm3616_vm4, %v3612_v51, %v4936_v3  ;;  %3682 = vmatmul.f32.vlgmr.msra.gmra.mxu3 %v3635_v34  ;;  %v4938_v16 = vadd.f32 -1.0, %v5186_v14  ;;  %v3790_v56 = vpop.permute.xlu0 %3789 }
 0x636   :  { %4940 = vmatmul.msk.f32.vlgmr.msra.gmra.mxu0 %vm3523_vm9, %v3636_v4  ;;  %v3637_v2 = vsel %vm3617_vm5, %v3613_v1, %v4937_v63 }
 0x637   :  { %v3638_v36 = vsel %vm3618_vm6, %v3614_v32, %v4938_v16 }
 0x639   :  { %v7541_v35 = vpop.permute.xlu1 %3913 }
 0x63d   :  { %3685 = vmatmul.f32.gmra.mxu3 %v3637_v2  ;;  %v7523_v62 = vpop.permute.xlu2 %3833  ;;  %v3874_v11 = vpop.permute.xlu0 %3873 }
 0x63e   :  { %4941 = vmatmul.msk.f32.gmra.mxu0 %vm3523_vm9, %v3638_v36 }
 0x641   :  { %v3910_v27 = vpop.permute.xlu1 %3909 }
 0x646   :  { %v7527_v54 = vpop.permute.xlu2 %3853  ;;  %v3890_v23 = vpop.permute.xlu0 %3889 }
 0x649   :  { %v3930_v42 = vpop.permute.xlu1 %3929 }
 0x64e   :  { %v3850_v61 = vpop.permute.xlu2 %3849 }
 0x64f   :  { %v3974_v34 = vpop.permute.xlu0 %3973 }
 0x651   :  { %v3994_v9 = vpop.permute.xlu1 %3993 }
 0x657   :  { %v3870_v53 = vpop.permute.xlu2 %3869 }
 0x658   :  { %v3990_v16 = vpop.permute.xlu0 %3989 }
 0x659   :  { %v4014_v39 = vpop.permute.xlu1 %4013 }
 0x660   :  { %v7536_v40 = vpop.permute.xlu2 %3933 }
 0x669   :  { %v3954_v44 = vpop.permute.xlu2 %3953 }
 0x671   :  { %v3950_v19 = vpop.permute.xlu2 %3949 }
 0x67a   :  { %v3970_v51 = vpop.permute.xlu2 %3969 }
 0x6b3   :  { %v3706_v0 = vpop.f32.mrf.mxu0 }
 0x6b8   :  { %v3683_v49 = vpop.f32.mrf.mxu3 }
 0x6b9   :  { %v7531_v12 = vadd.f32 %v3706_v0, %v3683_v49 }
 0x6bb   :  { %v3776_v59 = vmul.f32 %v3770_v24, %v7531_v12  ;;  %v3756_v48 = vmul.f32 %v3750_v18, %v7531_v12  ;;  %v3736_v30 = vmul.f32 %v3730_v58, %v7531_v12  ;;  %v3836_v29 = vmul.f32 %v3830_v38, %v7531_v12  ;;  %v3709_v32 = vpop.f32.mrf.mxu0  ;;  %v3722_v58 = vpop.permute.xlu1 %3721 }
 0x6bc   :  { %v3796_v28 = vmul.f32 %v3790_v56, %v7531_v12  ;;  %v3816_v37 = vmul.f32 %v3810_v31, %v7531_v12  ;;  %v3896_v41 = vmul.f32 %v3890_v23, %v7531_v12  ;;  %v3856_v45 = vmul.f32 %v3850_v61, %v7531_v12 }
 0x6bd   :  { %3780 = vrot.lane.b32.xlu1 %v3776_v59, %s5247_s10  ;;  %3760 = vrot.lane.b32.xlu0 %v3756_v48, %s5248_s7  ;;  %v3876_v5 = vmul.f32 %v3870_v53, %v7531_v12  ;;  %v3956_v50 = vmul.f32 %v3950_v19, %v7531_v12  ;;  %v3916_v52 = vmul.f32 %v3910_v27, %v7531_v12 }
 0x6be   :  { %3740 = vrot.lane.b32.xlu2 %v3736_v30, %s5249_s18  ;;  %v3936_v26 = vmul.f32 %v3930_v42, %v7531_v12  ;;  %v3976_v46 = vmul.f32 %v3970_v51, %v7531_v12  ;;  %v3996_v2 = vmul.f32 %v3990_v16, %v7531_v12 }
 0x6c0   :  { %v3686_v1 = vpop.f32.mrf.mxu3 }
 0x6c1   :  { %v7560_v33 = vadd.f32 %v3709_v32, %v3686_v1 }
 0x6c3   :  { %v3777_v20 = vmul.f32 %v3774_v21, %v7560_v33  ;;  %v3757_v8 = vmul.f32 %v7517_v55, %v7560_v33  ;;  %v3837_v10 = vmul.f32 %v7523_v62, %v7560_v33  ;;  %v3737_v25 = vmul.f32 %v7519_v60, %v7560_v33  ;;  %v4010_v55 = vpop.permute.xlu2 %4009 }
 0x6c4   :  { %v3817_v7 = vmul.f32 %v7525_v43, %v7560_v33  ;;  %v3897_v57 = vmul.f32 %v7529_v13, %v7560_v33  ;;  %v3797_v22 = vmul.f32 %v7521_v17, %v7560_v33  ;;  %v3877_v15 = vmul.f32 %v3874_v11, %v7560_v33  ;;  %v3717_v17 = vpop.permute.xlu1 %3716 }
 0x6c5   :  { %3840 = vrot.lane.b32.xlu1 %v3836_v29, %s5250_s6  ;;  %3820 = vrot.lane.b32.xlu0 %v3816_v37, %s5252_s2  ;;  %v3957_v6 = vmul.f32 %v3954_v44, %v7560_v33  ;;  %v3857_v47 = vmul.f32 %v7527_v54, %v7560_v33  ;;  %v3937_v3 = vmul.f32 %v7536_v40, %v7560_v33 }
 0x6c6   :  { %3800 = vrot.lane.b32.xlu2 %v3796_v28, %s5251_s19  ;;  %v4017_v4 = vmul.f32 %v4014_v39, %v7560_v33  ;;  %v3917_v14 = vmul.f32 %v7541_v35, %v7560_v33  ;;  %v3997_v63 = vmul.f32 %v3994_v9, %v7560_v33  ;;  %v3977_v36 = vmul.f32 %v3974_v34, %v7560_v33 }
 0x6c7   :  { %v4016_v60 = vmul.f32 %v4010_v55, %v7531_v12  ;;  %v3724_v59 = vmul.f32 %v3717_v17, %v7531_v12  ;;  %v3725_v48 = vmul.f32 %v3722_v58, %v7560_v33 }
 0x6cd   :  { %3900 = vrot.lane.b32.xlu1 %v3896_v41, %s5253_s4  ;;  %3880 = vrot.lane.b32.xlu0 %v3876_v5, %s5255_s20 }
 0x6ce   :  { %3860 = vrot.lane.b32.xlu2 %v3856_v45, %s5254_s1 }
 0x6d5   :  { %3960 = vrot.lane.b32.xlu1 %v3956_v50, %s5256_s21  ;;  %3940 = vrot.lane.b32.xlu0 %v3936_v26, %s5258_s11 }
 0x6d6   :  { %3920 = vrot.lane.b32.xlu2 %v3916_v52, %s5257_s22 }
 0x6dd   :  { %3782 = vrot.lane.b32.xlu1 %v3777_v20, %s5247_s10  ;;  %3762 = vrot.lane.b32.xlu0 %v3757_v8, %s5248_s7 }
 0x6de   :  { %3980 = vrot.lane.b32.xlu2 %v3976_v46, %s5259_s26 }
 0x6e5   :  { %3842 = vrot.lane.b32.xlu1 %v3837_v10, %s5250_s6  ;;  %3822 = vrot.lane.b32.xlu0 %v3817_v7, %s5252_s2 }
 0x6e6   :  { %3742 = vrot.lane.b32.xlu2 %v3737_v25, %s5249_s18 }
 0x6ed   :  { %3902 = vrot.lane.b32.xlu1 %v3897_v57, %s5253_s4  ;;  %3882 = vrot.lane.b32.xlu0 %v3877_v15, %s5255_s20 }
 0x6ee   :  { %3802 = vrot.lane.b32.xlu2 %v3797_v22, %s5251_s19 }
 0x6f5   :  { %3962 = vrot.lane.b32.xlu1 %v3957_v6, %s5256_s21  ;;  %3942 = vrot.lane.b32.xlu0 %v3937_v3, %s5258_s11  ;;  %s4255_s11 = sshll.u32 %s7672_s17, 4  ;;  %s4256_s11 = int_to_ptr.hbm [resolvable:$true] %s4255_s11 }
 0x6f6   :  { %3862 = vrot.lane.b32.xlu2 %v3857_v47, %s5254_s1 }
 0x6fd   :  { %4022 = vrot.lane.b32.xlu1 %v4017_v4, %s5260_s23  ;;  %4002 = vrot.lane.b32.xlu0 %v3997_v63, %s5261_s24  ;;  %v5168_v4 = vld [vmem:[%s7667_s12] ss:$0 sm:$0xff] }
 0x6fe   :  { %3922 = vrot.lane.b32.xlu2 %v3917_v14, %s5257_s22 }
 0x705   :  { %4000 = vrot.lane.b32.xlu0 %v3996_v2, %s5261_s24 }
 0x706   :  { %3982 = vrot.lane.b32.xlu2 %v3977_v36, %s5259_s26 }
 0x70e   :  { %4020 = vrot.lane.b32.xlu2 %v4016_v60, %s5260_s23 }
 0x718   :  { %v3741_v18 = vpop.permute.xlu2 %3740 }
 0x719   :  { %v3746_v30 = vadd.f32 %v3741_v18, %v3724_v59 }
 0x720   :  { %v3801_v24 = vpop.permute.xlu2 %3800 }
 0x728   :  { %v3861_v62 = vpop.permute.xlu2 %3860 }
 0x72f   :  { %v3781_v43 = vpop.permute.xlu1 %3780  ;;  %v3761_v54 = vpop.permute.xlu0 %3760 }
 0x730   :  { %v3921_v31 = vpop.permute.xlu2 %3920  ;;  %v3766_v28 = vadd.f32 %v3761_v54, %v3746_v30 }
 0x732   :  { %v3786_v27 = vadd.f32 %v3781_v43, %v3766_v28  ;;  %v5262_v43 = vmov 34.0  }
 0x733   :  { %5187 = vrcp.f32 %v5262_v43  ;;  %v4159_v43 = vld [vmem:[%s7671_s16 + $0x8] sm:$0xff] }
 0x734   :  { %v3806_v5 = vadd.f32 %v3801_v24, %v3786_v27 }
 0x737   :  { %v3841_v61 = vpop.permute.xlu1 %3840  ;;  %v3821_v38 = vpop.permute.xlu0 %3820 }
 0x738   :  { %v3981_v21 = vpop.permute.xlu2 %3980  ;;  %v3826_v50 = vadd.f32 %v3821_v38, %v3806_v5 }
 0x739   :  { %v5188_v54 = vpop.eup %5187 }
 0x73a   :  { %v3846_v12 = vadd.f32 %v3841_v61, %v3826_v50  ;;  %vm4046_vm8 = vweird.f32 %v5188_v54 }
 0x73c   :  { %v3866_v51 = vadd.f32 %v3861_v62, %v3846_v12 }
 0x73f   :  { %v3901_v53 = vpop.permute.xlu1 %3900  ;;  %v3881_v13 = vpop.permute.xlu0 %3880 }
 0x740   :  { %v3743_v56 = vpop.permute.xlu2 %3742  ;;  %v3886_v8 = vadd.f32 %v3881_v13, %v3866_v51 }
 0x741   :  { %v3747_v40 = vadd.f32 %v3743_v56, %v3725_v48 }
 0x742   :  { %v3906_v57 = vadd.f32 %v3901_v53, %v3886_v8 }
 0x744   :  { %v3926_v9 = vadd.f32 %v3921_v31, %v3906_v57  ;;  %v4042_v31 = vmul.f32 34.0, %v5188_v54 }
 0x746   :  { %v4043_v61 = vsub.f32 1.0, %v4042_v31  ;;  %v4947_v31 = vld [vmem:[%s7670_s15 + $0x2] sm:$0x3] }
 0x747   :  { %v3961_v0 = vpop.permute.xlu1 %3960  ;;  %v3941_v49 = vpop.permute.xlu0 %3940 }
 0x748   :  { %v3803_v11 = vpop.permute.xlu2 %3802  ;;  %v3946_v47 = vadd.f32 %v3941_v49, %v3926_v9  ;;  %v4044_v38 = vmul.f32 %v5188_v54, %v4043_v61  ;;  %v4128_v61 = vld [vmem:[%s7670_s15] sm:$0x3]  ;;  %s5263_s15 = smov [#allocation2]  }
 0x74a   :  { %v3966_v63 = vadd.f32 %v3961_v0, %v3946_v47  ;;  %v4045_v53 = vadd.f32 %v5188_v54, %v4044_v38  ;;  %v4158_v38 = vld [vmem:[%s7671_s16] sm:$0xff] }
 0x74c   :  { %v3986_v36 = vadd.f32 %v3981_v21, %v3966_v63  ;;  %v4047_v21 = vsel %vm4046_vm8, %v5188_v54, %v4045_v53 }
 0x74f   :  { %v3783_v35 = vpop.permute.xlu1 %3782  ;;  %v3763_v29 = vpop.permute.xlu0 %3762 }
 0x750   :  { %v3767_v37 = vadd.f32 %v3763_v29, %v3747_v40  ;;  %v3863_v42 = vpop.permute.xlu2 %3862 }
 0x752   :  { %v3787_v44 = vadd.f32 %v3783_v35, %v3767_v37  ;;  %v4103_v37 = vld [vmem:[%s7669_s14 + $0x8] sm:$0xff] }
 0x754   :  { %v3807_v23 = vadd.f32 %v3803_v11, %v3787_v44 }
 0x757   :  { %v3843_v41 = vpop.permute.xlu1 %3842  ;;  %v3823_v45 = vpop.permute.xlu0 %3822 }
 0x758   :  { %v3827_v19 = vadd.f32 %v3823_v45, %v3807_v23  ;;  %v3923_v46 = vpop.permute.xlu2 %3922 }
 0x75a   :  { %v3847_v1 = vadd.f32 %v3843_v41, %v3827_v19 }
 0x75c   :  { %v3867_v52 = vadd.f32 %v3863_v42, %v3847_v1 }
 0x75f   :  { %v3903_v26 = vpop.permute.xlu1 %3902  ;;  %v3883_v32 = vpop.permute.xlu0 %3882 }
 0x760   :  { %v3887_v33 = vadd.f32 %v3883_v32, %v3867_v52  ;;  %v3983_v6 = vpop.permute.xlu2 %3982  ;;  %v4065_v32 = vld [vmem:[%s7668_s13 + $0x8] sm:$0xff] }
 0x762   :  { %v3907_v20 = vadd.f32 %v3903_v26, %v3887_v33 }
 0x764   :  { %v3927_v10 = vadd.f32 %v3923_v46, %v3907_v20 }
 0x767   :  { %v3943_v25 = vpop.permute.xlu0 %3942  ;;  %v3963_v7 = vpop.permute.xlu1 %3962 }
 0x768   :  { %v3947_v22 = vadd.f32 %v3943_v25, %v3927_v10  ;;  %v4021_v58 = vpop.permute.xlu2 %4020  ;;  %v4064_v25 = vld [vmem:[%s7668_s13] sm:$0xff] }
 0x76a   :  { %v3967_v15 = vadd.f32 %v3963_v7, %v3947_v22  ;;  %v4102_v22 = vld [vmem:[%s7669_s14] sm:$0xff] }
 0x76c   :  { %v3987_v3 = vadd.f32 %v3983_v6, %v3967_v15 }
 0x76f   :  { %v4003_v34 = vpop.permute.xlu0 %4002  ;;  %v4023_v14 = vpop.permute.xlu1 %4022 }
 0x770   :  { %v4007_v39 = vadd.f32 %v4003_v34, %v3987_v3 }
 0x772   :  { %v4027_v16 = vadd.f32 %v4023_v14, %v4007_v39 }
 0x774   :  { %v4033_v2 = vmul.f32 %v5168_v4, %v4027_v16 }
 0x776   :  { %v4038_v55 = vsel %vm4034_vm7, %v4033_v2, 0.0  ;;  %v4951_v2 = vld [vmem:[%s7671_s16 + $0x10] sm:$0xff] }
 0x777   :  { %v4001_v60 = vpop.permute.xlu0 %4000  ;;  %4039 = vadd.xlane.f32.xlu1 %v4038_v55 }
 0x778   :  { %v4006_v18 = vadd.f32 %v4001_v60, %v3986_v36 }
 0x77a   :  { %v4026_v24 = vadd.f32 %v4021_v58, %v4006_v18 }
 0x77c   :  { %v4032_v17 = vmul.f32 %v5168_v4, %v4026_v24 }
 0x77e   :  { %v4035_v62 = vsel %vm4034_vm7, %v4032_v17, 0.0 }
 0x77f   :  { %4036 = vadd.xlane.f32.xlu0 %v4035_v62 }
 0x793   :  { %4111 = vperm.xlu0 %5166, %v4103_v37  }
 0x7ea   :  { %v4040_v13 = vpop.xlane.xlu1 %4039 }
 0x7eb   :  { %v4049_v56 = vmul.f32 %v4047_v21, %v4040_v13 }
 0x7ed   :  { %v4051_v0 = vsub.f32 %v4027_v16, %v4049_v56  ;;  %v4952_v16 = vld [vmem:[%s7671_s16 + $0x18] sm:$0xff]  ;;  %s4253_s16 = sshll.u32 %s5263_s15, 4  ;;  %s4254_s16 = int_to_ptr.vmem [resolvable:$true] %s4253_s16 }
 0x7ee   :  { %4205 = vmatpush.msrb.mxu0 %v4952_v16 }
 0x7ef   :  { %v4053_v49 = vmul.f32 %v5168_v4, %v4051_v0 }
 0x7f0   :  { %4206 = vmatpush.msrb.mxu0 %v4951_v2 }
 0x7f1   :  { %v4055_v59 = vmul.f32 %v4053_v49, %v4053_v49 }
 0x7f2   :  { %v4037_v48 = vpop.xlane.xlu0 %4036 }
 0x7f3   :  { %v4048_v30 = vmul.f32 %v4047_v21, %v4037_v48  ;;  %v4059_v40 = vsel %vm4034_vm7, %v4055_v59, 0.0 }
 0x7f4   :  { %4060 = vadd.xlane.f32.xlu2 %v4059_v40 }
 0x7f5   :  { %v4050_v35 = vsub.f32 %v4026_v24, %v4048_v30 }
 0x7f7   :  { %v4052_v11 = vmul.f32 %v5168_v4, %v4050_v35 }
 0x7f9   :  { %v4054_v29 = vmul.f32 %v4052_v11, %v4052_v11 }
 0x7fb   :  { %v4056_v28 = vsel %vm4034_vm7, %v4054_v29, 0.0 }
 0x7fc   :  { %4057 = vadd.xlane.f32.xlu1 %v4056_v28 }
 0x805   :  { %v4112_v6 = vpop.permute.xlu0 %4111 }
 0x867   :  { %v4061_v44 = vpop.xlane.xlu2 %4060 }
 0x868   :  { %v4063_v27 = vmul.f32 %v4061_v44, %v4047_v21 }
 0x86a   :  { %v4067_v23 = vadd.f32 1e-05, %v4063_v27 }
 0x86c   :  { %5189 = vrsqrt.f32 %v4067_v23  ;;  %vm4084_vm10 = vweird.f32 %v4067_v23 }
 0x86f   :  { %v4058_v41 = vpop.xlane.xlu1 %4057 }
 0x870   :  { %v4062_v45 = vmul.f32 %v4058_v41, %v4047_v21 }
 0x872   :  { %v5190_v5 = vpop.eup %5189  ;;  %v4066_v19 = vadd.f32 1e-05, %v4062_v45 }
 0x873   :  { %v4079_v42 = vmul.f32 %v5190_v5, %v4067_v23  ;;  %vm4085_vm9 = vweird.f32 %v5190_v5 }
 0x874   :  { %5191 = vrsqrt.f32 %v4066_v19  ;;  %vm4086_vm11 = vmor %vm4084_vm10, %vm4085_vm9  ;;  %vm4074_vm13 = vweird.f32 %v4066_v19 }
 0x875   :  { %v4080_v50 = vmul.f32 %v5190_v5, %v4079_v42 }
 0x877   :  { %v4081_v1 = vmul.f32 0.5, %v4080_v50 }
 0x879   :  { %v4082_v12 = vsub.f32 1.5, %v4081_v1 }
 0x87a   :  { %v5192_v52 = vpop.eup %5191 }
 0x87b   :  { %v4069_v26 = vmul.f32 %v5192_v52, %v4066_v19  ;;  %v4083_v33 = vmul.f32 %v5190_v5, %v4082_v12  ;;  %vm4075_vm12 = vweird.f32 %v5192_v52 }
 0x87c   :  { %vm4076_vm14 = vmor %vm4074_vm13, %vm4075_vm12 }
 0x87d   :  { %v4070_v51 = vmul.f32 %v5192_v52, %v4069_v26  ;;  %v4087_v20 = vsel %vm4086_vm11, %v5190_v5, %v4083_v33 }
 0x87e   :  { %v4089_v46 = vmul.f32 %v4087_v20, %v4065_v32 }
 0x87f   :  { %v4071_v8 = vmul.f32 0.5, %v4070_v51 }
 0x880   :  { %4097 = vperm.xlu2 %5167, %v4089_v46  }
 0x881   :  { %v4072_v10 = vsub.f32 1.5, %v4071_v8 }
 0x883   :  { %v4073_v7 = vmul.f32 %v5192_v52, %v4072_v10 }
 0x885   :  { %v4077_v57 = vsel %vm4076_vm14, %v5192_v52, %v4073_v7 }
 0x886   :  { %v4088_v15 = vmul.f32 %v4077_v57, %v4064_v25 }
 0x888   :  { %4092 = vperm.xlu1 %5165, %v4088_v15   ;;  %4106 = vperm.xlu2 %5167, %v4102_v22  }
 0x8da   :  { %v4098_v9 = vpop.permute.xlu2 %4097 }
 0x8db   :  { %v4101_v47 = vmul.f32 %v4098_v9, %v4051_v0 }
 0x8dd   :  { %v4115_v3 = vadd.f32 %v4112_v6, %v4101_v47 }
 0x8df   :  { %v4119_v34 = vmin.f32 %v4115_v3, 0.0  ;;  %vm4117_vm15 = vcmp.gt.f32.partialorder %v4115_v3, 0.0 }
 0x8e1   :  { %v4122_v39 = vmul.f32 1.442695, %v4119_v34 }
 0x8e2   :  { %v4107_v60 = vpop.permute.xlu2 %4106 }
 0x8e3   :  { %5193 = vpow2.f32 %v4122_v39 }
 0x8e9   :  { %v5194_v4 = vpop.eup %5193 }
 0x8ea   :  { %v4943_v14 = vadd.f32 -1.0, %v5194_v4 }
 0x8ec   :  { %v4127_v63 = vsel %vm4117_vm15, %v4115_v3, %v4943_v14 }
 0x8ed   :  { %4944 = vmatpush.xpose.msk.msra.mxu1 %vm4034_vm7, %v4127_v63  ;;  %4948 = vmatpush.xpose.msk.msra.mxu2 %vm4034_vm7, %v4127_v63 }
 0x8fa   :  { %v4093_v36 = vpop.permute.xlu1 %4092 }
 0x8fb   :  { %v4100_v55 = vmul.f32 %v4093_v36, %v4050_v35 }
 0x8fd   :  { %v4114_v18 = vadd.f32 %v4107_v60, %v4100_v55 }
 0x8ff   :  { %v4118_v58 = vmin.f32 %v4114_v18, 0.0  ;;  %vm4116_vm0 = vcmp.gt.f32.partialorder %v4114_v18, 0.0 }
 0x901   :  { %v4120_v24 = vmul.f32 1.442695, %v4118_v58 }
 0x903   :  { %5195 = vpow2.f32 %v4120_v24 }
 0x909   :  { %v5196_v17 = vpop.eup %5195 }
 0x90a   :  { %v4942_v62 = vadd.f32 -1.0, %v5196_v17 }
 0x90c   :  { %v4126_v54 = vsel %vm4116_vm0, %v4114_v18, %v4942_v62 }
 0x90d   :  { %4945 = vmatpush.xpose.msk.msra.mxu1 %vm4034_vm7, %v4126_v54  ;;  %4949 = vmatpush.xpose.msk.msra.mxu2 %vm4034_vm7, %v4126_v54 }
 0x910   :  { %4950 = vmatmul.msk.f32.vlgmr.msra.gmra.mxu2 %vm4034_vm7, %v4947_v31  ;;  %4946 = vmatmul.msk.f32.vlgmr.msra.gmra.mxu1 %vm4034_vm7, %v4128_v61 }
 0x911   :  { %4228 = vmatpush.msrb.mxu1 %v4159_v43 }
 0x913   :  { %4229 = vmatpush.msrb.mxu1 %v4158_v38 }
 0x98d   :  { %v4155_v53 = vpop.f32.mrf.mxu1 }
 0x98e   :  { %4954 = vmatmul.msk.f32.vlgmr.msrb.gmra.mxu1 %vm1409_vm1, %v4155_v53 }
 0x993   :  { %v4182_v21 = vpop.f32.mrf.mxu2 }
 0x994   :  { %4953 = vmatmul.msk.f32.vlgmr.msrb.gmra.mxu0 %vm1409_vm1, %v4182_v21 }
 0xa0b   :  { %v4231_v13 = vpop.f32.mrf.mxu1 }
 0xa11   :  { %v4208_v56 = vpop.f32.mrf.mxu0 }
 0xa12   :  { %v4232_v0 = vadd.f32 %v4231_v13, %v4208_v56 }
 0xa14   :  { %v4235_v49 = vsel %vm4234_vm2, %v4232_v0, -inf }
 0xa15   :  { %4236 = vmax.xlane.f32.xlu1 %v4235_v49 }
 0xa88   :  { %v4237_v59 = vpop.xlane.xlu1 %4236 }
 0xa89   :  { %v4238_v48 = vsub.f32 %v4232_v0, %v4237_v59 }
 0xa8b   :  { %v4239_v30 = vmul.f32 1.442695, %v4238_v48 }
 0xa8d   :  { %5197 = vpow2.f32 %v4239_v30 }
 0xa93   :  { %v5198_v40 = vpop.eup %5197 }
 0xa94   :  { %v4241_v35 = vsel %vm4234_vm2, %v5198_v40, 0.0 }
 0xa95   :  { %4242 = vadd.xlane.f32.xlu2 %v4241_v35 }
 0xb08   :  { %v4243_v11 = vpop.xlane.xlu2 %4242 }
 0xb09   :  { %5199 = vlog2.f32 %v4243_v11 }
 0xb0f   :  { %v5200_v29 = vpop.eup %5199 }
 0xb10   :  { %v4245_v28 = vmul.f32 0.6931472, %v5200_v29 }
 0xb12   :  { %v4246_v37 = vsub.f32 %v4238_v48, %v4245_v28 }
 0xb14   :  { %4247 = vst.msk [vmem:[#allocation2] sm:$0x3] %vm4234_vm2, %v4246_v37 }
 0xb15   :  { %4258 = dma.vmem_to_hbm [thread:$0]  %s4254_s16, 32, %s4256_s11, [#allocation3]  }
 0xb16   :  { %5227 = dma.done.wait [#allocation3], 32  }
 0xb17   :  { %5228 = vsyncadd [#allocation3], 4294967264 }
 0xb18   :  { %4263 = vsyncpa [#allocation3], 1 }

</bundles_post_ra>
